<compile_context>
chip_gen: v7x
topology: tpu7x:2x2x1
jax: 0.10.0
libtpu: 0.0.40
codegen_flags: <defaults>
</compile_context>

<pallas_src>
import functools
import math

import jax
import jax.numpy as jnp
from jax.experimental import pallas as pl
from jax.experimental.pallas import tpu as pltpu  # noqa: F401  (TPU backend)

# ----------------------------- model hyper-parameters -----------------------------
DTYPE      = jnp.float32
B          = 2                              # image batch
IN_CH      = 3
IMG        = 16
PATCH      = 8
NUM_PATCH  = (IMG // PATCH) ** 2            # 4
VIS_SEQ    = 1 + NUM_PATCH                  # 5  (cls token + patches)
PATCH_DIM  = IN_CH * PATCH * PATCH          # 192
VIS_WIDTH  = 32
VIS_HEADS  = 2
CTX_DIM    = 64                             # text transformer width (ln_final width)
TXT_HEADS  = 2
EMBED_DIM  = 64                             # shared CLIP embedding dim
N_CLS      = 3
N_CTX      = 4                              # "a photo of a"
SEQ_LEN    = 16                             # text context length (real CLIP uses 77)
SUFFIX_LEN = SEQ_LEN - 1 - N_CTX            # 11
META_MID   = EMBED_DIM // 16                # 4

# ----------------------------- packed-parameter slab layouts -----------------------------
# visual 32-col matrix slab (row offsets are all multiples of 8):
_V32_CONV1  = 0
_V32_PROJW  = _V32_CONV1 + PATCH_DIM              # 192  (MLP proj_w, [4*VW, VW])
_V32_OUTW   = _V32_PROJW + 4 * VIS_WIDTH          # 320  (attn out_w, [VW, VW])
_V32_CLSPOS = _V32_OUTW + VIS_WIDTH               # 352  (cls+pos slab, [VIS_SEQ, VW])
# visual 128-col matrix slab rows: [0:VW] in_w(:3VW), [VW:2VW] fc_w(:4VW), [2VW:3VW] vproj(:E)
# visual vector slab rows (width 4*VW = 128):
(_VV_LNPRE_G, _VV_LNPRE_B, _VV_LN1_G, _VV_LN1_B, _VV_IN_B, _VV_OUT_B,
 _VV_LN2_G, _VV_LN2_B, _VV_FC_B, _VV_PJ_B, _VV_LNPOST_G, _VV_LNPOST_B) = range(12)
# text 64-col matrix slab row offsets:
_T64_OUTW  = 0
_T64_PROJW = _T64_OUTW + CTX_DIM                  # 64   (MLP proj_w, [4D, D])
_T64_TPROJ = _T64_PROJW + 4 * CTX_DIM             # 320  (text_projection, [D, E])
# text vector slab rows (width 4*D = 256):
(_TV_LN1_G, _TV_LN1_B, _TV_IN_B, _TV_OUT_B, _TV_LN2_G, _TV_LN2_B,
 _TV_FC_B, _TV_PJ_B, _TV_LNF_G, _TV_LNF_B) = range(10)
# meta / prompt-learner slab (width 64):
_MR_W1T = 0                                       # meta_w1 stored TRANSPOSED: [MID, E]
_MR_W2  = _MR_W1T + META_MID                      # meta_w2 [MID, D]
_MR_CTX = _MR_W2 + META_MID                       # ctx     [N_CTX, D]
_MR_B1  = _MR_CTX + N_CTX                         # meta_b1 (padded row)
_MR_B2  = _MR_B1 + 1                              # meta_b2 (row)
META_W  = max(EMBED_DIM, CTX_DIM)


# ============================ in-kernel math helpers ============================
def _mm(a, b):
    """MXU matmul, f32 operands / f32 accumulation (no per-operand casts — see header)."""
    return jnp.dot(a, b, preferred_element_type=jnp.float32)


def _mm_nt(a, b):
    """a @ b.T on the MXU, f32."""
    return jax.lax.dot_general(a, b, (((1,), (1,)), ((), ())),
                               preferred_element_type=jnp.float32)


def _ln(x, g, b, eps=1e-5):
    mu = jnp.mean(x, axis=-1, keepdims=True)
    xc = x - mu
    var = jnp.mean(xc * xc, axis=-1, keepdims=True)
    return xc * jax.lax.rsqrt(var + eps) * g + b


def _l2n(x):
    return x * jax.lax.rsqrt(jnp.sum(x * x, axis=-1, keepdims=True) + 1e-12)


def _block_flat(x, n_items, seq, n_heads, w, causal_mask):
    """One CLIP ResidualAttentionBlock on a flattened [n_items*seq, width] f32 activation.

    LN / QKV / MLP / output projection are single 2-D matmuls over all items; only the tiny
    [seq, seq] score/softmax/PV core is iterated per item (static slices — no reshapes)."""
    (ln1_g, ln1_b, in_w, in_b, out_w, out_b,
     ln2_g, ln2_b, fc_w, fc_b, pj_w, pj_b) = w
    NS, W = x.shape
    hd = W // n_heads

    # --- multi-head self-attention ---
    h = _ln(x, ln1_g, ln1_b)
    qkv = _mm(h, in_w) + in_b                                 # [NS, 3W] — one matmul
    q = qkv[:, 0:W] * (1.0 / math.sqrt(hd))                   # scale folded into q once
    k = qkv[:, W:2 * W]
    v = qkv[:, 2 * W:3 * W]

    item_ctx = []
    for i in range(n_items):                                  # attention core only
        rows = slice(i * seq, (i + 1) * seq)
        heads = []
        for hh in range(n_heads):
            cols = slice(hh * hd, (hh + 1) * hd)
            s = _mm_nt(q[rows, cols], k[rows, cols])          # [seq, seq]
            if causal_mask is not None:
                s = s + causal_mask
            s = s - jnp.max(s, axis=-1, keepdims=True)
            p = jnp.exp(s)
            p = p * pl.reciprocal(jnp.sum(p, axis=-1, keepdims=True), approx=True)
            heads.append(_mm(p, v[rows, cols]))               # [seq, hd]
        item_ctx.append(jnp.concatenate(heads, axis=-1))      # [seq, W]
    attn = jnp.concatenate(item_ctx, axis=0)                  # [NS, W]
    x = x + _mm(attn, out_w) + out_b                          # ONE output projection

    # --- MLP (QuickGELU) ---
    h = _ln(x, ln2_g, ln2_b)
    h = _mm(h, fc_w) + fc_b
    h = h * jax.nn.sigmoid(1.702 * h)
    h = _mm(h, pj_w) + pj_b
    return x + h


def _vision_tower(patches, v_vecs, v_m32, v_m128):
    """CLIP visual transformer on flattened [n_img*VIS_SEQ, PATCH_DIM] patches -> [n_img, E]."""
    VW = VIS_WIDTH
    n_img = patches.shape[0] // VIS_SEQ
    row = lambda r, n: v_vecs[r:r + 1, :n]                    # noqa: E731

    conv1_w = v_m32[_V32_CONV1:_V32_CONV1 + PATCH_DIM, :]
    cls_pos = v_m32[_V32_CLSPOS:_V32_CLSPOS + VIS_SEQ, :]     # class_embedding folded into row 0
    bw = (row(_VV_LN1_G, VW), row(_VV_LN1_B, VW),
          v_m128[0:VW, :3 * VW], row(_VV_IN_B, 3 * VW),
          v_m32[_V32_OUTW:_V32_OUTW + VW, :], row(_VV_OUT_B, VW),
          row(_VV_LN2_G, VW), row(_VV_LN2_B, VW),
          v_m128[VW:2 * VW, :4 * VW], row(_VV_FC_B, 4 * VW),
          v_m32[_V32_PROJW:_V32_PROJW + 4 * VW, :], row(_VV_PJ_B, VW))

    x = _mm(patches, conv1_w) + jnp.concatenate([cls_pos] * n_img, axis=0)   # [n_img*S, VW]
    x = _ln(x, row(_VV_LNPRE_G, VW), row(_VV_LNPRE_B, VW))
    x = _block_flat(x, n_img, VIS_SEQ, VIS_HEADS, bw, causal_mask=None)
    cls_tok = jnp.concatenate([x[i * VIS_SEQ:i * VIS_SEQ + 1, :] for i in range(n_img)], axis=0)
    f = _ln(cls_tok, row(_VV_LNPOST_G, VW), row(_VV_LNPOST_B, VW))
    return _mm(f, v_m128[2 * VW:3 * VW, :EMBED_DIM])                         # [n_img, E]


def _text_tower(prompts, eot_oh, t_vecs, t_in_w, t_fc_w, t_m64):
    """CLIP text transformer on flattened [n_prompts*SEQ, D] prompt embeddings (+pos already
    folded in by the caller) -> [n_prompts, E]."""
    D = CTX_DIM
    n_prompts = prompts.shape[0] // SEQ_LEN
    row = lambda r, n: t_vecs[r:r + 1, :n]                    # noqa: E731

    bw = (row(_TV_LN1_G, D), row(_TV_LN1_B, D),
          t_in_w, row(_TV_IN_B, 3 * D),
          t_m64[_T64_OUTW:_T64_OUTW + D, :], row(_TV_OUT_B, D),
          row(_TV_LN2_G, D), row(_TV_LN2_B, D),
          t_fc_w, row(_TV_FC_B, 4 * D),
          t_m64[_T64_PROJW:_T64_PROJW + 4 * D, :], row(_TV_PJ_B, D))

    # causal mask built ONCE per kernel (not per prompt)
    ri = jax.lax.broadcasted_iota(jnp.int32, (SEQ_LEN, SEQ_LEN), 0)
    ci = jax.lax.broadcasted_iota(jnp.int32, (SEQ_LEN, SEQ_LEN), 1)
    mask = jnp.where(ci > ri, jnp.float32(-1e9), jnp.float32(0.0))

    x = _block_flat(prompts, n_prompts, SEQ_LEN, TXT_HEADS, bw, causal_mask=mask)
    # EOT gather: ONE batched one-hot matmul, then ln_final on just the gathered rows
    # (LayerNorm is row-wise, so gathering first is exact).
    eot_rows = _mm(eot_oh, x)                                                # [NP, D]
    f = _ln(eot_rows, row(_TV_LNF_G, D), row(_TV_LNF_B, D))
    return _mm(f, t_m64[_T64_TPROJ:_T64_TPROJ + D, :])                       # [NP, E]


def _meta_bias(imf, meta):
    """meta_net (Linear -> ReLU -> Linear): the width-4 intermediate never leaves vregs."""
    w1t = meta[_MR_W1T:_MR_W1T + META_MID, :EMBED_DIM]        # stored transposed
    w2  = meta[_MR_W2:_MR_W2 + META_MID, :CTX_DIM]
    b1  = meta[_MR_B1:_MR_B1 + 1, :META_MID]
    b2  = meta[_MR_B2:_MR_B2 + 1, :CTX_DIM]
    h = jnp.maximum(_mm_nt(imf, w1t) + b1, 0.0)
    return _mm(h, w2) + b2                                    # [n, D]


# ================================== Pallas kernels ==================================
def _inference_kernel(patches_ref, eot_oh_ref, base_ref, scale_ref,
                      v_vecs_ref, v_m32_ref, v_m128_ref,
                      t_vecs_ref, t_in_w_ref, t_fc_w_ref, t_m64_ref, meta_ref,
                      o_ref):
    """Whole CoCoOpCLIP.inference() fused into one kernel."""
    f32 = jnp.float32

    # ---- visual tower + image-feature l2 norm ----
    imf = _l2n(_vision_tower(patches_ref[...], v_vecs_ref[...], v_m32_ref[...], v_m128_ref[...]))
    n_img = imf.shape[0]

    # ---- meta_net + CoCoOp prompt assembly ----
    # prompt(b, c) = [prefix(c) | ctx | suffix(c)] + pos   (precomputed per class: base_ref)
    #             +  bias(b) broadcast over the n_ctx slots (masked add)
    # which equals cat([prefix, ctx + bias_b, suffix]) + pos of the reference module.
    bias = _meta_bias(imf, meta_ref[...])                                    # [B, D]
    bias_rows = jnp.concatenate(
        [jnp.broadcast_to(bias[b:b + 1, :], (N_CLS * SEQ_LEN, CTX_DIM)) for b in range(n_img)],
        axis=0)                                                              # [NP*SEQ, D]
    seq_pos = jax.lax.broadcasted_iota(jnp.int32, (SEQ_LEN, 1), 0)
    ctx_mask = ((seq_pos >= 1) & (seq_pos < 1 + N_CTX)).astype(f32)          # [SEQ, 1]
    ctx_mask = jnp.concatenate([ctx_mask] * (n_img * N_CLS), axis=0)         # [NP*SEQ, 1]
    prompts = jnp.concatenate([base_ref[...]] * n_img, axis=0) + bias_rows * ctx_mask

    # ---- text tower + text-feature l2 norm ----
    tf = _l2n(_text_tower(prompts, eot_oh_ref[...], t_vecs_ref[...],
                          t_in_w_ref[...], t_fc_w_ref[...], t_m64_ref[...])) # [NP, E]

    # ---- per-image cosine logits (block-diagonal of imf @ tf.T), one block store ----
    logits = jnp.concatenate(
        [_mm_nt(imf[b:b + 1, :], tf[b * N_CLS:(b + 1) * N_CLS, :]) for b in range(n_img)],
        axis=0)                                                              # [B, n_cls]
    o_ref[...] = (logits * jnp.exp(scale_ref[...])).astype(o_ref.dtype)


def _gen_ctx_kernel(patches_ref, v_vecs_ref, v_m32_ref, v_m128_ref, meta_ref,
                    imf_ref, ctx_ref, *, aug):
    """CoCoOpCLIP.gen_ctx(): visual tower + meta_net (ctx_only branch) fused."""
    imf = _vision_tower(patches_ref[...], v_vecs_ref[...], v_m32_ref[...], v_m128_ref[...])
    imf_ref[...] = imf.astype(imf_ref.dtype)                 # raw (un-normalized) features
    avg = imf[0:1, :] if aug else jnp.mean(imf, axis=0, keepdims=True)
    bias = _meta_bias(avg, meta_ref[...])                    # [1, D]
    ctx = meta_ref[...][_MR_CTX:_MR_CTX + N_CTX, :CTX_DIM]
    ctx_ref[...] = (ctx + bias).astype(ctx_ref.dtype)        # [n_ctx, D]


def _forward_ctx_kernel(prompts_ref, eot_oh_ref, imf_ref, scale_ref,
                        t_vecs_ref, t_in_w_ref, t_fc_w_ref, t_m64_ref, o_ref):
    """CoCoOpCLIP.forward_ctx(): text tower + l2 norms + scaled cosine similarity fused."""
    tf = _l2n(_text_tower(prompts_ref[...], eot_oh_ref[...], t_vecs_ref[...],
                          t_in_w_ref[...], t_fc_w_ref[...], t_m64_ref[...]))   # [n_cls, E]
    imf = _l2n(imf_ref[...])                                                   # [B, E]
    sim = _mm_nt(imf, tf)                                                      # [B, n_cls]
    o_ref[...] = (sim * jnp.exp(scale_ref[...])).astype(o_ref.dtype)


# ================================ parameter packing ================================
def _pad_cols(m, width):
    m = jnp.asarray(m, DTYPE)
    m = m.reshape(1, -1) if m.ndim == 1 else m
    return jnp.pad(m, ((0, 0), (0, width - m.shape[-1])))


def _pack_vecs(vs, width):
    return jnp.concatenate([_pad_cols(v, width) for v in vs], axis=0)


def _pack_visual(vp):
    bp = vp["block"]
    v_vecs = _pack_vecs([vp["ln_pre_g"], vp["ln_pre_b"], bp["ln1_g"], bp["ln1_b"],
                         bp["in_b"], bp["out_b"], bp["ln2_g"], bp["ln2_b"],
                         bp["fc_b"], bp["proj_b"], vp["ln_post_g"], vp["ln_post_b"]],
                        width=4 * VIS_WIDTH)
    cls_pos = vp["pos_embedding"] + jnp.pad(vp["class_embedding"][None, :],
                                            ((0, NUM_PATCH), (0, 0)))
    v_m32 = jnp.concatenate([vp["conv1_w"], bp["proj_w"], bp["out_w"], cls_pos], axis=0)
    v_m128 = jnp.concatenate([_pad_cols(bp["in_w"], 4 * VIS_WIDTH),
                              _pad_cols(bp["fc_w"], 4 * VIS_WIDTH),
                              _pad_cols(vp["proj"], 4 * VIS_WIDTH)], axis=0)
    return v_vecs, v_m32, v_m128


def _pack_text(tp):
    bp = tp["block"]
    t_vecs = _pack_vecs([bp["ln1_g"], bp["ln1_b"], bp["in_b"], bp["out_b"],
                         bp["ln2_g"], bp["ln2_b"], bp["fc_b"], bp["proj_b"],
                         tp["ln_final_g"], tp["ln_final_b"]], width=4 * CTX_DIM)
    t_m64 = jnp.concatenate([bp["out_w"], bp["proj_w"], tp["text_projection"]], axis=0)
    return t_vecs, bp["in_w"], bp["fc_w"], t_m64


def _pack_meta(pp):
    return jnp.concatenate([_pad_cols(pp["meta_w1"].T, META_W),
                            _pad_cols(pp["meta_w2"], META_W),
                            _pad_cols(pp["ctx"], META_W),
                            _pad_cols(pp["meta_b1"], META_W),
                            _pad_cols(pp["meta_b2"], META_W)], axis=0)


def _base_prompts(pp, text_pos):
    """Per-class [prefix | ctx | suffix] + positional embedding, flattened to [n_cls*SEQ, D]."""
    ctx_b = jnp.broadcast_to(pp["ctx"][None], (N_CLS, N_CTX, CTX_DIM))
    base = jnp.concatenate([pp["token_prefix"], ctx_b, pp["token_suffix"]], axis=1)
    return (base + text_pos[None]).reshape(N_CLS * SEQ_LEN, CTX_DIM)


def _eot_onehot(tokenized, n_rep):
    """[n_rep*n_cls, n_rep*n_cls*SEQ] one-hot selecting each prompt's EOT row.  Uses the standard
    argmax(token id) trick (valid because the EOT id is the largest id, as in the real tokenizer)."""
    eot = jnp.argmax(tokenized, axis=-1)
    n_p = n_rep * tokenized.shape[0]
    flat = jnp.arange(n_p) * SEQ_LEN + jnp.tile(eot, (n_rep,))
    return jax.nn.one_hot(flat, n_p * SEQ_LEN, dtype=DTYPE)


def _patchify(image):
    n, c, hgt, wid = image.shape
    gh, gw = hgt // PATCH, wid // PATCH
    p = image.reshape(n, c, gh, PATCH, gw, PATCH)
    p = p.transpose(0, 2, 4, 1, 3, 5).reshape(n, gh * gw, c * PATCH * PATCH)
    z = jnp.zeros((n, 1, p.shape[-1]), p.dtype)               # class-token placeholder row
    return jnp.concatenate([z, p], axis=1).reshape(n * (1 + gh * gw), c * PATCH * PATCH)


# ================================ CoCoOpCLIP forward ================================
def inference(params, image):
    """CoCoOpCLIP.inference(): ONE fused pallas_call end-to-end."""
    n_img = image.shape[0]
    vp, tp, pp = params["visual"], params["text"], params["prompt"]
    v_vecs, v_m32, v_m128 = _pack_visual(vp)
    t_vecs, t_in_w, t_fc_w, t_m64 = _pack_text(tp)
    return pl.pallas_call(
        _inference_kernel,
        out_shape=jax.ShapeDtypeStruct((n_img, N_CLS), DTYPE),
    )(_patchify(image),
      _eot_onehot(pp["tokenized_prompts"], n_img),
      _base_prompts(pp, tp["pos_embedding"]),
      params["logit_scale"].reshape(1, 1),
      v_vecs, v_m32, v_m128,
      t_vecs, t_in_w, t_fc_w, t_m64,
      _pack_meta(pp))


def gen_ctx(params, image, aug=False):
    """CoCoOpCLIP.gen_ctx(): fused visual tower + meta_net.  One pallas_call."""
    vp, pp = params["visual"], params["prompt"]
    v_vecs, v_m32, v_m128 = _pack_visual(vp)
    imf, ctx = pl.pallas_call(
        functools.partial(_gen_ctx_kernel, aug=bool(aug)),
        out_shape=(jax.ShapeDtypeStruct((image.shape[0], EMBED_DIM), DTYPE),
                   jax.ShapeDtypeStruct((N_CTX, CTX_DIM), DTYPE)),
    )(_patchify(image), v_vecs, v_m32, v_m128, _pack_meta(pp))
    return imf, ctx.reshape(1, N_CTX, CTX_DIM)


def forward_ctx(params, image_features, ctx, cons=1.0, l2_norm_cal=False):
    """CoCoOpCLIP.forward_ctx(): fused text tower + l2 norms + scaled similarity.  One pallas_call.

    Prompt assembly uses only inputs/parameters (ctx comes from a previous call), so it is plain
    wrapper-side JAX and does not break the fusion."""
    tp, pp = params["text"], params["prompt"]
    ctx_b = jnp.broadcast_to(ctx.reshape(N_CTX, CTX_DIM)[None], (N_CLS, N_CTX, CTX_DIM))
    prompts = jnp.concatenate([pp["token_prefix"], ctx_b, pp["token_suffix"]], axis=1)
    prompts = (prompts + tp["pos_embedding"][None]).reshape(N_CLS * SEQ_LEN, CTX_DIM)
    t_vecs, t_in_w, t_fc_w, t_m64 = _pack_text(tp)
    # TODO(synk): the l2_norm_cal side statistics (prompt_mean / l2_norm_mean module attributes)
    # would need the un-fused text features as an extra kernel output; they do not affect the
    # returned logits and are omitted here.
    return pl.pallas_call(
        _forward_ctx_kernel,
        out_shape=jax.ShapeDtypeStruct((image_features.shape[0], N_CLS), DTYPE),
    )(prompts, _eot_onehot(pp["tokenized_prompts"], 1), image_features,
      params["logit_scale"].reshape(1, 1),
      t_vecs, t_in_w, t_fc_w, t_m64)


def cocoop_forward(params, inp, cons=1.0, args=None):
    if isinstance(inp, tuple):
        image_features, ctx = inp
        return forward_ctx(params, image_features, ctx, cons)
    return inference(params, inp)


# ================================= parameter init =================================
def init_params(key):
    keys = iter(jax.random.split(key, 64))

    def nrm(shape, std=0.02):
        return (std * jax.random.normal(next(keys), shape)).astype(DTYPE)

    def block_params(width):
        return dict(
            ln1_g=jnp.ones((width,), DTYPE), ln1_b=jnp.zeros((width,), DTYPE),
            in_w=nrm((width, 3 * width)),     in_b=jnp.zeros((3 * width,), DTYPE),
            out_w=nrm((width, width)),        out_b=jnp.zeros((width,), DTYPE),
            ln2_g=jnp.ones((width,), DTYPE), ln2_b=jnp.zeros((width,), DTYPE),
            fc_w=nrm((width, 4 * width)),     fc_b=jnp.zeros((4 * width,), DTYPE),
            proj_w=nrm((4 * width, width)),   proj_b=jnp.zeros((width,), DTYPE),
        )

    visual = dict(
        conv1_w=nrm((PATCH_DIM, VIS_WIDTH)),
        class_embedding=nrm((VIS_WIDTH,)),
        pos_embedding=nrm((VIS_SEQ, VIS_WIDTH)),
        ln_pre_g=jnp.ones((VIS_WIDTH,), DTYPE), ln_pre_b=jnp.zeros((VIS_WIDTH,), DTYPE),
        block=block_params(VIS_WIDTH),
        ln_post_g=jnp.ones((VIS_WIDTH,), DTYPE), ln_post_b=jnp.zeros((VIS_WIDTH,), DTYPE),
        proj=nrm((VIS_WIDTH, EMBED_DIM)),
    )
    text = dict(
        pos_embedding=nrm((SEQ_LEN, CTX_DIM)),
        block=block_params(CTX_DIM),
        ln_final_g=jnp.ones((CTX_DIM,), DTYPE), ln_final_b=jnp.zeros((CTX_DIM,), DTYPE),
        text_projection=nrm((CTX_DIM, EMBED_DIM)),
    )
    # synthetic tokenized prompts: "SOS a photo of a <name> . EOS" with varying name lengths
    eot_pos = jnp.array([7, 8, 9], dtype=jnp.int32)
    tok = jax.random.randint(next(keys), (N_CLS, SEQ_LEN), 1, 400, dtype=jnp.int32)
    tok = tok.at[jnp.arange(N_CLS), eot_pos].set(49407)        # EOT id is the max id (argmax trick)
    tok = jnp.where(jnp.arange(SEQ_LEN)[None, :] <= eot_pos[:, None], tok, 0)
    prompt = dict(
        ctx=nrm((N_CTX, CTX_DIM)),
        meta_w1=nrm((EMBED_DIM, META_MID)), meta_b1=jnp.zeros((META_MID,), DTYPE),
        meta_w2=nrm((META_MID, CTX_DIM)),   meta_b2=jnp.zeros((CTX_DIM,), DTYPE),
        token_prefix=nrm((N_CLS, 1, CTX_DIM)),
        token_suffix=nrm((N_CLS, SUFFIX_LEN, CTX_DIM)),
        tokenized_prompts=tok,
    )
    logit_scale = jnp.asarray(math.log(1.0 / 0.07), DTYPE)
    return dict(visual=visual, text=text, prompt=prompt, logit_scale=logit_scale)


# ====================================== main ======================================
if __name__ == "__main__":
    key = jax.random.PRNGKey(0)
    pkey, ikey = jax.random.split(key)
    params = init_params(pkey)
    image = jax.random.normal(ikey, (B, IN_CH, IMG, IMG)).astype(DTYPE)

    # branch 1: image input -> inference()   (1 pallas_call)
    logits = jax.block_until_ready(jax.jit(inference)(params, image))
    assert logits.shape == (B, N_CLS)
    assert bool(jnp.all(jnp.isfinite(logits)))

    # branch 2: tuple input -> gen_ctx() + forward_ctx()   (1 pallas_call each)
    imf, ctx = jax.jit(gen_ctx)(params, image)
    logits2 = jax.block_until_ready(jax.jit(forward_ctx)(params, imf, ctx))
    assert logits2.shape == (B, N_CLS)
    assert bool(jnp.all(jnp.isfinite(logits2)))

    print("KERNEL_OK")
</pallas_src>

<mosaic_0001>
module attributes {stable_mosaic.version = 11 : i64} {
  func.func @_inference_kernel(%arg0: memref<10x192xf32, #tpu.memory_space<vmem>>, %arg1: memref<6x96xf32, #tpu.memory_space<vmem>>, %arg2: memref<48x64xf32, #tpu.memory_space<vmem>>, %arg3: memref<1x1xf32, #tpu.memory_space<vmem>>, %arg4: memref<12x128xf32, #tpu.memory_space<vmem>>, %arg5: memref<357x32xf32, #tpu.memory_space<vmem>>, %arg6: memref<96x128xf32, #tpu.memory_space<vmem>>, %arg7: memref<10x256xf32, #tpu.memory_space<vmem>>, %arg8: memref<64x192xf32, #tpu.memory_space<vmem>>, %arg9: memref<64x256xf32, #tpu.memory_space<vmem>>, %arg10: memref<384x64xf32, #tpu.memory_space<vmem>>, %arg11: memref<14x64xf32, #tpu.memory_space<vmem>>, %arg12: memref<2x3xf32, #tpu.memory_space<vmem>>) attributes {dimension_semantics = [], scalar_prefetch = 0 : i64, scratch_operands = 0 : i64, tpu.core_type = #tpu.core_type<tc>} {
    %c0 = arith.constant 0 : index
    %c0_0 = arith.constant 0 : index
    %0 = vector.load %arg0[%c0, %c0_0] : memref<10x192xf32, #tpu.memory_space<vmem>>, vector<10x192xf32>
    %c0_1 = arith.constant 0 : index
    %c0_2 = arith.constant 0 : index
    %1 = vector.load %arg4[%c0_1, %c0_2] : memref<12x128xf32, #tpu.memory_space<vmem>>, vector<12x128xf32>
    %c0_3 = arith.constant 0 : index
    %c0_4 = arith.constant 0 : index
    %2 = vector.load %arg5[%c0_3, %c0_4] : memref<357x32xf32, #tpu.memory_space<vmem>>, vector<357x32xf32>
    %c0_5 = arith.constant 0 : index
    %c0_6 = arith.constant 0 : index
    %3 = vector.load %arg6[%c0_5, %c0_6] : memref<96x128xf32, #tpu.memory_space<vmem>>, vector<96x128xf32>
    %4 = vector.extract_strided_slice %2 {offsets = [0, 0], sizes = [192, 32], strides = [1, 1]} : vector<357x32xf32> to vector<192x32xf32>
    %5 = vector.extract_strided_slice %2 {offsets = [352, 0], sizes = [5, 32], strides = [1, 1]} : vector<357x32xf32> to vector<5x32xf32>
    %6 = vector.extract_strided_slice %1 {offsets = [2, 0], sizes = [1, 32], strides = [1, 1]} : vector<12x128xf32> to vector<1x32xf32>
    %7 = vector.extract_strided_slice %1 {offsets = [3, 0], sizes = [1, 32], strides = [1, 1]} : vector<12x128xf32> to vector<1x32xf32>
    %8 = vector.extract_strided_slice %3 {offsets = [0, 0], sizes = [32, 96], strides = [1, 1]} : vector<96x128xf32> to vector<32x96xf32>
    %9 = vector.extract_strided_slice %1 {offsets = [4, 0], sizes = [1, 96], strides = [1, 1]} : vector<12x128xf32> to vector<1x96xf32>
    %10 = vector.extract_strided_slice %2 {offsets = [320, 0], sizes = [32, 32], strides = [1, 1]} : vector<357x32xf32> to vector<32x32xf32>
    %11 = vector.extract_strided_slice %1 {offsets = [5, 0], sizes = [1, 32], strides = [1, 1]} : vector<12x128xf32> to vector<1x32xf32>
    %12 = vector.extract_strided_slice %1 {offsets = [6, 0], sizes = [1, 32], strides = [1, 1]} : vector<12x128xf32> to vector<1x32xf32>
    %13 = vector.extract_strided_slice %1 {offsets = [7, 0], sizes = [1, 32], strides = [1, 1]} : vector<12x128xf32> to vector<1x32xf32>
    %14 = vector.extract_strided_slice %3 {offsets = [32, 0], sizes = [32, 128], strides = [1, 1]} : vector<96x128xf32> to vector<32x128xf32>
    %15 = vector.extract_strided_slice %1 {offsets = [8, 0], sizes = [1, 128], strides = [1, 1]} : vector<12x128xf32> to vector<1x128xf32>
    %16 = vector.extract_strided_slice %2 {offsets = [192, 0], sizes = [128, 32], strides = [1, 1]} : vector<357x32xf32> to vector<128x32xf32>
    %17 = vector.extract_strided_slice %1 {offsets = [9, 0], sizes = [1, 32], strides = [1, 1]} : vector<12x128xf32> to vector<1x32xf32>
    %cst = arith.constant dense<0.000000e+00> : vector<10x32xf32>
    %18 = tpu.matmul %0, %4, %cst {dimension_numbers = #tpu.dot_dimension_numbers<[1], [0], [0], [1], [0, 0, 1, 1], [], []>} : vector<10x192xf32>, vector<192x32xf32>, vector<10x32xf32> -> vector<10x32xf32>
    %19 = tpu.concatenate %5, %5 in 0 : vector<5x32xf32>, vector<5x32xf32> -> vector<10x32xf32>
    %20 = arith.addf %18, %19 : vector<10x32xf32>
    %21 = vector.extract_strided_slice %1 {offsets = [0, 0], sizes = [1, 32], strides = [1, 1]} : vector<12x128xf32> to vector<1x32xf32>
    %22 = vector.extract_strided_slice %1 {offsets = [1, 0], sizes = [1, 32], strides = [1, 1]} : vector<12x128xf32> to vector<1x32xf32>
    %cst_7 = arith.constant dense<0.000000e+00> : vector<10xf32>
    %23 = vector.multi_reduction <add>, %20, %cst_7 [1] : vector<10x32xf32> to vector<10xf32>
    %24 = vector.shape_cast %23 : vector<10xf32> to vector<10x1xf32>
    %cst_8 = arith.constant 3.200000e+01 : f32
    %25 = vector.broadcast %cst_8 : f32 to vector<10x1xf32>
    %26 = arith.divf %24, %25 : vector<10x1xf32>
    %27 = vector.broadcast %26 : vector<10x1xf32> to vector<10x32xf32>
    %28 = arith.subf %20, %27 : vector<10x32xf32>
    %29 = arith.mulf %28, %28 : vector<10x32xf32>
    %cst_9 = arith.constant dense<0.000000e+00> : vector<10xf32>
    %30 = vector.multi_reduction <add>, %29, %cst_9 [1] : vector<10x32xf32> to vector<10xf32>
    %31 = vector.shape_cast %30 : vector<10xf32> to vector<10x1xf32>
    %cst_10 = arith.constant 3.200000e+01 : f32
    %32 = vector.broadcast %cst_10 : f32 to vector<10x1xf32>
    %33 = arith.divf %31, %32 : vector<10x1xf32>
    %cst_11 = arith.constant 9.99999974E-6 : f32
    %34 = vector.broadcast %cst_11 : f32 to vector<10x1xf32>
    %35 = arith.addf %33, %34 : vector<10x1xf32>
    %36 = math.rsqrt %35 : vector<10x1xf32>
    %37 = vector.broadcast %36 : vector<10x1xf32> to vector<10x32xf32>
    %38 = arith.mulf %28, %37 : vector<10x32xf32>
    %39 = vector.broadcast %21 : vector<1x32xf32> to vector<10x32xf32>
    %40 = arith.mulf %38, %39 : vector<10x32xf32>
    %41 = vector.broadcast %22 : vector<1x32xf32> to vector<10x32xf32>
    %42 = arith.addf %40, %41 : vector<10x32xf32>
    %cst_12 = arith.constant dense<0.000000e+00> : vector<10xf32>
    %43 = vector.multi_reduction <add>, %42, %cst_12 [1] : vector<10x32xf32> to vector<10xf32>
    %44 = vector.shape_cast %43 : vector<10xf32> to vector<10x1xf32>
    %cst_13 = arith.constant 3.200000e+01 : f32
    %45 = vector.broadcast %cst_13 : f32 to vector<10x1xf32>
    %46 = arith.divf %44, %45 : vector<10x1xf32>
    %47 = vector.broadcast %46 : vector<10x1xf32> to vector<10x32xf32>
    %48 = arith.subf %42, %47 : vector<10x32xf32>
    %49 = arith.mulf %48, %48 : vector<10x32xf32>
    %cst_14 = arith.constant dense<0.000000e+00> : vector<10xf32>
    %50 = vector.multi_reduction <add>, %49, %cst_14 [1] : vector<10x32xf32> to vector<10xf32>
    %51 = vector.shape_cast %50 : vector<10xf32> to vector<10x1xf32>
    %cst_15 = arith.constant 3.200000e+01 : f32
    %52 = vector.broadcast %cst_15 : f32 to vector<10x1xf32>
    %53 = arith.divf %51, %52 : vector<10x1xf32>
    %cst_16 = arith.constant 9.99999974E-6 : f32
    %54 = vector.broadcast %cst_16 : f32 to vector<10x1xf32>
    %55 = arith.addf %53, %54 : vector<10x1xf32>
    %56 = math.rsqrt %55 : vector<10x1xf32>
    %57 = vector.broadcast %56 : vector<10x1xf32> to vector<10x32xf32>
    %58 = arith.mulf %48, %57 : vector<10x32xf32>
    %59 = vector.broadcast %6 : vector<1x32xf32> to vector<10x32xf32>
    %60 = arith.mulf %58, %59 : vector<10x32xf32>
    %61 = vector.broadcast %7 : vector<1x32xf32> to vector<10x32xf32>
    %62 = arith.addf %60, %61 : vector<10x32xf32>
    %cst_17 = arith.constant dense<0.000000e+00> : vector<10x96xf32>
    %63 = tpu.matmul %62, %8, %cst_17 {dimension_numbers = #tpu.dot_dimension_numbers<[1], [0], [0], [1], [0, 0, 1, 1], [], []>} : vector<10x32xf32>, vector<32x96xf32>, vector<10x96xf32> -> vector<10x96xf32>
    %64 = vector.broadcast %9 : vector<1x96xf32> to vector<10x96xf32>
    %65 = arith.addf %63, %64 : vector<10x96xf32>
    %66 = vector.extract_strided_slice %65 {offsets = [0, 0], sizes = [10, 32], strides = [1, 1]} : vector<10x96xf32> to vector<10x32xf32>
    %cst_18 = arith.constant 2.500000e-01 : f32
    %67 = vector.broadcast %cst_18 : f32 to vector<10x32xf32>
    %68 = arith.mulf %66, %67 : vector<10x32xf32>
    %69 = vector.extract_strided_slice %65 {offsets = [0, 32], sizes = [10, 32], strides = [1, 1]} : vector<10x96xf32> to vector<10x32xf32>
    %70 = vector.extract_strided_slice %65 {offsets = [0, 64], sizes = [10, 32], strides = [1, 1]} : vector<10x96xf32> to vector<10x32xf32>
    %71 = vector.extract_strided_slice %68 {offsets = [0, 0], sizes = [5, 16], strides = [1, 1]} : vector<10x32xf32> to vector<5x16xf32>
    %72 = vector.extract_strided_slice %69 {offsets = [0, 0], sizes = [5, 16], strides = [1, 1]} : vector<10x32xf32> to vector<5x16xf32>
    %cst_19 = arith.constant dense<0.000000e+00> : vector<5x5xf32>
    %73 = tpu.matmul %71, %72, %cst_19 {dimension_numbers = #tpu.dot_dimension_numbers<[1], [1], [0], [0], [0, 0, 1, 0], [], []>} : vector<5x16xf32>, vector<5x16xf32>, vector<5x5xf32> -> vector<5x5xf32>
    %cst_20 = arith.constant dense<0xFF800000> : vector<5xf32>
    %74 = vector.multi_reduction <maximumf>, %73, %cst_20 [1] : vector<5x5xf32> to vector<5xf32>
    %75 = vector.shape_cast %74 : vector<5xf32> to vector<5x1xf32>
    %76 = vector.broadcast %75 : vector<5x1xf32> to vector<5x5xf32>
    %77 = arith.subf %73, %76 : vector<5x5xf32>
    %78 = math.exp %77 : vector<5x5xf32>
    %cst_21 = arith.constant dense<0.000000e+00> : vector<5xf32>
    %79 = vector.multi_reduction <add>, %78, %cst_21 [1] : vector<5x5xf32> to vector<5xf32>
    %80 = vector.shape_cast %79 : vector<5xf32> to vector<5x1xf32>
    %81 = tpu.reciprocal %80 {approx = true} : vector<5x1xf32> -> vector<5x1xf32>
    %82 = vector.broadcast %81 : vector<5x1xf32> to vector<5x5xf32>
    %83 = arith.mulf %78, %82 : vector<5x5xf32>
    %84 = vector.extract_strided_slice %70 {offsets = [0, 0], sizes = [5, 16], strides = [1, 1]} : vector<10x32xf32> to vector<5x16xf32>
    %cst_22 = arith.constant dense<0.000000e+00> : vector<5x16xf32>
    %85 = tpu.matmul %83, %84, %cst_22 {dimension_numbers = #tpu.dot_dimension_numbers<[1], [0], [0], [1], [0, 0, 1, 1], [], []>} : vector<5x5xf32>, vector<5x16xf32>, vector<5x16xf32> -> vector<5x16xf32>
    %86 = vector.extract_strided_slice %68 {offsets = [0, 16], sizes = [5, 16], strides = [1, 1]} : vector<10x32xf32> to vector<5x16xf32>
    %87 = vector.extract_strided_slice %69 {offsets = [0, 16], sizes = [5, 16], strides = [1, 1]} : vector<10x32xf32> to vector<5x16xf32>
    %cst_23 = arith.constant dense<0.000000e+00> : vector<5x5xf32>
    %88 = tpu.matmul %86, %87, %cst_23 {dimension_numbers = #tpu.dot_dimension_numbers<[1], [1], [0], [0], [0, 0, 1, 0], [], []>} : vector<5x16xf32>, vector<5x16xf32>, vector<5x5xf32> -> vector<5x5xf32>
    %cst_24 = arith.constant dense<0xFF800000> : vector<5xf32>
    %89 = vector.multi_reduction <maximumf>, %88, %cst_24 [1] : vector<5x5xf32> to vector<5xf32>
    %90 = vector.shape_cast %89 : vector<5xf32> to vector<5x1xf32>
    %91 = vector.broadcast %90 : vector<5x1xf32> to vector<5x5xf32>
    %92 = arith.subf %88, %91 : vector<5x5xf32>
    %93 = math.exp %92 : vector<5x5xf32>
    %cst_25 = arith.constant dense<0.000000e+00> : vector<5xf32>
    %94 = vector.multi_reduction <add>, %93, %cst_25 [1] : vector<5x5xf32> to vector<5xf32>
    %95 = vector.shape_cast %94 : vector<5xf32> to vector<5x1xf32>
    %96 = tpu.reciprocal %95 {approx = true} : vector<5x1xf32> -> vector<5x1xf32>
    %97 = vector.broadcast %96 : vector<5x1xf32> to vector<5x5xf32>
    %98 = arith.mulf %93, %97 : vector<5x5xf32>
    %99 = vector.extract_strided_slice %70 {offsets = [0, 16], sizes = [5, 16], strides = [1, 1]} : vector<10x32xf32> to vector<5x16xf32>
    %cst_26 = arith.constant dense<0.000000e+00> : vector<5x16xf32>
    %100 = tpu.matmul %98, %99, %cst_26 {dimension_numbers = #tpu.dot_dimension_numbers<[1], [0], [0], [1], [0, 0, 1, 1], [], []>} : vector<5x5xf32>, vector<5x16xf32>, vector<5x16xf32> -> vector<5x16xf32>
    %101 = tpu.concatenate %85, %100 in 1 : vector<5x16xf32>, vector<5x16xf32> -> vector<5x32xf32>
    %102 = vector.extract_strided_slice %68 {offsets = [5, 0], sizes = [5, 16], strides = [1, 1]} : vector<10x32xf32> to vector<5x16xf32>
    %103 = vector.extract_strided_slice %69 {offsets = [5, 0], sizes = [5, 16], strides = [1, 1]} : vector<10x32xf32> to vector<5x16xf32>
    %cst_27 = arith.constant dense<0.000000e+00> : vector<5x5xf32>
    %104 = tpu.matmul %102, %103, %cst_27 {dimension_numbers = #tpu.dot_dimension_numbers<[1], [1], [0], [0], [0, 0, 1, 0], [], []>} : vector<5x16xf32>, vector<5x16xf32>, vector<5x5xf32> -> vector<5x5xf32>
    %cst_28 = arith.constant dense<0xFF800000> : vector<5xf32>
    %105 = vector.multi_reduction <maximumf>, %104, %cst_28 [1] : vector<5x5xf32> to vector<5xf32>
    %106 = vector.shape_cast %105 : vector<5xf32> to vector<5x1xf32>
    %107 = vector.broadcast %106 : vector<5x1xf32> to vector<5x5xf32>
    %108 = arith.subf %104, %107 : vector<5x5xf32>
    %109 = math.exp %108 : vector<5x5xf32>
    %cst_29 = arith.constant dense<0.000000e+00> : vector<5xf32>
    %110 = vector.multi_reduction <add>, %109, %cst_29 [1] : vector<5x5xf32> to vector<5xf32>
    %111 = vector.shape_cast %110 : vector<5xf32> to vector<5x1xf32>
    %112 = tpu.reciprocal %111 {approx = true} : vector<5x1xf32> -> vector<5x1xf32>
    %113 = vector.broadcast %112 : vector<5x1xf32> to vector<5x5xf32>
    %114 = arith.mulf %109, %113 : vector<5x5xf32>
    %115 = vector.extract_strided_slice %70 {offsets = [5, 0], sizes = [5, 16], strides = [1, 1]} : vector<10x32xf32> to vector<5x16xf32>
    %cst_30 = arith.constant dense<0.000000e+00> : vector<5x16xf32>
    %116 = tpu.matmul %114, %115, %cst_30 {dimension_numbers = #tpu.dot_dimension_numbers<[1], [0], [0], [1], [0, 0, 1, 1], [], []>} : vector<5x5xf32>, vector<5x16xf32>, vector<5x16xf32> -> vector<5x16xf32>
    %117 = vector.extract_strided_slice %68 {offsets = [5, 16], sizes = [5, 16], strides = [1, 1]} : vector<10x32xf32> to vector<5x16xf32>
    %118 = vector.extract_strided_slice %69 {offsets = [5, 16], sizes = [5, 16], strides = [1, 1]} : vector<10x32xf32> to vector<5x16xf32>
    %cst_31 = arith.constant dense<0.000000e+00> : vector<5x5xf32>
    %119 = tpu.matmul %117, %118, %cst_31 {dimension_numbers = #tpu.dot_dimension_numbers<[1], [1], [0], [0], [0, 0, 1, 0], [], []>} : vector<5x16xf32>, vector<5x16xf32>, vector<5x5xf32> -> vector<5x5xf32>
    %cst_32 = arith.constant dense<0xFF800000> : vector<5xf32>
    %120 = vector.multi_reduction <maximumf>, %119, %cst_32 [1] : vector<5x5xf32> to vector<5xf32>
    %121 = vector.shape_cast %120 : vector<5xf32> to vector<5x1xf32>
    %122 = vector.broadcast %121 : vector<5x1xf32> to vector<5x5xf32>
    %123 = arith.subf %119, %122 : vector<5x5xf32>
    %124 = math.exp %123 : vector<5x5xf32>
    %cst_33 = arith.constant dense<0.000000e+00> : vector<5xf32>
    %125 = vector.multi_reduction <add>, %124, %cst_33 [1] : vector<5x5xf32> to vector<5xf32>
    %126 = vector.shape_cast %125 : vector<5xf32> to vector<5x1xf32>
    %127 = tpu.reciprocal %126 {approx = true} : vector<5x1xf32> -> vector<5x1xf32>
    %128 = vector.broadcast %127 : vector<5x1xf32> to vector<5x5xf32>
    %129 = arith.mulf %124, %128 : vector<5x5xf32>
    %130 = vector.extract_strided_slice %70 {offsets = [5, 16], sizes = [5, 16], strides = [1, 1]} : vector<10x32xf32> to vector<5x16xf32>
    %cst_34 = arith.constant dense<0.000000e+00> : vector<5x16xf32>
    %131 = tpu.matmul %129, %130, %cst_34 {dimension_numbers = #tpu.dot_dimension_numbers<[1], [0], [0], [1], [0, 0, 1, 1], [], []>} : vector<5x5xf32>, vector<5x16xf32>, vector<5x16xf32> -> vector<5x16xf32>
    %132 = tpu.concatenate %116, %131 in 1 : vector<5x16xf32>, vector<5x16xf32> -> vector<5x32xf32>
    %133 = tpu.concatenate %101, %132 in 0 : vector<5x32xf32>, vector<5x32xf32> -> vector<10x32xf32>
    %cst_35 = arith.constant dense<0.000000e+00> : vector<10x32xf32>
    %134 = tpu.matmul %133, %10, %cst_35 {dimension_numbers = #tpu.dot_dimension_numbers<[1], [0], [0], [1], [0, 0, 1, 1], [], []>} : vector<10x32xf32>, vector<32x32xf32>, vector<10x32xf32> -> vector<10x32xf32>
    %135 = arith.addf %42, %134 : vector<10x32xf32>
    %136 = vector.broadcast %11 : vector<1x32xf32> to vector<10x32xf32>
    %137 = arith.addf %135, %136 : vector<10x32xf32>
    %cst_36 = arith.constant dense<0.000000e+00> : vector<10xf32>
    %138 = vector.multi_reduction <add>, %137, %cst_36 [1] : vector<10x32xf32> to vector<10xf32>
    %139 = vector.shape_cast %138 : vector<10xf32> to vector<10x1xf32>
    %cst_37 = arith.constant 3.200000e+01 : f32
    %140 = vector.broadcast %cst_37 : f32 to vector<10x1xf32>
    %141 = arith.divf %139, %140 : vector<10x1xf32>
    %142 = vector.broadcast %141 : vector<10x1xf32> to vector<10x32xf32>
    %143 = arith.subf %137, %142 : vector<10x32xf32>
    %144 = arith.mulf %143, %143 : vector<10x32xf32>
    %cst_38 = arith.constant dense<0.000000e+00> : vector<10xf32>
    %145 = vector.multi_reduction <add>, %144, %cst_38 [1] : vector<10x32xf32> to vector<10xf32>
    %146 = vector.shape_cast %145 : vector<10xf32> to vector<10x1xf32>
    %cst_39 = arith.constant 3.200000e+01 : f32
    %147 = vector.broadcast %cst_39 : f32 to vector<10x1xf32>
    %148 = arith.divf %146, %147 : vector<10x1xf32>
    %cst_40 = arith.constant 9.99999974E-6 : f32
    %149 = vector.broadcast %cst_40 : f32 to vector<10x1xf32>
    %150 = arith.addf %148, %149 : vector<10x1xf32>
    %151 = math.rsqrt %150 : vector<10x1xf32>
    %152 = vector.broadcast %151 : vector<10x1xf32> to vector<10x32xf32>
    %153 = arith.mulf %143, %152 : vector<10x32xf32>
    %154 = vector.broadcast %12 : vector<1x32xf32> to vector<10x32xf32>
    %155 = arith.mulf %153, %154 : vector<10x32xf32>
    %156 = vector.broadcast %13 : vector<1x32xf32> to vector<10x32xf32>
    %157 = arith.addf %155, %156 : vector<10x32xf32>
    %cst_41 = arith.constant dense<0.000000e+00> : vector<10x128xf32>
    %158 = tpu.matmul %157, %14, %cst_41 {dimension_numbers = #tpu.dot_dimension_numbers<[1], [0], [0], [1], [0, 0, 1, 1], [], []>} : vector<10x32xf32>, vector<32x128xf32>, vector<10x128xf32> -> vector<10x128xf32>
    %159 = vector.broadcast %15 : vector<1x128xf32> to vector<10x128xf32>
    %160 = arith.addf %158, %159 : vector<10x128xf32>
    %cst_42 = arith.constant 1.702000e+00 : f32
    %161 = vector.broadcast %cst_42 : f32 to vector<10x128xf32>
    %162 = arith.mulf %161, %160 : vector<10x128xf32>
    %163 = arith.negf %162 : vector<10x128xf32>
    %164 = math.exp %163 : vector<10x128xf32>
    %cst_43 = arith.constant 1.000000e+00 : f32
    %165 = vector.broadcast %cst_43 : f32 to vector<10x128xf32>
    %166 = arith.addf %165, %164 : vector<10x128xf32>
    %167 = arith.divf %165, %166 : vector<10x128xf32>
    %168 = arith.mulf %160, %167 : vector<10x128xf32>
    %cst_44 = arith.constant dense<0.000000e+00> : vector<10x32xf32>
    %169 = tpu.matmul %168, %16, %cst_44 {dimension_numbers = #tpu.dot_dimension_numbers<[1], [0], [0], [1], [0, 0, 1, 1], [], []>} : vector<10x128xf32>, vector<128x32xf32>, vector<10x32xf32> -> vector<10x32xf32>
    %170 = vector.broadcast %17 : vector<1x32xf32> to vector<10x32xf32>
    %171 = arith.addf %169, %170 : vector<10x32xf32>
    %172 = arith.addf %137, %171 : vector<10x32xf32>
    %173 = vector.extract_strided_slice %172 {offsets = [0, 0], sizes = [1, 32], strides = [1, 1]} : vector<10x32xf32> to vector<1x32xf32>
    %174 = vector.extract_strided_slice %172 {offsets = [5, 0], sizes = [1, 32], strides = [1, 1]} : vector<10x32xf32> to vector<1x32xf32>
    %175 = tpu.concatenate %173, %174 in 0 : vector<1x32xf32>, vector<1x32xf32> -> vector<2x32xf32>
    %176 = vector.extract_strided_slice %1 {offsets = [10, 0], sizes = [1, 32], strides = [1, 1]} : vector<12x128xf32> to vector<1x32xf32>
    %177 = vector.extract_strided_slice %1 {offsets = [11, 0], sizes = [1, 32], strides = [1, 1]} : vector<12x128xf32> to vector<1x32xf32>
    %cst_45 = arith.constant dense<0.000000e+00> : vector<2xf32>
    %178 = vector.multi_reduction <add>, %175, %cst_45 [1] : vector<2x32xf32> to vector<2xf32>
    %179 = vector.shape_cast %178 : vector<2xf32> to vector<2x1xf32>
    %cst_46 = arith.constant 3.200000e+01 : f32
    %180 = vector.broadcast %cst_46 : f32 to vector<2x1xf32>
    %181 = arith.divf %179, %180 : vector<2x1xf32>
    %182 = vector.broadcast %181 : vector<2x1xf32> to vector<2x32xf32>
    %183 = arith.subf %175, %182 : vector<2x32xf32>
    %184 = arith.mulf %183, %183 : vector<2x32xf32>
    %cst_47 = arith.constant dense<0.000000e+00> : vector<2xf32>
    %185 = vector.multi_reduction <add>, %184, %cst_47 [1] : vector<2x32xf32> to vector<2xf32>
    %186 = vector.shape_cast %185 : vector<2xf32> to vector<2x1xf32>
    %cst_48 = arith.constant 3.200000e+01 : f32
    %187 = vector.broadcast %cst_48 : f32 to vector<2x1xf32>
    %188 = arith.divf %186, %187 : vector<2x1xf32>
    %cst_49 = arith.constant 9.99999974E-6 : f32
    %189 = vector.broadcast %cst_49 : f32 to vector<2x1xf32>
    %190 = arith.addf %188, %189 : vector<2x1xf32>
    %191 = math.rsqrt %190 : vector<2x1xf32>
    %192 = vector.broadcast %191 : vector<2x1xf32> to vector<2x32xf32>
    %193 = arith.mulf %183, %192 : vector<2x32xf32>
    %194 = vector.broadcast %176 : vector<1x32xf32> to vector<2x32xf32>
    %195 = arith.mulf %193, %194 : vector<2x32xf32>
    %196 = vector.broadcast %177 : vector<1x32xf32> to vector<2x32xf32>
    %197 = arith.addf %195, %196 : vector<2x32xf32>
    %198 = vector.extract_strided_slice %3 {offsets = [64, 0], sizes = [32, 64], strides = [1, 1]} : vector<96x128xf32> to vector<32x64xf32>
    %cst_50 = arith.constant dense<0.000000e+00> : vector<2x64xf32>
    %199 = tpu.matmul %197, %198, %cst_50 {dimension_numbers = #tpu.dot_dimension_numbers<[1], [0], [0], [1], [0, 0, 1, 1], [], []>} : vector<2x32xf32>, vector<32x64xf32>, vector<2x64xf32> -> vector<2x64xf32>
    %200 = arith.mulf %199, %199 : vector<2x64xf32>
    %cst_51 = arith.constant dense<0.000000e+00> : vector<2xf32>
    %201 = vector.multi_reduction <add>, %200, %cst_51 [1] : vector<2x64xf32> to vector<2xf32>
    %202 = vector.shape_cast %201 : vector<2xf32> to vector<2x1xf32>
    %cst_52 = arith.constant 9.99999996E-13 : f32
    %203 = vector.broadcast %cst_52 : f32 to vector<2x1xf32>
    %204 = arith.addf %202, %203 : vector<2x1xf32>
    %205 = math.rsqrt %204 : vector<2x1xf32>
    %206 = vector.broadcast %205 : vector<2x1xf32> to vector<2x64xf32>
    %207 = arith.mulf %199, %206 : vector<2x64xf32>
    %c0_53 = arith.constant 0 : index
    %c0_54 = arith.constant 0 : index
    %208 = vector.load %arg11[%c0_53, %c0_54] : memref<14x64xf32, #tpu.memory_space<vmem>>, vector<14x64xf32>
    %209 = vector.extract_strided_slice %208 {offsets = [0, 0], sizes = [4, 64], strides = [1, 1]} : vector<14x64xf32> to vector<4x64xf32>
    %210 = vector.extract_strided_slice %208 {offsets = [4, 0], sizes = [4, 64], strides = [1, 1]} : vector<14x64xf32> to vector<4x64xf32>
    %211 = vector.extract_strided_slice %208 {offsets = [12, 0], sizes = [1, 4], strides = [1, 1]} : vector<14x64xf32> to vector<1x4xf32>
    %212 = vector.extract_strided_slice %208 {offsets = [13, 0], sizes = [1, 64], strides = [1, 1]} : vector<14x64xf32> to vector<1x64xf32>
    %cst_55 = arith.constant dense<0.000000e+00> : vector<2x4xf32>
    %213 = tpu.matmul %207, %209, %cst_55 {dimension_numbers = #tpu.dot_dimension_numbers<[1], [1], [0], [0], [0, 0, 1, 0], [], []>} : vector<2x64xf32>, vector<4x64xf32>, vector<2x4xf32> -> vector<2x4xf32>
    %214 = vector.broadcast %211 : vector<1x4xf32> to vector<2x4xf32>
    %215 = arith.addf %213, %214 : vector<2x4xf32>
    %cst_56 = arith.constant 0.000000e+00 : f32
    %216 = vector.broadcast %cst_56 : f32 to vector<2x4xf32>
    %217 = arith.maximumf %215, %216 : vector<2x4xf32>
    %cst_57 = arith.constant dense<0.000000e+00> : vector<2x64xf32>
    %218 = tpu.matmul %217, %210, %cst_57 {dimension_numbers = #tpu.dot_dimension_numbers<[1], [0], [0], [1], [0, 0, 1, 1], [], []>} : vector<2x4xf32>, vector<4x64xf32>, vector<2x64xf32> -> vector<2x64xf32>
    %219 = vector.broadcast %212 : vector<1x64xf32> to vector<2x64xf32>
    %220 = arith.addf %218, %219 : vector<2x64xf32>
    %221 = vector.extract_strided_slice %220 {offsets = [0, 0], sizes = [1, 64], strides = [1, 1]} : vector<2x64xf32> to vector<1x64xf32>
    %222 = vector.shape_cast %221 : vector<1x64xf32> to vector<1x64xf32>
    %223 = vector.broadcast %222 : vector<1x64xf32> to vector<48x64xf32>
    %224 = vector.extract_strided_slice %220 {offsets = [1, 0], sizes = [1, 64], strides = [1, 1]} : vector<2x64xf32> to vector<1x64xf32>
    %225 = vector.shape_cast %224 : vector<1x64xf32> to vector<1x64xf32>
    %226 = vector.broadcast %225 : vector<1x64xf32> to vector<48x64xf32>
    %227 = tpu.concatenate %223, %226 in 0 : vector<48x64xf32>, vector<48x64xf32> -> vector<96x64xf32>
    %228 = tpu.iota {dimensions = array<i32: 0>} : vector<16x1xi32>
    %c1_i32 = arith.constant 1 : i32
    %229 = vector.broadcast %c1_i32 : i32 to vector<16x1xi32>
    %230 = arith.cmpi sge, %228, %229 : vector<16x1xi32>
    %c5_i32 = arith.constant 5 : i32
    %231 = vector.broadcast %c5_i32 : i32 to vector<16x1xi32>
    %232 = arith.cmpi slt, %228, %231 : vector<16x1xi32>
    %233 = arith.andi %230, %232 : vector<16x1xi1>
    %234 = arith.extui %233 : vector<16x1xi1> to vector<16x1xi32>
    %235 = arith.sitofp %234 : vector<16x1xi32> to vector<16x1xf32>
    %236 = tpu.concatenate %235, %235, %235, %235, %235, %235 in 0 : vector<16x1xf32>, vector<16x1xf32>, vector<16x1xf32>, vector<16x1xf32>, vector<16x1xf32>, vector<16x1xf32> -> vector<96x1xf32>
    %c0_58 = arith.constant 0 : index
    %c0_59 = arith.constant 0 : index
    %237 = vector.load %arg2[%c0_58, %c0_59] : memref<48x64xf32, #tpu.memory_space<vmem>>, vector<48x64xf32>
    %238 = tpu.concatenate %237, %237 in 0 : vector<48x64xf32>, vector<48x64xf32> -> vector<96x64xf32>
    %239 = vector.broadcast %236 : vector<96x1xf32> to vector<96x64xf32>
    %240 = arith.mulf %227, %239 : vector<96x64xf32>
    %241 = arith.addf %238, %240 : vector<96x64xf32>
    %c0_60 = arith.constant 0 : index
    %c0_61 = arith.constant 0 : index
    %242 = vector.load %arg1[%c0_60, %c0_61] : memref<6x96xf32, #tpu.memory_space<vmem>>, vector<6x96xf32>
    %c0_62 = arith.constant 0 : index
    %c0_63 = arith.constant 0 : index
    %243 = vector.load %arg7[%c0_62, %c0_63] : memref<10x256xf32, #tpu.memory_space<vmem>>, vector<10x256xf32>
    %c0_64 = arith.constant 0 : index
    %c0_65 = arith.constant 0 : index
    %244 = vector.load %arg8[%c0_64, %c0_65] : memref<64x192xf32, #tpu.memory_space<vmem>>, vector<64x192xf32>
    %c0_66 = arith.constant 0 : index
    %c0_67 = arith.constant 0 : index
    %245 = vector.load %arg9[%c0_66, %c0_67] : memref<64x256xf32, #tpu.memory_space<vmem>>, vector<64x256xf32>
    %c0_68 = arith.constant 0 : index
    %c0_69 = arith.constant 0 : index
    %246 = vector.load %arg10[%c0_68, %c0_69] : memref<384x64xf32, #tpu.memory_space<vmem>>, vector<384x64xf32>
    %247 = vector.extract_strided_slice %243 {offsets = [0, 0], sizes = [1, 64], strides = [1, 1]} : vector<10x256xf32> to vector<1x64xf32>
    %248 = vector.extract_strided_slice %243 {offsets = [1, 0], sizes = [1, 64], strides = [1, 1]} : vector<10x256xf32> to vector<1x64xf32>
    %249 = vector.extract_strided_slice %243 {offsets = [2, 0], sizes = [1, 192], strides = [1, 1]} : vector<10x256xf32> to vector<1x192xf32>
    %250 = vector.extract_strided_slice %246 {offsets = [0, 0], sizes = [64, 64], strides = [1, 1]} : vector<384x64xf32> to vector<64x64xf32>
    %251 = vector.extract_strided_slice %243 {offsets = [3, 0], sizes = [1, 64], strides = [1, 1]} : vector<10x256xf32> to vector<1x64xf32>
    %252 = vector.extract_strided_slice %243 {offsets = [4, 0], sizes = [1, 64], strides = [1, 1]} : vector<10x256xf32> to vector<1x64xf32>
    %253 = vector.extract_strided_slice %243 {offsets = [5, 0], sizes = [1, 64], strides = [1, 1]} : vector<10x256xf32> to vector<1x64xf32>
    %254 = vector.extract_strided_slice %243 {offsets = [6, 0], sizes = [1, 256], strides = [1, 1]} : vector<10x256xf32> to vector<1x256xf32>
    %255 = vector.extract_strided_slice %246 {offsets = [64, 0], sizes = [256, 64], strides = [1, 1]} : vector<384x64xf32> to vector<256x64xf32>
    %256 = vector.extract_strided_slice %243 {offsets = [7, 0], sizes = [1, 64], strides = [1, 1]} : vector<10x256xf32> to vector<1x64xf32>
    %257 = tpu.iota {dimensions = array<i32: 0>} : vector<16x16xi32>
    %258 = tpu.iota {dimensions = array<i32: 1>} : vector<16x16xi32>
    %259 = arith.cmpi sgt, %258, %257 : vector<16x16xi32>
    %cst_70 = arith.constant -1.000000e+09 : f32
    %cst_71 = arith.constant 0.000000e+00 : f32
    %260 = vector.broadcast %cst_70 : f32 to vector<16x16xf32>
    %261 = vector.broadcast %cst_71 : f32 to vector<16x16xf32>
    %262 = arith.select %259, %260, %261 : vector<16x16xi1>, vector<16x16xf32>
    %cst_72 = arith.constant dense<0.000000e+00> : vector<96xf32>
    %263 = vector.multi_reduction <add>, %241, %cst_72 [1] : vector<96x64xf32> to vector<96xf32>
    %264 = vector.shape_cast %263 : vector<96xf32> to vector<96x1xf32>
    %cst_73 = arith.constant 6.400000e+01 : f32
    %265 = vector.broadcast %cst_73 : f32 to vector<96x1xf32>
    %266 = arith.divf %264, %265 : vector<96x1xf32>
    %267 = vector.broadcast %266 : vector<96x1xf32> to vector<96x64xf32>
    %268 = arith.subf %241, %267 : vector<96x64xf32>
    %269 = arith.mulf %268, %268 : vector<96x64xf32>
    %cst_74 = arith.constant dense<0.000000e+00> : vector<96xf32>
    %270 = vector.multi_reduction <add>, %269, %cst_74 [1] : vector<96x64xf32> to vector<96xf32>
    %271 = vector.shape_cast %270 : vector<96xf32> to vector<96x1xf32>
    %cst_75 = arith.constant 6.400000e+01 : f32
    %272 = vector.broadcast %cst_75 : f32 to vector<96x1xf32>
    %273 = arith.divf %271, %272 : vector<96x1xf32>
    %cst_76 = arith.constant 9.99999974E-6 : f32
    %274 = vector.broadcast %cst_76 : f32 to vector<96x1xf32>
    %275 = arith.addf %273, %274 : vector<96x1xf32>
    %276 = math.rsqrt %275 : vector<96x1xf32>
    %277 = vector.broadcast %276 : vector<96x1xf32> to vector<96x64xf32>
    %278 = arith.mulf %268, %277 : vector<96x64xf32>
    %279 = vector.broadcast %247 : vector<1x64xf32> to vector<96x64xf32>
    %280 = arith.mulf %278, %279 : vector<96x64xf32>
    %281 = vector.broadcast %248 : vector<1x64xf32> to vector<96x64xf32>
    %282 = arith.addf %280, %281 : vector<96x64xf32>
    %cst_77 = arith.constant dense<0.000000e+00> : vector<96x192xf32>
    %283 = tpu.matmul %282, %244, %cst_77 {dimension_numbers = #tpu.dot_dimension_numbers<[1], [0], [0], [1], [0, 0, 1, 1], [], []>} : vector<96x64xf32>, vector<64x192xf32>, vector<96x192xf32> -> vector<96x192xf32>
    %284 = vector.broadcast %249 : vector<1x192xf32> to vector<96x192xf32>
    %285 = arith.addf %283, %284 : vector<96x192xf32>
    %286 = vector.extract_strided_slice %285 {offsets = [0, 0], sizes = [96, 64], strides = [1, 1]} : vector<96x192xf32> to vector<96x64xf32>
    %cst_78 = arith.constant 0.176776692 : f32
    %287 = vector.broadcast %cst_78 : f32 to vector<96x64xf32>
    %288 = arith.mulf %286, %287 : vector<96x64xf32>
    %289 = vector.extract_strided_slice %285 {offsets = [0, 64], sizes = [96, 64], strides = [1, 1]} : vector<96x192xf32> to vector<96x64xf32>
    %290 = vector.extract_strided_slice %285 {offsets = [0, 128], sizes = [96, 64], strides = [1, 1]} : vector<96x192xf32> to vector<96x64xf32>
    %291 = vector.extract_strided_slice %288 {offsets = [0, 0], sizes = [16, 32], strides = [1, 1]} : vector<96x64xf32> to vector<16x32xf32>
    %292 = vector.extract_strided_slice %289 {offsets = [0, 0], sizes = [16, 32], strides = [1, 1]} : vector<96x64xf32> to vector<16x32xf32>
    %cst_79 = arith.constant dense<0.000000e+00> : vector<16x16xf32>
    %293 = tpu.matmul %291, %292, %cst_79 {dimension_numbers = #tpu.dot_dimension_numbers<[1], [1], [0], [0], [0, 0, 1, 0], [], []>} : vector<16x32xf32>, vector<16x32xf32>, vector<16x16xf32> -> vector<16x16xf32>
    %294 = arith.addf %293, %262 : vector<16x16xf32>
    %cst_80 = arith.constant dense<0xFF800000> : vector<16xf32>
    %295 = vector.multi_reduction <maximumf>, %294, %cst_80 [1] : vector<16x16xf32> to vector<16xf32>
    %296 = vector.shape_cast %295 : vector<16xf32> to vector<16x1xf32>
    %297 = vector.broadcast %296 : vector<16x1xf32> to vector<16x16xf32>
    %298 = arith.subf %294, %297 : vector<16x16xf32>
    %299 = math.exp %298 : vector<16x16xf32>
    %cst_81 = arith.constant dense<0.000000e+00> : vector<16xf32>
    %300 = vector.multi_reduction <add>, %299, %cst_81 [1] : vector<16x16xf32> to vector<16xf32>
    %301 = vector.shape_cast %300 : vector<16xf32> to vector<16x1xf32>
    %302 = tpu.reciprocal %301 {approx = true} : vector<16x1xf32> -> vector<16x1xf32>
    %303 = vector.broadcast %302 : vector<16x1xf32> to vector<16x16xf32>
    %304 = arith.mulf %299, %303 : vector<16x16xf32>
    %305 = vector.extract_strided_slice %290 {offsets = [0, 0], sizes = [16, 32], strides = [1, 1]} : vector<96x64xf32> to vector<16x32xf32>
    %cst_82 = arith.constant dense<0.000000e+00> : vector<16x32xf32>
    %306 = tpu.matmul %304, %305, %cst_82 {dimension_numbers = #tpu.dot_dimension_numbers<[1], [0], [0], [1], [0, 0, 1, 1], [], []>} : vector<16x16xf32>, vector<16x32xf32>, vector<16x32xf32> -> vector<16x32xf32>
    %307 = vector.extract_strided_slice %288 {offsets = [0, 32], sizes = [16, 32], strides = [1, 1]} : vector<96x64xf32> to vector<16x32xf32>
    %308 = vector.extract_strided_slice %289 {offsets = [0, 32], sizes = [16, 32], strides = [1, 1]} : vector<96x64xf32> to vector<16x32xf32>
    %cst_83 = arith.constant dense<0.000000e+00> : vector<16x16xf32>
    %309 = tpu.matmul %307, %308, %cst_83 {dimension_numbers = #tpu.dot_dimension_numbers<[1], [1], [0], [0], [0, 0, 1, 0], [], []>} : vector<16x32xf32>, vector<16x32xf32>, vector<16x16xf32> -> vector<16x16xf32>
    %310 = arith.addf %309, %262 : vector<16x16xf32>
    %cst_84 = arith.constant dense<0xFF800000> : vector<16xf32>
    %311 = vector.multi_reduction <maximumf>, %310, %cst_84 [1] : vector<16x16xf32> to vector<16xf32>
    %312 = vector.shape_cast %311 : vector<16xf32> to vector<16x1xf32>
    %313 = vector.broadcast %312 : vector<16x1xf32> to vector<16x16xf32>
    %314 = arith.subf %310, %313 : vector<16x16xf32>
    %315 = math.exp %314 : vector<16x16xf32>
    %cst_85 = arith.constant dense<0.000000e+00> : vector<16xf32>
    %316 = vector.multi_reduction <add>, %315, %cst_85 [1] : vector<16x16xf32> to vector<16xf32>
    %317 = vector.shape_cast %316 : vector<16xf32> to vector<16x1xf32>
    %318 = tpu.reciprocal %317 {approx = true} : vector<16x1xf32> -> vector<16x1xf32>
    %319 = vector.broadcast %318 : vector<16x1xf32> to vector<16x16xf32>
    %320 = arith.mulf %315, %319 : vector<16x16xf32>
    %321 = vector.extract_strided_slice %290 {offsets = [0, 32], sizes = [16, 32], strides = [1, 1]} : vector<96x64xf32> to vector<16x32xf32>
    %cst_86 = arith.constant dense<0.000000e+00> : vector<16x32xf32>
    %322 = tpu.matmul %320, %321, %cst_86 {dimension_numbers = #tpu.dot_dimension_numbers<[1], [0], [0], [1], [0, 0, 1, 1], [], []>} : vector<16x16xf32>, vector<16x32xf32>, vector<16x32xf32> -> vector<16x32xf32>
    %323 = tpu.concatenate %306, %322 in 1 : vector<16x32xf32>, vector<16x32xf32> -> vector<16x64xf32>
    %324 = vector.extract_strided_slice %288 {offsets = [16, 0], sizes = [16, 32], strides = [1, 1]} : vector<96x64xf32> to vector<16x32xf32>
    %325 = vector.extract_strided_slice %289 {offsets = [16, 0], sizes = [16, 32], strides = [1, 1]} : vector<96x64xf32> to vector<16x32xf32>
    %cst_87 = arith.constant dense<0.000000e+00> : vector<16x16xf32>
    %326 = tpu.matmul %324, %325, %cst_87 {dimension_numbers = #tpu.dot_dimension_numbers<[1], [1], [0], [0], [0, 0, 1, 0], [], []>} : vector<16x32xf32>, vector<16x32xf32>, vector<16x16xf32> -> vector<16x16xf32>
    %327 = arith.addf %326, %262 : vector<16x16xf32>
    %cst_88 = arith.constant dense<0xFF800000> : vector<16xf32>
    %328 = vector.multi_reduction <maximumf>, %327, %cst_88 [1] : vector<16x16xf32> to vector<16xf32>
    %329 = vector.shape_cast %328 : vector<16xf32> to vector<16x1xf32>
    %330 = vector.broadcast %329 : vector<16x1xf32> to vector<16x16xf32>
    %331 = arith.subf %327, %330 : vector<16x16xf32>
    %332 = math.exp %331 : vector<16x16xf32>
    %cst_89 = arith.constant dense<0.000000e+00> : vector<16xf32>
    %333 = vector.multi_reduction <add>, %332, %cst_89 [1] : vector<16x16xf32> to vector<16xf32>
    %334 = vector.shape_cast %333 : vector<16xf32> to vector<16x1xf32>
    %335 = tpu.reciprocal %334 {approx = true} : vector<16x1xf32> -> vector<16x1xf32>
    %336 = vector.broadcast %335 : vector<16x1xf32> to vector<16x16xf32>
    %337 = arith.mulf %332, %336 : vector<16x16xf32>
    %338 = vector.extract_strided_slice %290 {offsets = [16, 0], sizes = [16, 32], strides = [1, 1]} : vector<96x64xf32> to vector<16x32xf32>
    %cst_90 = arith.constant dense<0.000000e+00> : vector<16x32xf32>
    %339 = tpu.matmul %337, %338, %cst_90 {dimension_numbers = #tpu.dot_dimension_numbers<[1], [0], [0], [1], [0, 0, 1, 1], [], []>} : vector<16x16xf32>, vector<16x32xf32>, vector<16x32xf32> -> vector<16x32xf32>
    %340 = vector.extract_strided_slice %288 {offsets = [16, 32], sizes = [16, 32], strides = [1, 1]} : vector<96x64xf32> to vector<16x32xf32>
    %341 = vector.extract_strided_slice %289 {offsets = [16, 32], sizes = [16, 32], strides = [1, 1]} : vector<96x64xf32> to vector<16x32xf32>
    %cst_91 = arith.constant dense<0.000000e+00> : vector<16x16xf32>
    %342 = tpu.matmul %340, %341, %cst_91 {dimension_numbers = #tpu.dot_dimension_numbers<[1], [1], [0], [0], [0, 0, 1, 0], [], []>} : vector<16x32xf32>, vector<16x32xf32>, vector<16x16xf32> -> vector<16x16xf32>
    %343 = arith.addf %342, %262 : vector<16x16xf32>
    %cst_92 = arith.constant dense<0xFF800000> : vector<16xf32>
    %344 = vector.multi_reduction <maximumf>, %343, %cst_92 [1] : vector<16x16xf32> to vector<16xf32>
    %345 = vector.shape_cast %344 : vector<16xf32> to vector<16x1xf32>
    %346 = vector.broadcast %345 : vector<16x1xf32> to vector<16x16xf32>
    %347 = arith.subf %343, %346 : vector<16x16xf32>
    %348 = math.exp %347 : vector<16x16xf32>
    %cst_93 = arith.constant dense<0.000000e+00> : vector<16xf32>
    %349 = vector.multi_reduction <add>, %348, %cst_93 [1] : vector<16x16xf32> to vector<16xf32>
    %350 = vector.shape_cast %349 : vector<16xf32> to vector<16x1xf32>
    %351 = tpu.reciprocal %350 {approx = true} : vector<16x1xf32> -> vector<16x1xf32>
    %352 = vector.broadcast %351 : vector<16x1xf32> to vector<16x16xf32>
    %353 = arith.mulf %348, %352 : vector<16x16xf32>
    %354 = vector.extract_strided_slice %290 {offsets = [16, 32], sizes = [16, 32], strides = [1, 1]} : vector<96x64xf32> to vector<16x32xf32>
    %cst_94 = arith.constant dense<0.000000e+00> : vector<16x32xf32>
    %355 = tpu.matmul %353, %354, %cst_94 {dimension_numbers = #tpu.dot_dimension_numbers<[1], [0], [0], [1], [0, 0, 1, 1], [], []>} : vector<16x16xf32>, vector<16x32xf32>, vector<16x32xf32> -> vector<16x32xf32>
    %356 = tpu.concatenate %339, %355 in 1 : vector<16x32xf32>, vector<16x32xf32> -> vector<16x64xf32>
    %357 = vector.extract_strided_slice %288 {offsets = [32, 0], sizes = [16, 32], strides = [1, 1]} : vector<96x64xf32> to vector<16x32xf32>
    %358 = vector.extract_strided_slice %289 {offsets = [32, 0], sizes = [16, 32], strides = [1, 1]} : vector<96x64xf32> to vector<16x32xf32>
    %cst_95 = arith.constant dense<0.000000e+00> : vector<16x16xf32>
    %359 = tpu.matmul %357, %358, %cst_95 {dimension_numbers = #tpu.dot_dimension_numbers<[1], [1], [0], [0], [0, 0, 1, 0], [], []>} : vector<16x32xf32>, vector<16x32xf32>, vector<16x16xf32> -> vector<16x16xf32>
    %360 = arith.addf %359, %262 : vector<16x16xf32>
    %cst_96 = arith.constant dense<0xFF800000> : vector<16xf32>
    %361 = vector.multi_reduction <maximumf>, %360, %cst_96 [1] : vector<16x16xf32> to vector<16xf32>
    %362 = vector.shape_cast %361 : vector<16xf32> to vector<16x1xf32>
    %363 = vector.broadcast %362 : vector<16x1xf32> to vector<16x16xf32>
    %364 = arith.subf %360, %363 : vector<16x16xf32>
    %365 = math.exp %364 : vector<16x16xf32>
    %cst_97 = arith.constant dense<0.000000e+00> : vector<16xf32>
    %366 = vector.multi_reduction <add>, %365, %cst_97 [1] : vector<16x16xf32> to vector<16xf32>
    %367 = vector.shape_cast %366 : vector<16xf32> to vector<16x1xf32>
    %368 = tpu.reciprocal %367 {approx = true} : vector<16x1xf32> -> vector<16x1xf32>
    %369 = vector.broadcast %368 : vector<16x1xf32> to vector<16x16xf32>
    %370 = arith.mulf %365, %369 : vector<16x16xf32>
    %371 = vector.extract_strided_slice %290 {offsets = [32, 0], sizes = [16, 32], strides = [1, 1]} : vector<96x64xf32> to vector<16x32xf32>
    %cst_98 = arith.constant dense<0.000000e+00> : vector<16x32xf32>
    %372 = tpu.matmul %370, %371, %cst_98 {dimension_numbers = #tpu.dot_dimension_numbers<[1], [0], [0], [1], [0, 0, 1, 1], [], []>} : vector<16x16xf32>, vector<16x32xf32>, vector<16x32xf32> -> vector<16x32xf32>
    %373 = vector.extract_strided_slice %288 {offsets = [32, 32], sizes = [16, 32], strides = [1, 1]} : vector<96x64xf32> to vector<16x32xf32>
    %374 = vector.extract_strided_slice %289 {offsets = [32, 32], sizes = [16, 32], strides = [1, 1]} : vector<96x64xf32> to vector<16x32xf32>
    %cst_99 = arith.constant dense<0.000000e+00> : vector<16x16xf32>
    %375 = tpu.matmul %373, %374, %cst_99 {dimension_numbers = #tpu.dot_dimension_numbers<[1], [1], [0], [0], [0, 0, 1, 0], [], []>} : vector<16x32xf32>, vector<16x32xf32>, vector<16x16xf32> -> vector<16x16xf32>
    %376 = arith.addf %375, %262 : vector<16x16xf32>
    %cst_100 = arith.constant dense<0xFF800000> : vector<16xf32>
    %377 = vector.multi_reduction <maximumf>, %376, %cst_100 [1] : vector<16x16xf32> to vector<16xf32>
    %378 = vector.shape_cast %377 : vector<16xf32> to vector<16x1xf32>
    %379 = vector.broadcast %378 : vector<16x1xf32> to vector<16x16xf32>
    %380 = arith.subf %376, %379 : vector<16x16xf32>
    %381 = math.exp %380 : vector<16x16xf32>
    %cst_101 = arith.constant dense<0.000000e+00> : vector<16xf32>
    %382 = vector.multi_reduction <add>, %381, %cst_101 [1] : vector<16x16xf32> to vector<16xf32>
    %383 = vector.shape_cast %382 : vector<16xf32> to vector<16x1xf32>
    %384 = tpu.reciprocal %383 {approx = true} : vector<16x1xf32> -> vector<16x1xf32>
    %385 = vector.broadcast %384 : vector<16x1xf32> to vector<16x16xf32>
    %386 = arith.mulf %381, %385 : vector<16x16xf32>
    %387 = vector.extract_strided_slice %290 {offsets = [32, 32], sizes = [16, 32], strides = [1, 1]} : vector<96x64xf32> to vector<16x32xf32>
    %cst_102 = arith.constant dense<0.000000e+00> : vector<16x32xf32>
    %388 = tpu.matmul %386, %387, %cst_102 {dimension_numbers = #tpu.dot_dimension_numbers<[1], [0], [0], [1], [0, 0, 1, 1], [], []>} : vector<16x16xf32>, vector<16x32xf32>, vector<16x32xf32> -> vector<16x32xf32>
    %389 = tpu.concatenate %372, %388 in 1 : vector<16x32xf32>, vector<16x32xf32> -> vector<16x64xf32>
    %390 = vector.extract_strided_slice %288 {offsets = [48, 0], sizes = [16, 32], strides = [1, 1]} : vector<96x64xf32> to vector<16x32xf32>
    %391 = vector.extract_strided_slice %289 {offsets = [48, 0], sizes = [16, 32], strides = [1, 1]} : vector<96x64xf32> to vector<16x32xf32>
    %cst_103 = arith.constant dense<0.000000e+00> : vector<16x16xf32>
    %392 = tpu.matmul %390, %391, %cst_103 {dimension_numbers = #tpu.dot_dimension_numbers<[1], [1], [0], [0], [0, 0, 1, 0], [], []>} : vector<16x32xf32>, vector<16x32xf32>, vector<16x16xf32> -> vector<16x16xf32>
    %393 = arith.addf %392, %262 : vector<16x16xf32>
    %cst_104 = arith.constant dense<0xFF800000> : vector<16xf32>
    %394 = vector.multi_reduction <maximumf>, %393, %cst_104 [1] : vector<16x16xf32> to vector<16xf32>
    %395 = vector.shape_cast %394 : vector<16xf32> to vector<16x1xf32>
    %396 = vector.broadcast %395 : vector<16x1xf32> to vector<16x16xf32>
    %397 = arith.subf %393, %396 : vector<16x16xf32>
    %398 = math.exp %397 : vector<16x16xf32>
    %cst_105 = arith.constant dense<0.000000e+00> : vector<16xf32>
    %399 = vector.multi_reduction <add>, %398, %cst_105 [1] : vector<16x16xf32> to vector<16xf32>
    %400 = vector.shape_cast %399 : vector<16xf32> to vector<16x1xf32>
    %401 = tpu.reciprocal %400 {approx = true} : vector<16x1xf32> -> vector<16x1xf32>
    %402 = vector.broadcast %401 : vector<16x1xf32> to vector<16x16xf32>
    %403 = arith.mulf %398, %402 : vector<16x16xf32>
    %404 = vector.extract_strided_slice %290 {offsets = [48, 0], sizes = [16, 32], strides = [1, 1]} : vector<96x64xf32> to vector<16x32xf32>
    %cst_106 = arith.constant dense<0.000000e+00> : vector<16x32xf32>
    %405 = tpu.matmul %403, %404, %cst_106 {dimension_numbers = #tpu.dot_dimension_numbers<[1], [0], [0], [1], [0, 0, 1, 1], [], []>} : vector<16x16xf32>, vector<16x32xf32>, vector<16x32xf32> -> vector<16x32xf32>
    %406 = vector.extract_strided_slice %288 {offsets = [48, 32], sizes = [16, 32], strides = [1, 1]} : vector<96x64xf32> to vector<16x32xf32>
    %407 = vector.extract_strided_slice %289 {offsets = [48, 32], sizes = [16, 32], strides = [1, 1]} : vector<96x64xf32> to vector<16x32xf32>
    %cst_107 = arith.constant dense<0.000000e+00> : vector<16x16xf32>
    %408 = tpu.matmul %406, %407, %cst_107 {dimension_numbers = #tpu.dot_dimension_numbers<[1], [1], [0], [0], [0, 0, 1, 0], [], []>} : vector<16x32xf32>, vector<16x32xf32>, vector<16x16xf32> -> vector<16x16xf32>
    %409 = arith.addf %408, %262 : vector<16x16xf32>
    %cst_108 = arith.constant dense<0xFF800000> : vector<16xf32>
    %410 = vector.multi_reduction <maximumf>, %409, %cst_108 [1] : vector<16x16xf32> to vector<16xf32>
    %411 = vector.shape_cast %410 : vector<16xf32> to vector<16x1xf32>
    %412 = vector.broadcast %411 : vector<16x1xf32> to vector<16x16xf32>
    %413 = arith.subf %409, %412 : vector<16x16xf32>
    %414 = math.exp %413 : vector<16x16xf32>
    %cst_109 = arith.constant dense<0.000000e+00> : vector<16xf32>
    %415 = vector.multi_reduction <add>, %414, %cst_109 [1] : vector<16x16xf32> to vector<16xf32>
    %416 = vector.shape_cast %415 : vector<16xf32> to vector<16x1xf32>
    %417 = tpu.reciprocal %416 {approx = true} : vector<16x1xf32> -> vector<16x1xf32>
    %418 = vector.broadcast %417 : vector<16x1xf32> to vector<16x16xf32>
    %419 = arith.mulf %414, %418 : vector<16x16xf32>
    %420 = vector.extract_strided_slice %290 {offsets = [48, 32], sizes = [16, 32], strides = [1, 1]} : vector<96x64xf32> to vector<16x32xf32>
    %cst_110 = arith.constant dense<0.000000e+00> : vector<16x32xf32>
    %421 = tpu.matmul %419, %420, %cst_110 {dimension_numbers = #tpu.dot_dimension_numbers<[1], [0], [0], [1], [0, 0, 1, 1], [], []>} : vector<16x16xf32>, vector<16x32xf32>, vector<16x32xf32> -> vector<16x32xf32>
    %422 = tpu.concatenate %405, %421 in 1 : vector<16x32xf32>, vector<16x32xf32> -> vector<16x64xf32>
    %423 = vector.extract_strided_slice %288 {offsets = [64, 0], sizes = [16, 32], strides = [1, 1]} : vector<96x64xf32> to vector<16x32xf32>
    %424 = vector.extract_strided_slice %289 {offsets = [64, 0], sizes = [16, 32], strides = [1, 1]} : vector<96x64xf32> to vector<16x32xf32>
    %cst_111 = arith.constant dense<0.000000e+00> : vector<16x16xf32>
    %425 = tpu.matmul %423, %424, %cst_111 {dimension_numbers = #tpu.dot_dimension_numbers<[1], [1], [0], [0], [0, 0, 1, 0], [], []>} : vector<16x32xf32>, vector<16x32xf32>, vector<16x16xf32> -> vector<16x16xf32>
    %426 = arith.addf %425, %262 : vector<16x16xf32>
    %cst_112 = arith.constant dense<0xFF800000> : vector<16xf32>
    %427 = vector.multi_reduction <maximumf>, %426, %cst_112 [1] : vector<16x16xf32> to vector<16xf32>
    %428 = vector.shape_cast %427 : vector<16xf32> to vector<16x1xf32>
    %429 = vector.broadcast %428 : vector<16x1xf32> to vector<16x16xf32>
    %430 = arith.subf %426, %429 : vector<16x16xf32>
    %431 = math.exp %430 : vector<16x16xf32>
    %cst_113 = arith.constant dense<0.000000e+00> : vector<16xf32>
    %432 = vector.multi_reduction <add>, %431, %cst_113 [1] : vector<16x16xf32> to vector<16xf32>
    %433 = vector.shape_cast %432 : vector<16xf32> to vector<16x1xf32>
    %434 = tpu.reciprocal %433 {approx = true} : vector<16x1xf32> -> vector<16x1xf32>
    %435 = vector.broadcast %434 : vector<16x1xf32> to vector<16x16xf32>
    %436 = arith.mulf %431, %435 : vector<16x16xf32>
    %437 = vector.extract_strided_slice %290 {offsets = [64, 0], sizes = [16, 32], strides = [1, 1]} : vector<96x64xf32> to vector<16x32xf32>
    %cst_114 = arith.constant dense<0.000000e+00> : vector<16x32xf32>
    %438 = tpu.matmul %436, %437, %cst_114 {dimension_numbers = #tpu.dot_dimension_numbers<[1], [0], [0], [1], [0, 0, 1, 1], [], []>} : vector<16x16xf32>, vector<16x32xf32>, vector<16x32xf32> -> vector<16x32xf32>
    %439 = vector.extract_strided_slice %288 {offsets = [64, 32], sizes = [16, 32], strides = [1, 1]} : vector<96x64xf32> to vector<16x32xf32>
    %440 = vector.extract_strided_slice %289 {offsets = [64, 32], sizes = [16, 32], strides = [1, 1]} : vector<96x64xf32> to vector<16x32xf32>
    %cst_115 = arith.constant dense<0.000000e+00> : vector<16x16xf32>
    %441 = tpu.matmul %439, %440, %cst_115 {dimension_numbers = #tpu.dot_dimension_numbers<[1], [1], [0], [0], [0, 0, 1, 0], [], []>} : vector<16x32xf32>, vector<16x32xf32>, vector<16x16xf32> -> vector<16x16xf32>
    %442 = arith.addf %441, %262 : vector<16x16xf32>
    %cst_116 = arith.constant dense<0xFF800000> : vector<16xf32>
    %443 = vector.multi_reduction <maximumf>, %442, %cst_116 [1] : vector<16x16xf32> to vector<16xf32>
    %444 = vector.shape_cast %443 : vector<16xf32> to vector<16x1xf32>
    %445 = vector.broadcast %444 : vector<16x1xf32> to vector<16x16xf32>
    %446 = arith.subf %442, %445 : vector<16x16xf32>
    %447 = math.exp %446 : vector<16x16xf32>
    %cst_117 = arith.constant dense<0.000000e+00> : vector<16xf32>
    %448 = vector.multi_reduction <add>, %447, %cst_117 [1] : vector<16x16xf32> to vector<16xf32>
    %449 = vector.shape_cast %448 : vector<16xf32> to vector<16x1xf32>
    %450 = tpu.reciprocal %449 {approx = true} : vector<16x1xf32> -> vector<16x1xf32>
    %451 = vector.broadcast %450 : vector<16x1xf32> to vector<16x16xf32>
    %452 = arith.mulf %447, %451 : vector<16x16xf32>
    %453 = vector.extract_strided_slice %290 {offsets = [64, 32], sizes = [16, 32], strides = [1, 1]} : vector<96x64xf32> to vector<16x32xf32>
    %cst_118 = arith.constant dense<0.000000e+00> : vector<16x32xf32>
    %454 = tpu.matmul %452, %453, %cst_118 {dimension_numbers = #tpu.dot_dimension_numbers<[1], [0], [0], [1], [0, 0, 1, 1], [], []>} : vector<16x16xf32>, vector<16x32xf32>, vector<16x32xf32> -> vector<16x32xf32>
    %455 = tpu.concatenate %438, %454 in 1 : vector<16x32xf32>, vector<16x32xf32> -> vector<16x64xf32>
    %456 = vector.extract_strided_slice %288 {offsets = [80, 0], sizes = [16, 32], strides = [1, 1]} : vector<96x64xf32> to vector<16x32xf32>
    %457 = vector.extract_strided_slice %289 {offsets = [80, 0], sizes = [16, 32], strides = [1, 1]} : vector<96x64xf32> to vector<16x32xf32>
    %cst_119 = arith.constant dense<0.000000e+00> : vector<16x16xf32>
    %458 = tpu.matmul %456, %457, %cst_119 {dimension_numbers = #tpu.dot_dimension_numbers<[1], [1], [0], [0], [0, 0, 1, 0], [], []>} : vector<16x32xf32>, vector<16x32xf32>, vector<16x16xf32> -> vector<16x16xf32>
    %459 = arith.addf %458, %262 : vector<16x16xf32>
    %cst_120 = arith.constant dense<0xFF800000> : vector<16xf32>
    %460 = vector.multi_reduction <maximumf>, %459, %cst_120 [1] : vector<16x16xf32> to vector<16xf32>
    %461 = vector.shape_cast %460 : vector<16xf32> to vector<16x1xf32>
    %462 = vector.broadcast %461 : vector<16x1xf32> to vector<16x16xf32>
    %463 = arith.subf %459, %462 : vector<16x16xf32>
    %464 = math.exp %463 : vector<16x16xf32>
    %cst_121 = arith.constant dense<0.000000e+00> : vector<16xf32>
    %465 = vector.multi_reduction <add>, %464, %cst_121 [1] : vector<16x16xf32> to vector<16xf32>
    %466 = vector.shape_cast %465 : vector<16xf32> to vector<16x1xf32>
    %467 = tpu.reciprocal %466 {approx = true} : vector<16x1xf32> -> vector<16x1xf32>
    %468 = vector.broadcast %467 : vector<16x1xf32> to vector<16x16xf32>
    %469 = arith.mulf %464, %468 : vector<16x16xf32>
    %470 = vector.extract_strided_slice %290 {offsets = [80, 0], sizes = [16, 32], strides = [1, 1]} : vector<96x64xf32> to vector<16x32xf32>
    %cst_122 = arith.constant dense<0.000000e+00> : vector<16x32xf32>
    %471 = tpu.matmul %469, %470, %cst_122 {dimension_numbers = #tpu.dot_dimension_numbers<[1], [0], [0], [1], [0, 0, 1, 1], [], []>} : vector<16x16xf32>, vector<16x32xf32>, vector<16x32xf32> -> vector<16x32xf32>
    %472 = vector.extract_strided_slice %288 {offsets = [80, 32], sizes = [16, 32], strides = [1, 1]} : vector<96x64xf32> to vector<16x32xf32>
    %473 = vector.extract_strided_slice %289 {offsets = [80, 32], sizes = [16, 32], strides = [1, 1]} : vector<96x64xf32> to vector<16x32xf32>
    %cst_123 = arith.constant dense<0.000000e+00> : vector<16x16xf32>
    %474 = tpu.matmul %472, %473, %cst_123 {dimension_numbers = #tpu.dot_dimension_numbers<[1], [1], [0], [0], [0, 0, 1, 0], [], []>} : vector<16x32xf32>, vector<16x32xf32>, vector<16x16xf32> -> vector<16x16xf32>
    %475 = arith.addf %474, %262 : vector<16x16xf32>
    %cst_124 = arith.constant dense<0xFF800000> : vector<16xf32>
    %476 = vector.multi_reduction <maximumf>, %475, %cst_124 [1] : vector<16x16xf32> to vector<16xf32>
    %477 = vector.shape_cast %476 : vector<16xf32> to vector<16x1xf32>
    %478 = vector.broadcast %477 : vector<16x1xf32> to vector<16x16xf32>
    %479 = arith.subf %475, %478 : vector<16x16xf32>
    %480 = math.exp %479 : vector<16x16xf32>
    %cst_125 = arith.constant dense<0.000000e+00> : vector<16xf32>
    %481 = vector.multi_reduction <add>, %480, %cst_125 [1] : vector<16x16xf32> to vector<16xf32>
    %482 = vector.shape_cast %481 : vector<16xf32> to vector<16x1xf32>
    %483 = tpu.reciprocal %482 {approx = true} : vector<16x1xf32> -> vector<16x1xf32>
    %484 = vector.broadcast %483 : vector<16x1xf32> to vector<16x16xf32>
    %485 = arith.mulf %480, %484 : vector<16x16xf32>
    %486 = vector.extract_strided_slice %290 {offsets = [80, 32], sizes = [16, 32], strides = [1, 1]} : vector<96x64xf32> to vector<16x32xf32>
    %cst_126 = arith.constant dense<0.000000e+00> : vector<16x32xf32>
    %487 = tpu.matmul %485, %486, %cst_126 {dimension_numbers = #tpu.dot_dimension_numbers<[1], [0], [0], [1], [0, 0, 1, 1], [], []>} : vector<16x16xf32>, vector<16x32xf32>, vector<16x32xf32> -> vector<16x32xf32>
    %488 = tpu.concatenate %471, %487 in 1 : vector<16x32xf32>, vector<16x32xf32> -> vector<16x64xf32>
    %489 = tpu.concatenate %323, %356, %389, %422, %455, %488 in 0 : vector<16x64xf32>, vector<16x64xf32>, vector<16x64xf32>, vector<16x64xf32>, vector<16x64xf32>, vector<16x64xf32> -> vector<96x64xf32>
    %cst_127 = arith.constant dense<0.000000e+00> : vector<96x64xf32>
    %490 = tpu.matmul %489, %250, %cst_127 {dimension_numbers = #tpu.dot_dimension_numbers<[1], [0], [0], [1], [0, 0, 1, 1], [], []>} : vector<96x64xf32>, vector<64x64xf32>, vector<96x64xf32> -> vector<96x64xf32>
    %491 = arith.addf %241, %490 : vector<96x64xf32>
    %492 = vector.broadcast %251 : vector<1x64xf32> to vector<96x64xf32>
    %493 = arith.addf %491, %492 : vector<96x64xf32>
    %cst_128 = arith.constant dense<0.000000e+00> : vector<96xf32>
    %494 = vector.multi_reduction <add>, %493, %cst_128 [1] : vector<96x64xf32> to vector<96xf32>
    %495 = vector.shape_cast %494 : vector<96xf32> to vector<96x1xf32>
    %cst_129 = arith.constant 6.400000e+01 : f32
    %496 = vector.broadcast %cst_129 : f32 to vector<96x1xf32>
    %497 = arith.divf %495, %496 : vector<96x1xf32>
    %498 = vector.broadcast %497 : vector<96x1xf32> to vector<96x64xf32>
    %499 = arith.subf %493, %498 : vector<96x64xf32>
    %500 = arith.mulf %499, %499 : vector<96x64xf32>
    %cst_130 = arith.constant dense<0.000000e+00> : vector<96xf32>
    %501 = vector.multi_reduction <add>, %500, %cst_130 [1] : vector<96x64xf32> to vector<96xf32>
    %502 = vector.shape_cast %501 : vector<96xf32> to vector<96x1xf32>
    %cst_131 = arith.constant 6.400000e+01 : f32
    %503 = vector.broadcast %cst_131 : f32 to vector<96x1xf32>
    %504 = arith.divf %502, %503 : vector<96x1xf32>
    %cst_132 = arith.constant 9.99999974E-6 : f32
    %505 = vector.broadcast %cst_132 : f32 to vector<96x1xf32>
    %506 = arith.addf %504, %505 : vector<96x1xf32>
    %507 = math.rsqrt %506 : vector<96x1xf32>
    %508 = vector.broadcast %507 : vector<96x1xf32> to vector<96x64xf32>
    %509 = arith.mulf %499, %508 : vector<96x64xf32>
    %510 = vector.broadcast %252 : vector<1x64xf32> to vector<96x64xf32>
    %511 = arith.mulf %509, %510 : vector<96x64xf32>
    %512 = vector.broadcast %253 : vector<1x64xf32> to vector<96x64xf32>
    %513 = arith.addf %511, %512 : vector<96x64xf32>
    %cst_133 = arith.constant dense<0.000000e+00> : vector<96x256xf32>
    %514 = tpu.matmul %513, %245, %cst_133 {dimension_numbers = #tpu.dot_dimension_numbers<[1], [0], [0], [1], [0, 0, 1, 1], [], []>} : vector<96x64xf32>, vector<64x256xf32>, vector<96x256xf32> -> vector<96x256xf32>
    %515 = vector.broadcast %254 : vector<1x256xf32> to vector<96x256xf32>
    %516 = arith.addf %514, %515 : vector<96x256xf32>
    %cst_134 = arith.constant 1.702000e+00 : f32
    %517 = vector.broadcast %cst_134 : f32 to vector<96x256xf32>
    %518 = arith.mulf %517, %516 : vector<96x256xf32>
    %519 = arith.negf %518 : vector<96x256xf32>
    %520 = math.exp %519 : vector<96x256xf32>
    %cst_135 = arith.constant 1.000000e+00 : f32
    %521 = vector.broadcast %cst_135 : f32 to vector<96x256xf32>
    %522 = arith.addf %521, %520 : vector<96x256xf32>
    %523 = arith.divf %521, %522 : vector<96x256xf32>
    %524 = arith.mulf %516, %523 : vector<96x256xf32>
    %cst_136 = arith.constant dense<0.000000e+00> : vector<96x64xf32>
    %525 = tpu.matmul %524, %255, %cst_136 {dimension_numbers = #tpu.dot_dimension_numbers<[1], [0], [0], [1], [0, 0, 1, 1], [], []>} : vector<96x256xf32>, vector<256x64xf32>, vector<96x64xf32> -> vector<96x64xf32>
    %526 = vector.broadcast %256 : vector<1x64xf32> to vector<96x64xf32>
    %527 = arith.addf %525, %526 : vector<96x64xf32>
    %528 = arith.addf %493, %527 : vector<96x64xf32>
    %cst_137 = arith.constant dense<0.000000e+00> : vector<6x64xf32>
    %529 = tpu.matmul %242, %528, %cst_137 {dimension_numbers = #tpu.dot_dimension_numbers<[1], [0], [0], [1], [0, 0, 1, 1], [], []>} : vector<6x96xf32>, vector<96x64xf32>, vector<6x64xf32> -> vector<6x64xf32>
    %530 = vector.extract_strided_slice %243 {offsets = [8, 0], sizes = [1, 64], strides = [1, 1]} : vector<10x256xf32> to vector<1x64xf32>
    %531 = vector.extract_strided_slice %243 {offsets = [9, 0], sizes = [1, 64], strides = [1, 1]} : vector<10x256xf32> to vector<1x64xf32>
    %cst_138 = arith.constant dense<0.000000e+00> : vector<6xf32>
    %532 = vector.multi_reduction <add>, %529, %cst_138 [1] : vector<6x64xf32> to vector<6xf32>
    %533 = vector.shape_cast %532 : vector<6xf32> to vector<6x1xf32>
    %cst_139 = arith.constant 6.400000e+01 : f32
    %534 = vector.broadcast %cst_139 : f32 to vector<6x1xf32>
    %535 = arith.divf %533, %534 : vector<6x1xf32>
    %536 = vector.broadcast %535 : vector<6x1xf32> to vector<6x64xf32>
    %537 = arith.subf %529, %536 : vector<6x64xf32>
    %538 = arith.mulf %537, %537 : vector<6x64xf32>
    %cst_140 = arith.constant dense<0.000000e+00> : vector<6xf32>
    %539 = vector.multi_reduction <add>, %538, %cst_140 [1] : vector<6x64xf32> to vector<6xf32>
    %540 = vector.shape_cast %539 : vector<6xf32> to vector<6x1xf32>
    %cst_141 = arith.constant 6.400000e+01 : f32
    %541 = vector.broadcast %cst_141 : f32 to vector<6x1xf32>
    %542 = arith.divf %540, %541 : vector<6x1xf32>
    %cst_142 = arith.constant 9.99999974E-6 : f32
    %543 = vector.broadcast %cst_142 : f32 to vector<6x1xf32>
    %544 = arith.addf %542, %543 : vector<6x1xf32>
    %545 = math.rsqrt %544 : vector<6x1xf32>
    %546 = vector.broadcast %545 : vector<6x1xf32> to vector<6x64xf32>
    %547 = arith.mulf %537, %546 : vector<6x64xf32>
    %548 = vector.broadcast %530 : vector<1x64xf32> to vector<6x64xf32>
    %549 = arith.mulf %547, %548 : vector<6x64xf32>
    %550 = vector.broadcast %531 : vector<1x64xf32> to vector<6x64xf32>
    %551 = arith.addf %549, %550 : vector<6x64xf32>
    %552 = vector.extract_strided_slice %246 {offsets = [320, 0], sizes = [64, 64], strides = [1, 1]} : vector<384x64xf32> to vector<64x64xf32>
    %cst_143 = arith.constant dense<0.000000e+00> : vector<6x64xf32>
    %553 = tpu.matmul %551, %552, %cst_143 {dimension_numbers = #tpu.dot_dimension_numbers<[1], [0], [0], [1], [0, 0, 1, 1], [], []>} : vector<6x64xf32>, vector<64x64xf32>, vector<6x64xf32> -> vector<6x64xf32>
    %554 = arith.mulf %553, %553 : vector<6x64xf32>
    %cst_144 = arith.constant dense<0.000000e+00> : vector<6xf32>
    %555 = vector.multi_reduction <add>, %554, %cst_144 [1] : vector<6x64xf32> to vector<6xf32>
    %556 = vector.shape_cast %555 : vector<6xf32> to vector<6x1xf32>
    %cst_145 = arith.constant 9.99999996E-13 : f32
    %557 = vector.broadcast %cst_145 : f32 to vector<6x1xf32>
    %558 = arith.addf %556, %557 : vector<6x1xf32>
    %559 = math.rsqrt %558 : vector<6x1xf32>
    %560 = vector.broadcast %559 : vector<6x1xf32> to vector<6x64xf32>
    %561 = arith.mulf %553, %560 : vector<6x64xf32>
    %562 = vector.extract_strided_slice %207 {offsets = [0, 0], sizes = [1, 64], strides = [1, 1]} : vector<2x64xf32> to vector<1x64xf32>
    %563 = vector.extract_strided_slice %561 {offsets = [0, 0], sizes = [3, 64], strides = [1, 1]} : vector<6x64xf32> to vector<3x64xf32>
    %cst_146 = arith.constant dense<0.000000e+00> : vector<1x3xf32>
    %564 = tpu.matmul %562, %563, %cst_146 {dimension_numbers = #tpu.dot_dimension_numbers<[1], [1], [0], [0], [0, 0, 1, 0], [], []>} : vector<1x64xf32>, vector<3x64xf32>, vector<1x3xf32> -> vector<1x3xf32>
    %565 = vector.extract_strided_slice %207 {offsets = [1, 0], sizes = [1, 64], strides = [1, 1]} : vector<2x64xf32> to vector<1x64xf32>
    %566 = vector.extract_strided_slice %561 {offsets = [3, 0], sizes = [3, 64], strides = [1, 1]} : vector<6x64xf32> to vector<3x64xf32>
    %cst_147 = arith.constant dense<0.000000e+00> : vector<1x3xf32>
    %567 = tpu.matmul %565, %566, %cst_147 {dimension_numbers = #tpu.dot_dimension_numbers<[1], [1], [0], [0], [0, 0, 1, 0], [], []>} : vector<1x64xf32>, vector<3x64xf32>, vector<1x3xf32> -> vector<1x3xf32>
    %568 = tpu.concatenate %564, %567 in 0 : vector<1x3xf32>, vector<1x3xf32> -> vector<2x3xf32>
    %c0_148 = arith.constant 0 : index
    %c0_149 = arith.constant 0 : index
    %569 = vector.load %arg3[%c0_148, %c0_149] : memref<1x1xf32, #tpu.memory_space<vmem>>, vector<1x1xf32>
    %570 = math.exp %569 : vector<1x1xf32>
    %571 = vector.broadcast %570 : vector<1x1xf32> to vector<2x3xf32>
    %572 = arith.mulf %568, %571 : vector<2x3xf32>
    %c0_150 = arith.constant 0 : index
    %c0_151 = arith.constant 0 : index
    %573 = vector.load %arg12[%c0_150, %c0_151] : memref<2x3xf32, #tpu.memory_space<vmem>>, vector<2x3xf32>
    tpu.vector_store %arg12[%c0_150, %c0_151], %572 {strides = array<i32>} : memref<2x3xf32, #tpu.memory_space<vmem>>, vector<2x3xf32>,
    return
  }
}

</mosaic_0001>

<bundles_post_ra>
// kernel: tile.8
= control target key start
LH: loop header
LB: loop body
LE: loop exit
PB: predicated region body
PF: predicated region fallthrough
CT: control target
= control target key end

     0   :  { %s22_s0 = inlined_call_operand.vmem [shape: s32[3], index: 0, kind: input, shape index: {}]   ;;  %s23_s1 = inlined_call_operand.vmem [shape: s32[2,3], index: 1, kind: output, shape index: {}]  }
   0x1   :  { %v4_v0 = vld [vmem:[%s22_s0] ss:$0 sm:$0xff] }
   0x2   :  { %5 = vst [vmem:[%s23_s1] sm:$0x3] %v4_v0 }

// kernel: inference.1
= control target key start
LH: loop header
LB: loop body
LE: loop exit
PB: predicated region body
PF: predicated region fallthrough
CT: control target
= control target key end

     0   :  { %s9260_s0 = inlined_call_operand.vmem [shape: f32[10,192], index: 0, kind: input, shape index: {}]   ;;  %s9261_s1 = inlined_call_operand.vmem [shape: f32[6,96], index: 1, kind: input, shape index: {}]   ;;  %s9262_s2 = inlined_call_operand.vmem [shape: f32[48,64], index: 2, kind: input, shape index: {}]   ;;  %s9263_s3 = inlined_call_operand.<no memory space> [shape: f32[1,1], index: 3, kind: input, shape index: {}]   ;;  %s9264_s4 = inlined_call_operand.vmem [shape: f32[12,128], index: 4, kind: input, shape index: {}]   ;;  %s9265_s5 = inlined_call_operand.vmem [shape: f32[357,32], index: 5, kind: input, shape index: {}]   ;;  %s9266_s6 = inlined_call_operand.vmem [shape: f32[96,128], index: 6, kind: input, shape index: {}]   ;;  %s9267_s7 = inlined_call_operand.vmem [shape: f32[10,256], index: 7, kind: input, shape index: {}]   ;;  %s9268_s8 = inlined_call_operand.vmem [shape: f32[64,192], index: 8, kind: input, shape index: {}]   ;;  %s9269_s9 = inlined_call_operand.vmem [shape: f32[64,256], index: 9, kind: input, shape index: {}]   ;;  %s9270_s10 = inlined_call_operand.vmem [shape: f32[384,64], index: 10, kind: input, shape index: {}]   ;;  %s9271_s11 = inlined_call_operand.vmem [shape: f32[14,64], index: 11, kind: input, shape index: {}]   ;;  %s9272_s12 = inlined_call_operand.hbm [shape: f32[2,3], index: 12, kind: output, shape index: {}]  }
   0x1   :  { %v17_v0 = vstv %s9263_s3 }
   0x2   :  { %18 = vst [vmem:[#allocation2] sm:$0x1] %v17_v0 }
   0x3   :  { %v50_v1 = vld [vmem:[%s9265_s5] sm:$0xff]  ;;  %v51_v2 = vld [vmem:[%s9265_s5 + $0x8] sm:$0xff]  ;;  %v52_v3 = vld [vmem:[%s9265_s5 + $0x10] sm:$0xff]  ;;  %v9274_v4 = vmov 0.0|0.0   ;;  %vm112_vm0 = vcmask 523264  }
   0x4   :  { %6668 = vmatprep.subr.bf16.mxu0 %v9274_v4  ;;  %v6669_v5 = vpack.c.bf16 %v51_v2, %v50_v1  ;;  %v53_v6 = vld [vmem:[%s9265_s5 + $0x18] sm:$0xff]  ;;  %v54_v8 = vld [vmem:[%s9265_s5 + $0x20] sm:$0xff]  ;;  %v55_v9 = vld [vmem:[%s9265_s5 + $0x28] sm:$0xff] }
   0x5   :  { %v6672_v7 = vpack.c.bf16 %v53_v6, %v52_v3  ;;  %v6675_v10 = vpack.c.bf16 %v55_v9, %v54_v8  ;;  %v56_v11 = vld [vmem:[%s9265_s5 + $0x30] sm:$0xff]  ;;  %v57_v12 = vld [vmem:[%s9265_s5 + $0x38] sm:$0xff]  ;;  %v45_v13 = vld [vmem:[%s9260_s0 + $0x8] sm:$0xff] }
   0x6   :  { %6670 = vmatpush1.bf16.msra.mxu0 %v6669_v5  ;;  %5840 = vmatprep.mubr.msk.f32.mxu0 %vm112_vm0, %v45_v13 }
   0x7   :  { %6671 = vmatprep.subr.bf16.mxu0 %v9274_v4 }
   0xa   :  { %6673 = vmatpush1.bf16.msra.mxu0 %v6672_v7 }
   0xb   :  { %6674 = vmatprep.subr.bf16.mxu0 %v9274_v4 }
   0xc   :  { %19 = vsyncpa [#allocation4], 0  ;;  %v6678_v14 = vpack.c.bf16 %v57_v12, %v56_v11  ;;  %v58_v15 = vld [vmem:[%s9265_s5 + $0x40] sm:$0xff]  ;;  %v59_v16 = vld [vmem:[%s9265_s5 + $0x48] sm:$0xff]  ;;  %vm110_vm1 = vcmask 1044480   ;;  %vm194_vm2 = vcmask 261120   ;;  %v223_v1 = vlaneseq }
   0xd   :  { %v6681_v17 = vpack.c.bf16 %v59_v16, %v58_v15  ;;  %v60_v18 = vld [vmem:[%s9265_s5 + $0x50] sm:$0xff]  ;;  %v61_v19 = vld [vmem:[%s9265_s5 + $0x58] sm:$0xff]  ;;  %v62_v21 = vld [vmem:[%s9265_s5 + $0x60] sm:$0xff]  ;;  %vm198_vm3 = vcmask 254976   ;;  %vm7415_vm4 = vmmov 0   ;;  %s7416_s14 = smov 96  }
   0xe   :  { %6676 = vmatpush1.bf16.msra.mxu0 %v6675_v10  ;;  %v6684_v20 = vpack.c.bf16 %v61_v19, %v60_v18  ;;  %v63_v22 = vld [vmem:[%s9265_s5 + $0x68] sm:$0xff]  ;;  %v64_v24 = vld [vmem:[%s9265_s5 + $0x70] sm:$0xff]  ;;  %v65_v25 = vld [vmem:[%s9265_s5 + $0x78] sm:$0xff]  ;;  %v7600_v6 = vshrl.u32 %v223_v1, 7  ;;  %vm701_vm5 = vcmask 1042432   ;;  %s7417_s15 = smov 80  }
   0xf   :  { %6677 = vmatprep.subr.bf16.mxu0 %v9274_v4  ;;  %v6687_v23 = vpack.c.bf16 %v63_v22, %v62_v21  ;;  %v6690_v26 = vpack.c.bf16 %v65_v25, %v64_v24  ;;  %v66_v27 = vld [vmem:[%s9265_s5 + $0x80] sm:$0xff]  ;;  %v67_v28 = vld [vmem:[%s9265_s5 + $0x88] sm:$0xff]  ;;  %v68_v30 = vld [vmem:[%s9265_s5 + $0x90] sm:$0xff]  ;;  %vm363_vm6 = vcmask 130048   ;;  %vm439_vm7 = vcmask 36864   ;;  %s7418_s16 = smov 64  }
  0x10   :  { %v6693_v29 = vpack.c.bf16 %v67_v28, %v66_v27  ;;  %v69_v31 = vld [vmem:[%s9265_s5 + $0x98] sm:$0xff]  ;;  %v70_v33 = vld [vmem:[%s9265_s5 + $0xa0] sm:$0xff]  ;;  %v71_v34 = vld [vmem:[%s9265_s5 + $0xa8] sm:$0xff]  ;;  %9292 = vst [vmem:[#allocation6_spill] sm:$0xff] %v7600_v6  ;;  %v7603_v8 = vsub.s32 0, %v7600_v6  ;;  %v7611_v10 = vsub.s32 1, %v7600_v6 }
  0x11   :  { %v6696_v32 = vpack.c.bf16 %v69_v31, %v68_v30  ;;  %v6699_v35 = vpack.c.bf16 %v71_v34, %v70_v33  ;;  %v72_v36 = vld [vmem:[%s9265_s5 + $0xb0] sm:$0xff]  ;;  %v73_v37 = vld [vmem:[%s9265_s5 + $0xb8] sm:$0xff]  ;;  %v44_v39 = vld [vmem:[%s9260_s0] sm:$0xff]  ;;  %s7419_s17 = smov 112   ;;  %vm453_vm8 = vcmask 39936   ;;  %s7420_s18 = smov 48  }
  0x12   :  { %6679 = vmatpush1.bf16.msra.mxu0 %v6678_v14  ;;  %v6702_v38 = vpack.c.bf16 %v73_v37, %v72_v36  ;;  %v47_v40 = vld [vmem:[%s9260_s0 + $0x18] sm:$0x3]  ;;  %v46_v41 = vld [vmem:[%s9260_s0 + $0x10] sm:$0x3]  ;;  %v94_v42 = vld [vmem:[%s9265_s5 + $0x160] sm:$0x1f] }
  0x13   :  { %6680 = vmatprep.subr.bf16.mxu0 %v9274_v4  ;;  %v108_v43 = vrot.slane %v94_v42, 3  ;;  %9293 = vst [vmem:[#allocation7_spill] sm:$0xff] %v7603_v8  ;;  %v7608_v9 = vld [vmem:[%s9264_s4] sm:$0xff]  ;;  %9294 = vst [vmem:[#allocation8_spill] sm:$0xff] %v7611_v10  ;;  %v96_v34 = vld [vmem:[%s9266_s6 + $0x8] sm:$0xff]  ;;  %s7421_s26 = smov 16  }
  0x14   :  { %v226_v11 = vrot.slane %v7608_v9, %v7603_v8  ;;  %v232_v14 = vrot.slane %v7608_v9, %v7611_v10  ;;  %v95_v33 = vld [vmem:[%s9266_s6] sm:$0xff]  ;;  %v98_v37 = vld [vmem:[%s9266_s6 + $0x18] sm:$0xff]  ;;  %vm1357_vm9 = vcmask 1040384   ;;  %vm1456_vm10 = vcmask 517120   ;;  %s7423_s24 = smov 32  }
  0x15   :  { %v111_v44 = vsel %vm110_vm1, %v94_v42, %v108_v43  ;;  %v6704_v36 = vpack.c.bf16 %v96_v34, %v95_v33  ;;  %vm1555_vm11 = vcmask 1043456   ;;  %vm1639_vm12 = vcmp.ge.s32.totalorder %v7600_v6, 1 }
  0x16   :  { %6682 = vmatpush1.bf16.msra.mxu0 %v6681_v17  ;;  %vm1641_vm13 = vcmp.lt.s32.totalorder %v7600_v6, 5  ;;  %vm1551_vm15 = vcmask 31744  }
  0x17   :  { %6683 = vmatprep.subr.bf16.mxu0 %v9274_v4  ;;  %6705 = vmatprep.subr.bf16.mxu1 %v6704_v36  ;;  %vm1643_vm14 = vmand %vm1639_vm12, %vm1641_vm13 }
  0x18   :  { %6707 = vmatpush3.bf16.msra.mxu1 %v6704_v36 }
  0x1a   :  { %6685 = vmatpush1.bf16.msra.mxu0 %v6684_v20 }
  0x1b   :  { %6686 = vmatprep.subr.bf16.mxu0 %v9274_v4 }
  0x1e   :  { %6688 = vmatpush1.bf16.msra.mxu0 %v6687_v23 }
  0x1f   :  { %6689 = vmatprep.subr.bf16.mxu0 %v9274_v4 }
  0x22   :  { %6691 = vmatpush1.bf16.msra.mxu0 %v6690_v26 }
  0x23   :  { %6692 = vmatprep.subr.bf16.mxu0 %v9274_v4 }
  0x26   :  { %6694 = vmatpush1.bf16.msra.mxu0 %v6693_v29 }
  0x27   :  { %6695 = vmatprep.subr.bf16.mxu0 %v9274_v4 }
  0x2a   :  { %6697 = vmatpush1.bf16.msra.mxu0 %v6696_v32 }
  0x2b   :  { %6698 = vmatprep.subr.bf16.mxu0 %v9274_v4 }
  0x2e   :  { %6700 = vmatpush1.bf16.msra.mxu0 %v6699_v35  ;;  %v97_v35 = vld [vmem:[%s9266_s6 + $0x10] sm:$0xff] }
  0x2f   :  { %6701 = vmatprep.subr.bf16.mxu0 %v9274_v4 }
  0x32   :  { %6703 = vmatpush1.bf16.msra.mxu0 %v6702_v38  ;;  %v6708_v38 = vpack.c.bf16 %v98_v37, %v97_v35 }
  0x34   :  { %6709 = vmatprep.subr.bf16.mxu1 %v6708_v38 }
  0x35   :  { %184 = vmatmul.mubr.f32.vlgmr.msra.gmra.mrb[0].mxu0 %v44_v39  ;;  %6711 = vmatpush3.bf16.msra.mxu1 %v6708_v38 }
  0x36   :  { %5841 = vmatprep.mubr.msk.f32.mxu0 %vm112_vm0, %v47_v40 }
  0x39   :  { %189 = vmatmul.mubr.f32.gmra.mrb[2].mxu0 %v46_v41 }
 0x108   :  { %v185_v45 = vpop.f32.mrb[0].mxu0 }
 0x109   :  { %v186_v46 = vadd.f32 %v185_v45, %v111_v44  ;;  %v187_v47 = vpop.f32.mrb[1].mxu0  ;;  %v7642_v45 = vsub.s32 2, %v7600_v6 }
 0x10b   :  { %v195_v48 = vsel %vm194_vm2, %v186_v46, 0.0  ;;  %v264_v47 = vrot.slane %v7608_v9, %v7642_v45 }
 0x10c   :  { %v190_v49 = vpop.f32.mrb[2].mxu0  ;;  %196 = vadd.xlane.f32.xlu0 %v195_v48 }
 0x10d   :  { %v191_v50 = vadd.f32 %v190_v49, %v108_v43  ;;  %v192_v51 = vpop.f32.mrb[3].mxu0 }
 0x10f   :  { %v199_v52 = vsel %vm198_vm3, %v191_v50, 0.0 }
 0x110   :  { %200 = vadd.xlane.f32.xlu0 %v199_v52 }
 0x199   :  { %v197_v53 = vpop.xlane.xlu0 %196 }
 0x19a   :  { %v203_v54 = vmul.f32 0.03125, %v197_v53 }
 0x19c   :  { %v205_v55 = vsub.f32 %v186_v46, %v203_v54  ;;  %v7645_v46 = vsub.s32 3, %v7600_v6 }
 0x19d   :  { %v201_v56 = vpop.xlane.xlu0 %200 }
 0x19e   :  { %v204_v57 = vmul.f32 0.03125, %v201_v56  ;;  %v207_v58 = vmul.f32 %v205_v55, %v205_v55 }
 0x1a0   :  { %v206_v59 = vsub.f32 %v191_v50, %v204_v57  ;;  %v209_v60 = vsel %vm194_vm2, %v207_v58, 0.0  ;;  %v270_v50 = vrot.slane %v7608_v9, %v7645_v46  ;;  %v9276_v57 = vmov 0.0  }
 0x1a1   :  { %210 = vadd.xlane.f32.xlu1 %v209_v60  ;;  %6292 = vmatprep.subr.mxu1 %v9276_v57  ;;  %v7657_v58 = vsub.s32 4, %v7600_v6 }
 0x1a2   :  { %v208_v61 = vmul.f32 %v206_v59, %v206_v59 }
 0x1a3   :  { %9295 = vst [vmem:[#allocation9_spill] sm:$0xff] %v7657_v58 }
 0x1a4   :  { %v212_v62 = vsel %vm198_vm3, %v208_v61, 0.0 }
 0x1a5   :  { %213 = vadd.xlane.f32.xlu1 %v212_v62 }
 0x22e   :  { %v211_v63 = vpop.xlane.xlu1 %210 }
 0x22f   :  { %v215_v0 = vmul.f32 0.03125, %v211_v63 }
 0x231   :  { %v217_v2 = vadd.f32 1e-05, %v215_v0 }
 0x232   :  { %v214_v3 = vpop.xlane.xlu1 %213 }
 0x233   :  { %7100 = vrsqrt.f32 %v217_v2  ;;  %v216_v5 = vmul.f32 0.03125, %v214_v3 }
 0x235   :  { %v218_v7 = vadd.f32 1e-05, %v216_v5 }
 0x237   :  { %7102 = vrsqrt.f32 %v218_v7 }
 0x23d   :  { %v7101_v12 = vpop.eup %7100 }
 0x23e   :  { %v221_v13 = vmul.f32 %v7101_v12, %v205_v55 }
 0x240   :  { %v227_v15 = vmul.f32 %v226_v11, %v221_v13 }
 0x241   :  { %v7103_v16 = vpop.eup %7102 }
 0x242   :  { %v7617_v17 = vadd.f32 %v232_v14, %v227_v15  ;;  %v222_v18 = vmul.f32 %v7103_v16, %v206_v59  ;;  %v276_v59 = vrot.slane %v7608_v9, %v7657_v58 }
 0x244   :  { %v235_v19 = vsel %vm194_vm2, %v7617_v17, 0.0  ;;  %v228_v20 = vmul.f32 %v226_v11, %v222_v18 }
 0x245   :  { %236 = vadd.xlane.f32.xlu0 %v235_v19 }
 0x246   :  { %v7621_v21 = vadd.f32 %v232_v14, %v228_v20 }
 0x248   :  { %v238_v22 = vsel %vm198_vm3, %v7621_v21, 0.0 }
 0x249   :  { %239 = vadd.xlane.f32.xlu1 %v238_v22 }
 0x2d2   :  { %v237_v23 = vpop.xlane.xlu0 %236 }
 0x2d3   :  { %v241_v24 = vmul.f32 0.03125, %v237_v23 }
 0x2d5   :  { %v243_v25 = vsub.f32 %v7617_v17, %v241_v24 }
 0x2d6   :  { %v240_v26 = vpop.xlane.xlu1 %239 }
 0x2d7   :  { %v242_v27 = vmul.f32 0.03125, %v240_v26  ;;  %v245_v28 = vmul.f32 %v243_v25, %v243_v25 }
 0x2d9   :  { %v244_v29 = vsub.f32 %v7621_v21, %v242_v27  ;;  %v247_v30 = vsel %vm194_vm2, %v245_v28, 0.0 }
 0x2da   :  { %248 = vadd.xlane.f32.xlu0 %v247_v30 }
 0x2db   :  { %v246_v31 = vmul.f32 %v244_v29, %v244_v29 }
 0x2dd   :  { %v250_v32 = vsel %vm198_vm3, %v246_v31, 0.0 }
 0x2de   :  { %251 = vadd.xlane.f32.xlu1 %v250_v32 }
 0x367   :  { %v249_v39 = vpop.xlane.xlu0 %248 }
 0x368   :  { %v253_v40 = vmul.f32 0.03125, %v249_v39 }
 0x36a   :  { %v255_v41 = vadd.f32 1e-05, %v253_v40 }
 0x36b   :  { %v252_v42 = vpop.xlane.xlu1 %251 }
 0x36c   :  { %7104 = vrsqrt.f32 %v255_v41  ;;  %v254_v43 = vmul.f32 0.03125, %v252_v42 }
 0x36e   :  { %v256_v44 = vadd.f32 1e-05, %v254_v43 }
 0x370   :  { %7106 = vrsqrt.f32 %v256_v44 }
 0x376   :  { %v7105_v48 = vpop.eup %7104 }
 0x377   :  { %v259_v49 = vmul.f32 %v7105_v48, %v243_v25 }
 0x379   :  { %v265_v51 = vmul.f32 %v264_v47, %v259_v49 }
 0x37a   :  { %v7107_v52 = vpop.eup %7106 }
 0x37b   :  { %v260_v53 = vmul.f32 %v7107_v52, %v244_v29  ;;  %v271_v54 = vadd.f32 %v270_v50, %v265_v51 }
 0x37d   :  { %v266_v55 = vmul.f32 %v264_v47, %v260_v53  ;;  %6289 = vmatprep.mubr.msk.f32.mxu1 %vm194_vm2, %v271_v54 }
 0x37f   :  { %v272_v56 = vadd.f32 %v270_v50, %v266_v55 }
 0x381   :  { %6290 = vmatmul.mubr.msk.f32.vlgmr.msra.gmra.mrb[0].mxu1 %vm194_vm2, %v272_v56 }
 0x382   :  { %6294 = vmatprep.mubr.msk.f32.mxu1 %vm7415_vm4, %v9276_v57 }
 0x454   :  { %v6291_v60 = vpop.f32.mrb[0].mxu1 }
 0x455   :  { %v7661_v61 = vadd.f32 %v6291_v60, %v276_v59  ;;  %v349_v62 = vpop.f32.mrb[1].mxu1 }
 0x456   :  { %v7663_v63 = vadd.f32 %v349_v62, %v276_v59 }
 0x457   :  { %v359_v0 = vmul.f32 0.25, %v7661_v61  ;;  %v707_v39 = vrot.slane %v7661_v61, 5 }
 0x458   :  { %361 = vrot.lane.b32.xlu0 %v7663_v63, %s7416_s14  ;;  %v358_v2 = vmul.f32 0.25, %v7663_v63  ;;  %v706_v40 = vrot.slane %v7663_v63, 5 }
 0x459   :  { %v703_v3 = vrot.slane %v359_v0, 5 }
 0x45a   :  { %v702_v5 = vrot.slane %v358_v2, 5  ;;  %v708_v41 = vsel %vm701_vm5, %v706_v40, %v707_v39  ;;  %v7758_v39 = vsub.s32 5, %v7600_v6 }
 0x45c   :  { %531 = vrot.lane.b32.xlu0 %v7663_v63, %s7417_s15  ;;  %v7672_v7 = vsel %vm701_vm5, %v702_v5, %v703_v3  ;;  %9296 = vst [vmem:[#allocation10_spill] sm:$0xff] %v7758_v39  ;;  %v1133_v40 = vrot.slane %v7608_v9, %v7758_v39 }
 0x4ca   :  { %v362_v11 = vpop.permute.xlu0 %361 }
 0x4cb   :  { %6293 = vmatpush3.xpose.msk.msra.mxu1 %vm363_vm6, %v362_v11 }
 0x4cc   :  { %6297 = vmatprep.subr.mxu1 %v9276_v57 }
 0x4ce   :  { %6295 = vmatmul.mubr.msk.f32.vlgmr.msra.gmra.mrb[2].mxu1 %vm363_vm6, %v358_v2  ;;  %v532_v26 = vpop.permute.xlu0 %531 }
 0x4cf   :  { %6299 = vmatprep.mubr.msk.f32.mxu1 %vm7415_vm4, %v9276_v57 }
 0x5a1   :  { %v435_v12 = vpop.f32.mrb[2].mxu1 }
 0x5a2   :  { %v6296_v13 = vpop.f32.mrb[3].mxu1  ;;  %v440_v14 = vsel %vm439_vm7, %v435_v12, -inf }
 0x5a3   :  { %441 = vmax.xlane.f32.xlu1 %v440_v14 }
 0x5b4   :  { %451 = vrot.lane.b32.xlu1 %v7663_v63, %s7418_s16 }
 0x630   :  { %v442_v15 = vpop.xlane.xlu1 %441 }
 0x631   :  { %v443_v16 = vsub.f32 %v435_v12, %v442_v15 }
 0x633   :  { %v444_v18 = vmul.f32 1.442695, %v443_v16 }
 0x634   :  { %v452_v19 = vpop.permute.xlu1 %451 }
 0x635   :  { %7108 = vpow2.f32 %v444_v18  ;;  %6298 = vmatpush3.msk.msra.mxu1 %vm110_vm1, %v452_v19 }
 0x636   :  { %6302 = vmatprep.subr.mxu1 %v9276_v57 }
 0x63f   :  { %v7109_v20 = vpop.eup %7108 }
 0x640   :  { %v446_v22 = vsel %vm439_vm7, %v7109_v20, 0.0 }
 0x641   :  { %447 = vadd.xlane.f32.xlu1 %v446_v22 }
 0x652   :  { %529 = vrot.lane.b32.xlu1 %v358_v2, %s7419_s17 }
 0x6ce   :  { %v448_v23 = vpop.xlane.xlu1 %447 }
 0x6cf   :  { %7110 = vrcp.f32 %v448_v23 }
 0x6d2   :  { %v530_v27 = vpop.permute.xlu1 %529 }
 0x6d9   :  { %v7111_v24 = vpop.eup %7110 }
 0x6da   :  { %v450_v25 = vmul.f32 %v7111_v24, %v7109_v20  ;;  %v90_v24 = vld [vmem:[%s9265_s5 + $0x140] sm:$0xff] }
 0x6dc   :  { %6300 = vmatmul.mubr.msk.f32.vlgmr.msra.gmra.mrb[4].mxu1 %vm453_vm8, %v450_v25  ;;  %v91_v25 = vld [vmem:[%s9265_s5 + $0x148] sm:$0xff] }
 0x6dd   :  { %6303 = vmatpush3.xpose.msk.msra.mxu1 %vm363_vm6, %v532_v26  ;;  %6304 = vmatprep.mubr.msk.f32.mxu1 %vm7415_vm4, %v9276_v57  ;;  %v6712_v26 = vpack.c.bf16 %v91_v25, %v90_v24 }
 0x6de   :  { %6307 = vmatprep.subr.mxu1 %v9276_v57 }
 0x6e0   :  { %6305 = vmatmul.mubr.msk.f32.vlgmr.msra.gmra.mrb[6].mxu1 %vm363_vm6, %v530_v27  ;;  %v92_v27 = vld [vmem:[%s9265_s5 + $0x150] sm:$0xff] }
 0x6e1   :  { %6309 = vmatprep.mubr.msk.f32.mxu1 %vm7415_vm4, %v9276_v57 }
 0x7af   :  { %v7694_v28 = vpop.f32.mrb[4].mxu1 }
 0x7b0   :  { %v6301_v29 = vpop.f32.mrb[5].mxu1 }
 0x7b1   :  { %v93_v29 = vld [vmem:[%s9265_s5 + $0x158] sm:$0xff] }
 0x7b3   :  { %v603_v30 = vpop.f32.mrb[6].mxu1 }
 0x7b4   :  { %v6306_v31 = vpop.f32.mrb[7].mxu1  ;;  %v607_v32 = vsel %vm439_vm7, %v603_v30, -inf }
 0x7b5   :  { %608 = vmax.xlane.f32.xlu0 %v607_v32 }
 0x7cb   :  { %618 = vrot.lane.b32.xlu0 %v7663_v63, %s7420_s18 }
 0x842   :  { %v609_v33 = vpop.xlane.xlu0 %608 }
 0x843   :  { %v610_v34 = vsub.f32 %v603_v30, %v609_v33  ;;  %v6716_v30 = vpack.c.bf16 %v93_v29, %v92_v27  ;;  %v74_v29 = vld [vmem:[%s9265_s5 + $0xc0] sm:$0xff] }
 0x845   :  { %v611_v35 = vmul.f32 1.442695, %v610_v34 }
 0x846   :  { %v619_v36 = vpop.permute.xlu0 %618 }
 0x847   :  { %7112 = vpow2.f32 %v611_v35  ;;  %6308 = vmatpush3.msk.msra.mxu1 %vm110_vm1, %v619_v36 }
 0x848   :  { %6312 = vmatprep.subr.mxu1 %v9276_v57 }
 0x851   :  { %v7113_v37 = vpop.eup %7112 }
 0x852   :  { %v613_v38 = vsel %vm439_vm7, %v7113_v37, 0.0 }
 0x853   :  { %614 = vadd.xlane.f32.xlu1 %v613_v38 }
 0x864   :  { %709 = vrot.lane.b32.xlu1 %v708_v41, %s7416_s14 }
 0x8e0   :  { %v615_v42 = vpop.xlane.xlu1 %614 }
 0x8e1   :  { %7114 = vrcp.f32 %v615_v42 }
 0x8e4   :  { %v710_v47 = vpop.permute.xlu1 %709 }
 0x8eb   :  { %v7115_v43 = vpop.eup %7114 }
 0x8ec   :  { %v617_v44 = vmul.f32 %v7115_v43, %v7113_v37 }
 0x8ee   :  { %6310 = vmatmul.mubr.msk.f32.vlgmr.msra.gmra.mrb[8].mxu1 %vm453_vm8, %v617_v44 }
 0x8ef   :  { %6313 = vmatpush3.xpose.msk.msra.mxu1 %vm363_vm6, %v710_v47  ;;  %6314 = vmatprep.mubr.msk.f32.mxu1 %vm7415_vm4, %v9276_v57 }
 0x8f0   :  { %6317 = vmatprep.subr.mxu1 %v9276_v57 }
 0x8f2   :  { %6315 = vmatmul.mubr.msk.f32.vlgmr.msra.gmra.mrb[10].mxu1 %vm363_vm6, %v7672_v7 }
 0x8f3   :  { %6319 = vmatprep.mubr.msk.f32.mxu1 %vm7415_vm4, %v9276_v57 }
 0x9c1   :  { %v7715_v48 = vpop.f32.mrb[8].mxu1 }
 0x9c2   :  { %v6311_v49 = vpop.f32.mrb[9].mxu1 }
 0x9c5   :  { %v781_v50 = vpop.f32.mrb[10].mxu1 }
 0x9c6   :  { %v6316_v51 = vpop.f32.mrb[11].mxu1  ;;  %v785_v52 = vsel %vm439_vm7, %v781_v50, -inf }
 0x9c7   :  { %786 = vmax.xlane.f32.xlu0 %v785_v52 }
 0x9dd   :  { %796 = vrot.lane.b32.xlu0 %v708_v41, %s7418_s16 }
 0x9e1   :  { %873 = vrot.lane.b32.xlu0 %v7672_v7, %s7419_s17 }
 0xa54   :  { %v787_v53 = vpop.xlane.xlu0 %786 }
 0xa55   :  { %v788_v54 = vsub.f32 %v781_v50, %v787_v53 }
 0xa57   :  { %v789_v55 = vmul.f32 1.442695, %v788_v54 }
 0xa58   :  { %v797_v56 = vpop.permute.xlu0 %796 }
 0xa59   :  { %7116 = vpow2.f32 %v789_v55  ;;  %6318 = vmatpush3.msk.msra.mxu1 %vm110_vm1, %v797_v56 }
 0xa5a   :  { %6322 = vmatprep.subr.mxu1 %v9276_v57 }
 0xa5c   :  { %v874_v2 = vpop.permute.xlu0 %873 }
 0xa63   :  { %v7117_v59 = vpop.eup %7116 }
 0xa64   :  { %v791_v60 = vsel %vm439_vm7, %v7117_v59, 0.0 }
 0xa65   :  { %792 = vadd.xlane.f32.xlu1 %v791_v60  ;;  %v99_v60 = vld [vmem:[%s9266_s6 + $0x20] sm:$0xff] }
 0xa76   :  { %875 = vrot.lane.b32.xlu1 %v708_v41, %s7417_s15 }
 0xaf2   :  { %v793_v61 = vpop.xlane.xlu1 %792 }
 0xaf3   :  { %7118 = vrcp.f32 %v793_v61  ;;  %v100_v61 = vld [vmem:[%s9266_s6 + $0x28] sm:$0xff] }
 0xaf6   :  { %v876_v0 = vpop.permute.xlu1 %875 }
 0xafd   :  { %v7119_v62 = vpop.eup %7118 }
 0xafe   :  { %v795_v63 = vmul.f32 %v7119_v62, %v7117_v59  ;;  %v6720_v62 = vpack.c.bf16 %v100_v61, %v99_v60 }
 0xb00   :  { %6320 = vmatmul.mubr.msk.f32.vlgmr.msra.gmra.mrb[12].mxu1 %vm453_vm8, %v795_v63  ;;  %6721 = vmatprep.subr.bf16.mxu0 %v6720_v62  ;;  %v101_v63 = vld [vmem:[%s9266_s6 + $0x30] sm:$0xff] }
 0xb01   :  { %6323 = vmatpush3.xpose.msk.msra.mxu1 %vm363_vm6, %v876_v0  ;;  %6324 = vmatprep.mubr.msk.f32.mxu1 %vm7415_vm4, %v9276_v57  ;;  %v102_v0 = vld [vmem:[%s9266_s6 + $0x38] sm:$0xff] }
 0xb02   :  { %6327 = vmatprep.subr.mxu1 %v9276_v57  ;;  %6723 = vmatpush3.bf16.msra.mxu0 %v6720_v62 }
 0xb04   :  { %6325 = vmatmul.mubr.msk.f32.vlgmr.msra.gmra.mrb[14].mxu1 %vm363_vm6, %v874_v2  ;;  %v6724_v2 = vpack.c.bf16 %v102_v0, %v101_v63 }
 0xb05   :  { %6329 = vmatprep.mubr.msk.f32.mxu1 %vm7415_vm4, %v9276_v57 }
 0xb06   :  { %6725 = vmatprep.subr.bf16.mxu0 %v6724_v2 }
 0xb07   :  { %6727 = vmatpush3.bf16.msra.mxu0 %v6724_v2 }
 0xb08   :  { %6760 = vmatprep.subr.bf16.mxu0 %v9274_v4 }
 0xbd3   :  { %v869_v3 = vpop.f32.mrb[12].mxu1 }
 0xbd4   :  { %v6321_v5 = vpop.f32.mrb[13].mxu1 }
 0xbd7   :  { %v947_v7 = vpop.f32.mrb[14].mxu1 }
 0xbd8   :  { %v6326_v11 = vpop.f32.mrb[15].mxu1  ;;  %v951_v12 = vsel %vm439_vm7, %v947_v7, -inf }
 0xbd9   :  { %952 = vmax.xlane.f32.xlu1 %v951_v12 }
 0xc66   :  { %v953_v13 = vpop.xlane.xlu1 %952 }
 0xc67   :  { %v954_v14 = vsub.f32 %v947_v7, %v953_v13 }
 0xc69   :  { %v955_v15 = vmul.f32 1.442695, %v954_v14  ;;  %v7786_v14 = vsub.s32 6, %v7600_v6 }
 0xc6b   :  { %7120 = vpow2.f32 %v955_v15  ;;  %9297 = vst [vmem:[#allocation11_spill] sm:$0xff] %v7786_v14  ;;  %v9273_v15 = vsub.s32 7, %v7600_v6 }
 0xc75   :  { %v7121_v16 = vpop.eup %7120 }
 0xc76   :  { %v957_v18 = vsel %vm439_vm7, %v7121_v16, 0.0  ;;  %vm5824_vm7 = vcmask 17408  }
 0xc77   :  { %958 = vadd.xlane.f32.xlu0 %v957_v18 }
 0xc8d   :  { %962 = vrot.lane.b32.xlu0 %v708_v41, %s7420_s18 }
 0xd04   :  { %v959_v19 = vpop.xlane.xlu0 %958 }
 0xd05   :  { %7122 = vrcp.f32 %v959_v19 }
 0xd08   :  { %v963_v20 = vpop.permute.xlu0 %962 }
 0xd09   :  { %6328 = vmatpush3.msk.msra.mxu1 %vm110_vm1, %v963_v20  ;;  %v1171_v20 = vrot.slane %v7608_v9, %v9273_v15 }
 0xd0a   :  { %6713 = vmatprep.subr.bf16.mxu1 %v6712_v26 }
 0xd0f   :  { %v7123_v22 = vpop.eup %7122 }
 0xd10   :  { %v961_v23 = vmul.f32 %v7123_v22, %v7121_v16  ;;  %v1165_v16 = vrot.slane %v7608_v9, %v7786_v14  ;;  %v75_v9 = vld [vmem:[%s9265_s5 + $0xc8] sm:$0xff] }
 0xd12   :  { %6330 = vmatmul.mubr.msk.f32.vlgmr.msra.gmra.mrb[16].mxu1 %vm453_vm8, %v961_v23 }
 0xd13   :  { %6715 = vmatpush3.bf16.msra.mxu1 %v6712_v26 }
 0xd14   :  { %6717 = vmatprep.subr.bf16.mxu1 %v6716_v30 }
 0xd17   :  { %6719 = vmatpush3.bf16.msra.mxu1 %v6716_v30  ;;  %v6728_v30 = vpack.c.bf16 %v75_v9, %v74_v29 }
 0xd19   :  { %6729 = vmatprep.subr.bf16.mxu1 %v6728_v30 }
 0xde5   :  { %v1035_v31 = vpop.f32.mrb[16].mxu1 }
 0xde6   :  { %1040 = vrot.lane.b32.xlu1 %v1035_v31, %s7421_s26  ;;  %v6331_v32 = vpop.f32.mrb[17].mxu1  ;;  %v76_v31 = vld [vmem:[%s9265_s5 + $0xd0] sm:$0xff] }
 0xde7   :  { %v77_v32 = vld [vmem:[%s9265_s5 + $0xd8] sm:$0xff] }
 0xdea   :  { %696 = vrot.lane.b32.xlu1 %v7715_v48, %s7421_s26 }
 0xe58   :  { %v1041_v33 = vpop.permute.xlu1 %1040 }
 0xe59   :  { %v1043_v34 = vsel %vm363_vm6, %v869_v3, %v1041_v33  ;;  %v6732_v33 = vpack.c.bf16 %v77_v32, %v76_v31  ;;  %v103_v32 = vld [vmem:[%s9266_s6 + $0x40] sm:$0xff] }
 0xe5a   :  { %v1045_v35 = vrot.slane %v1043_v34, 3  ;;  %v78_v34 = vld [vmem:[%s9265_s5 + $0xe0] sm:$0xff] }
 0xe5c   :  { %v697_v36 = vpop.permute.xlu1 %696 }
 0xe5d   :  { %v699_v37 = vsel %vm363_vm6, %v7694_v28, %v697_v36 }
 0xe5e   :  { %v1047_v38 = vsel %vm110_vm1, %v699_v37, %v1045_v35  ;;  %v80_v37 = vld [vmem:[%s9265_s5 + $0xf0] sm:$0xff]  ;;  %vm8047_vm1 = vmpackc.low %vm194_vm2, %vm194_vm2 }
 0xe5f   :  { %6340 = vmatprep.mubr.msk.f32.mxu1 %vm194_vm2, %v1047_v38  ;;  %v81_v38 = vld [vmem:[%s9265_s5 + $0xf8] sm:$0xff] }
 0xe60   :  { %6341 = vmatmul.mubr.msk.f32.vlgmr.msra.gmra.mrb[18].mxu1 %vm194_vm2, %v1045_v35  ;;  %v79_v35 = vld [vmem:[%s9265_s5 + $0xe8] sm:$0xff] }
 0xe61   :  { %6731 = vmatpush3.bf16.msra.mxu1 %v6728_v30  ;;  %v6736_v36 = vpack.c.bf16 %v79_v35, %v78_v34  ;;  %v105_v34 = vld [vmem:[%s9266_s6 + $0x50] sm:$0xff]  ;;  %v106_v35 = vld [vmem:[%s9266_s6 + $0x58] sm:$0xff] }
 0xe62   :  { %6733 = vmatprep.subr.bf16.mxu1 %v6732_v33 }
 0xe65   :  { %6735 = vmatpush3.bf16.msra.mxu1 %v6732_v33 }
 0xe66   :  { %6737 = vmatprep.subr.bf16.mxu1 %v6736_v36 }
 0xe69   :  { %6739 = vmatpush3.bf16.msra.mxu1 %v6736_v36  ;;  %v6764_v36 = vpack.c.bf16 %v106_v35, %v105_v34 }
 0xf33   :  { %v6342_v41 = vpop.f32.mrb[18].mxu1 }
 0xf34   :  { %v1129_v42 = vadd.f32 %v6342_v41, %v7621_v21  ;;  %v1119_v43 = vpop.f32.mrb[19].mxu1  ;;  %v82_v41 = vld [vmem:[%s9265_s5 + $0x100] sm:$0xff] }
 0xf35   :  { %v1128_v44 = vadd.f32 %v1119_v43, %v7617_v17 }
 0xf36   :  { %v1135_v47 = vadd.f32 %v1133_v40, %v1129_v42  ;;  %v83_v42 = vld [vmem:[%s9265_s5 + $0x108] sm:$0xff] }
 0xf37   :  { %v7764_v28 = vadd.f32 %v1133_v40, %v1128_v44  ;;  %v6740_v40 = vpack.c.bf16 %v81_v38, %v80_v37  ;;  %v6744_v43 = vpack.c.bf16 %v83_v42, %v82_v41  ;;  %v84_v44 = vld [vmem:[%s9265_s5 + $0x110] sm:$0xff] }
 0xf38   :  { %v1139_v48 = vsel %vm198_vm3, %v1135_v47, 0.0 }
 0xf39   :  { %1140 = vadd.xlane.f32.xlu1 %v1139_v48  ;;  %v1136_v49 = vsel %vm194_vm2, %v7764_v28, 0.0  ;;  %6741 = vmatprep.subr.bf16.mxu1 %v6740_v40 }
 0xf3a   :  { %1137 = vadd.xlane.f32.xlu0 %v1136_v49  ;;  %6743 = vmatpush3.bf16.msra.mxu1 %v6740_v40  ;;  %v86_v49 = vld [vmem:[%s9265_s5 + $0x120] sm:$0xff] }
 0xf3b   :  { %6745 = vmatprep.subr.bf16.mxu1 %v6744_v43 }
 0xf3e   :  { %6747 = vmatpush3.bf16.msra.mxu1 %v6744_v43 }
 0xfc6   :  { %v1141_v50 = vpop.xlane.xlu1 %1140 }
 0xfc7   :  { %v1143_v51 = vmul.f32 0.03125, %v1141_v50  ;;  %v1138_v52 = vpop.xlane.xlu0 %1137  ;;  %v87_v50 = vld [vmem:[%s9265_s5 + $0x128] sm:$0xff] }
 0xfc8   :  { %v1142_v53 = vmul.f32 0.03125, %v1138_v52  ;;  %v88_v52 = vld [vmem:[%s9265_s5 + $0x130] sm:$0xff] }
 0xfc9   :  { %v1145_v54 = vsub.f32 %v1135_v47, %v1143_v51  ;;  %v85_v47 = vld [vmem:[%s9265_s5 + $0x118] sm:$0xff]  ;;  %v6752_v51 = vpack.c.bf16 %v87_v50, %v86_v49 }
 0xfca   :  { %v1144_v21 = vsub.f32 %v7764_v28, %v1142_v53  ;;  %v6748_v48 = vpack.c.bf16 %v85_v47, %v84_v44  ;;  %v89_v53 = vld [vmem:[%s9265_s5 + $0x138] sm:$0xff] }
 0xfcb   :  { %v1147_v56 = vmul.f32 %v1145_v54, %v1145_v54 }
 0xfcc   :  { %v1146_v55 = vmul.f32 %v1144_v21, %v1144_v21  ;;  %6749 = vmatprep.subr.bf16.mxu1 %v6748_v48 }
 0xfcd   :  { %v1151_v59 = vsel %vm198_vm3, %v1147_v56, 0.0  ;;  %6751 = vmatpush3.bf16.msra.mxu1 %v6748_v48 }
 0xfce   :  { %v1148_v17 = vsel %vm194_vm2, %v1146_v55, 0.0  ;;  %6753 = vmatprep.subr.bf16.mxu1 %v6752_v51 }
 0xfcf   :  { %1149 = vadd.xlane.f32.xlu0 %v1148_v17 }
 0xfd1   :  { %6755 = vmatpush3.bf16.msra.mxu1 %v6752_v51 }
 0xfd3   :  { %1152 = vadd.xlane.f32.xlu0 %v1151_v59 }
0x105c   :  { %v1150_v3 = vpop.xlane.xlu0 %1149 }
0x105d   :  { %v1154_v5 = vmul.f32 0.03125, %v1150_v3 }
0x105f   :  { %v1156_v7 = vadd.f32 1e-05, %v1154_v5 }
0x1060   :  { %v1153_v11 = vpop.xlane.xlu0 %1152 }
0x1061   :  { %7124 = vrsqrt.f32 %v1156_v7  ;;  %v1155_v12 = vmul.f32 0.03125, %v1153_v11 }
0x1063   :  { %v1157_v13 = vadd.f32 1e-05, %v1155_v12 }
0x1065   :  { %7126 = vrsqrt.f32 %v1157_v13 }
0x106b   :  { %v7125_v18 = vpop.eup %7124 }
0x106c   :  { %v1160_v19 = vmul.f32 %v7125_v18, %v1144_v21  ;;  %v49_v21 = vld [vmem:[%s9264_s4 + $0x8] sm:$0xf] }
0x106d   :  { %v1177_v55 = vrot.slane %v49_v21, %v7603_v8  ;;  %v1278_v18 = vrot.slane %v49_v21, %v7611_v10  ;;  %v1375_v41 = vrot.slane %v49_v21, %v7642_v45  ;;  %v1380_v43 = vrot.slane %v49_v21, %v7645_v46 }
0x106e   :  { %v1166_v22 = vmul.f32 %v1165_v16, %v1160_v19 }
0x106f   :  { %v7127_v23 = vpop.eup %7126 }
0x1070   :  { %v1161_v24 = vmul.f32 %v7127_v23, %v1145_v54  ;;  %v1172_v25 = vadd.f32 %v1171_v20, %v1166_v22  ;;  %v6756_v54 = vpack.c.bf16 %v89_v53, %v88_v52  ;;  %v1463_v53 = vld [vmem:[%s9271_s11] sm:$0xff] }
0x1072   :  { %v1167_v26 = vmul.f32 %v1165_v16, %v1161_v24  ;;  %6351 = vmatprep.mubr.msk.f32.mxu0 %vm194_vm2, %v1172_v25  ;;  %6757 = vmatprep.subr.bf16.mxu1 %v6756_v54 }
0x1073   :  { %6759 = vmatpush3.bf16.msra.mxu1 %v6756_v54 }
0x1074   :  { %v1173_v27 = vadd.f32 %v1171_v20, %v1167_v26 }
0x1076   :  { %6352 = vmatmul.mubr.msk.f32.vlgmr.msra.gmra.mrb[4].mxu0 %vm194_vm2, %v1173_v27 }
0x1077   :  { %6397 = vmatprep.mubr.msk.f32.mxu0 %vm7415_vm4, %v9276_v57 }
0x1149   :  { %v6353_v17 = vpop.f32.mrb[4].mxu0 }
0x114a   :  { %v1256_v56 = vadd.f32 %v6353_v17, %v1177_v55  ;;  %v1250_v59 = vpop.f32.mrb[5].mxu0 }
0x114b   :  { %v1251_v60 = vadd.f32 %v1250_v59, %v1177_v55  ;;  %v7422_v59 = vmov 0  }
0x114c   :  { %v5865_v61 = vmul.f32 -1.702, %v1256_v56  ;;  %7009 = vset.pattern.permute.xlu0 %v7422_v59  ;;  %7008 = vset.pattern.permute.xlu1 %v7422_v59 }
0x114d   :  { %v5864_v62 = vmul.f32 -1.702, %v1251_v60 }
0x114e   :  { %v1265_v63 = vmul.f32 1.442695, %v5865_v61  ;;  %v1464_v61 = vld [vmem:[%s9271_s11 + $0x8] sm:$0x3f] }
0x114f   :  { %v1263_v0 = vmul.f32 1.442695, %v5864_v62  ;;  %v1468_v62 = vrot.slane %v1464_v61, %v7657_v58 }
0x1150   :  { %7128 = vpow2.f32 %v1265_v63 }
0x1151   :  { %7130 = vpow2.f32 %v1263_v0 }
0x115a   :  { %v7129_v2 = vpop.eup %7128 }
0x115b   :  { %v7131_v3 = vpop.eup %7130  ;;  %v1268_v5 = vadd.f32 1.0, %v7129_v2 }
0x115c   :  { %v1267_v7 = vadd.f32 1.0, %v7131_v3 }
0x115d   :  { %7132 = vrcp.f32 %v1268_v5  ;;  %v1549_v5 = vrot.slane %v1464_v61, %v7758_v39  ;;  %v1692_v61 = vld [vmem:[%s9268_s8 + $0x38] sm:$0xff] }
0x115e   :  { %7134 = vrcp.f32 %v1267_v7 }
0x1167   :  { %v7133_v11 = vpop.eup %7132 }
0x1168   :  { %v7135_v12 = vpop.eup %7134  ;;  %v1274_v16 = vmul.f32 %v7133_v11, %v1256_v56  ;;  %v1550_v56 = vrot.slane %v1463_v53, 4 }
0x1169   :  { %v1273_v13 = vmul.f32 %v7135_v12, %v1251_v60  ;;  %v5871_v60 = vsel %vm1643_vm14, 1.0, %v9276_v57 }
0x116b   :  { %6386 = vmatprep.mubr.f32.mxu1 %v1273_v13 }
0x116c   :  { %6387 = vmatmul.mubr.f32.vlgmr.msra.gmra.mrb[20].mxu1 %v1274_v16 }
0x123f   :  { %v6388_v19 = vpop.f32.mrb[20].mxu1 }
0x1240   :  { %v1345_v20 = vpop.f32.mrb[21].mxu1 }
0x1241   :  { %v1346_v22 = vadd.f32 %v1345_v20, %v1278_v18  ;;  %v1650_v20 = vld [vmem:[%s9262_s2 + $0x8] sm:$0xff] }
0x1243   :  { %v1353_v23 = vadd.f32 %v1346_v22, %v7764_v28  ;;  %v104_v28 = vld [vmem:[%s9266_s6 + $0x48] sm:$0xff]  ;;  %v1649_v22 = vld [vmem:[%s9262_s2] sm:$0xff] }
0x1244   :  { %v6761_v33 = vpack.c.bf16 %v104_v28, %v103_v32  ;;  %v7931_v32 = vld [vmem:[%s9262_s2 + $0x20] sm:$0xff] }
0x1245   :  { %v1355_v24 = vrot.slane %v1353_v23, 4 }
0x1246   :  { %6762 = vmatpush3.bf16.msra.mxu0 %v6761_v33 }
0x1247   :  { %v1358_v25 = vsel %vm1357_vm9, %v1353_v23, %v1355_v24  ;;  %6763 = vmatprep.subr.bf16.mxu0 %v9274_v4 }
0x1248   :  { %v1359_v26 = vsel %vm198_vm3, %v1358_v25, 0.0 }
0x1249   :  { %1360 = vadd.xlane.f32.xlu0 %v1359_v26 }
0x124a   :  { %6765 = vmatpush3.bf16.msra.mxu0 %v6764_v36 }
0x124b   :  { %6400 = vmatprep.subr.mxu0 %v9276_v57 }
0x12d6   :  { %v1361_v27 = vpop.xlane.xlu0 %1360 }
0x12d7   :  { %v1362_v29 = vmul.f32 0.03125, %v1361_v27 }
0x12d9   :  { %v1363_v9 = vsub.f32 %v1358_v25, %v1362_v29 }
0x12db   :  { %v1364_v30 = vmul.f32 %v1363_v9, %v1363_v9 }
0x12dd   :  { %v1365_v31 = vsel %vm198_vm3, %v1364_v30, 0.0  ;;  %v7921_v30 = vld [vmem:[%s9262_s2 + $0x10] sm:$0xff] }
0x12de   :  { %1366 = vadd.xlane.f32.xlu1 %v1365_v31  ;;  %v7926_v31 = vld [vmem:[%s9262_s2 + $0x28] sm:$0xff] }
0x12ef   :  { %1657 = vperm.xlu1 %7008, %v5871_v60   ;;  %v1690_v60 = vld [vmem:[%s9268_s8 + $0x28] sm:$0xff] }
0x136b   :  { %v1367_v37 = vpop.xlane.xlu1 %1366 }
0x136c   :  { %v1368_v38 = vmul.f32 0.03125, %v1367_v37 }
0x136e   :  { %v1369_v40 = vadd.f32 1e-05, %v1368_v38 }
0x136f   :  { %v1658_v16 = vpop.permute.xlu1 %1657 }
0x1370   :  { %7136 = vrsqrt.f32 %v1369_v40 }
0x137a   :  { %v7137_v42 = vpop.eup %7136 }
0x137b   :  { %v1371_v44 = vmul.f32 %v7137_v42, %v1363_v9  ;;  %v7916_v9 = vld [vmem:[%s9262_s2 + $0x18] sm:$0xff] }
0x137d   :  { %v1376_v47 = vmul.f32 %v1375_v41, %v1371_v44 }
0x137f   :  { %v1381_v48 = vadd.f32 %v1380_v43, %v1376_v47 }
0x1381   :  { %6398 = vmatmul.mubr.msk.f32.vlgmr.msra.gmra.mrb[6].mxu0 %vm194_vm2, %v1381_v48 }
0x1382   :  { %6402 = vmatprep.mubr.msk.f32.mxu0 %vm7415_vm4, %v9276_v57  ;;  %6401 = vmatpush3.xpose.msk.msra.mxu0 %vm112_vm0, %v1463_v53  ;;  %v1686_v53 = vld [vmem:[%s9268_s8 + $0x8] sm:$0xff] }
0x1383   :  { %6405 = vmatprep.subr.mxu0 %v9276_v57 }
0x1454   :  { %v1451_v49 = vpop.f32.mrb[6].mxu0 }
0x1455   :  { %v1455_v50 = vmul.f32 %v1451_v49, %v1451_v49  ;;  %v6399_v51 = vpop.f32.mrb[7].mxu0 }
0x1457   :  { %v1457_v52 = vsel %vm1456_vm10, %v1455_v50, 0.0 }
0x1458   :  { %1458 = vadd.xlane.f32.xlu0 %v1457_v52 }
0x146e   :  { %1662 = vperm.xlu0 %7009, %v9276_v57  }
0x14e5   :  { %v1459_v54 = vpop.xlane.xlu0 %1458 }
0x14e6   :  { %v1460_v21 = vadd.f32 1e-12, %v1459_v54  ;;  %v1688_v54 = vld [vmem:[%s9268_s8 + $0x18] sm:$0xff] }
0x14e8   :  { %7138 = vrsqrt.f32 %v1460_v21  ;;  %v6766_v21 = vpack.c.bf16 %v1688_v54, %v1686_v53 }
0x14ed   :  { %v1663_v13 = vpop.permute.xlu0 %1662 }
0x14f2   :  { %v7139_v55 = vpop.eup %7138 }
0x14f3   :  { %v7879_v17 = vmul.f32 %v7139_v55, %v1451_v49  ;;  %v1685_v55 = vld [vmem:[%s9268_s8] sm:$0xff] }
0x14f5   :  { %9298 = vst [vmem:[#allocation12_spill] sm:$0xff] %v7879_v17  ;;  %6403 = vmatmul.mubr.msk.f32.vlgmr.msra.gmra.mrb[8].mxu0 %vm112_vm0, %v7879_v17 }
0x14f6   :  { %6407 = vmatprep.mubr.msk.f32.mxu0 %vm7415_vm4, %v9276_v57  ;;  %6406 = vmatpush3.msk.msra.mxu0 %vm1555_vm11, %v1550_v56  ;;  %v1687_v56 = vld [vmem:[%s9268_s8 + $0x10] sm:$0xff] }
0x14f7   :  { %v6768_v59 = vpack.c.bf16 %v1687_v56, %v1685_v55  ;;  %6767 = vmatprep.subr.bf16.mxu0 %v6766_v21 }
0x15c8   :  { %v1541_v63 = vpop.f32.mrb[8].mxu0 }
0x15c9   :  { %v1542_v0 = vadd.f32 %v1541_v63, %v1468_v62  ;;  %v6404_v2 = vpop.f32.mrb[9].mxu0  ;;  %v6770_v62 = vpack.c.bf16 %v1692_v61, %v1690_v60  ;;  %v1689_v63 = vld [vmem:[%s9268_s8 + $0x20] sm:$0xff]  ;;  %v1683_v60 = vld [vmem:[%s9267_s7 + $0x8] sm:$0xff] }
0x15cb   :  { %v1545_v3 = vmax.f32 %v1542_v0, 0.0  ;;  %v1691_v0 = vld [vmem:[%s9268_s8 + $0x30] sm:$0xff] }
0x15cc   :  { %v6772_v2 = vpack.c.bf16 %v1691_v0, %v1689_v63  ;;  %v8030_v63 = vrot.slane %v1683_v60, %v7642_v45 }
0x15cd   :  { %6408 = vmatmul.mubr.msk.f32.vlgmr.msra.gmra.mrb[10].mxu0 %vm1551_vm15, %v1545_v3  ;;  %v1694_v3 = vld [vmem:[%s9268_s8 + $0x48] sm:$0xff] }
0x15ce   :  { %2068 = vmatprep.mubr.f32.mxu0 %v9276_v57  ;;  %6769 = vmatpush1.bf16.msra.mxu0 %v6768_v59 }
0x15cf   :  { %6771 = vmatprep.subr.bf16.mxu0 %v6770_v62 }
0x15d2   :  { %6773 = vmatpush1.bf16.msra.mxu0 %v6772_v2 }
0x16a0   :  { %v1624_v7 = vpop.f32.mrb[10].mxu0 }
0x16a1   :  { %v1625_v11 = vadd.f32 %v1624_v7, %v1549_v5  ;;  %v6409_v12 = vpop.f32.mrb[11].mxu0  ;;  %v1696_v5 = vld [vmem:[%s9268_s8 + $0x58] sm:$0xff] }
0x16a2   :  { %v6774_v7 = vpack.c.bf16 %v1696_v5, %v1694_v3  ;;  %v1695_v12 = vld [vmem:[%s9268_s8 + $0x50] sm:$0xff] }
0x16a3   :  { %v1631_v18 = vrot.slane %v1625_v11, %v7603_v8  ;;  %v1635_v19 = vrot.slane %v1625_v11, %v7611_v10  ;;  %v1693_v11 = vld [vmem:[%s9268_s8 + $0x40] sm:$0xff] }
0x16a4   :  { %6775 = vmatprep.subr.bf16.mxu0 %v6774_v7 }
0x16a5   :  { %v7903_v23 = vmul.f32 %v1663_v13, %v1631_v18  ;;  %v1668_v24 = vmul.f32 %v1663_v13, %v1635_v19  ;;  %v7905_v25 = vmul.f32 %v1658_v16, %v1631_v18  ;;  %v1667_v26 = vmul.f32 %v1658_v16, %v1635_v19  ;;  %v1698_v16 = vld [vmem:[%s9268_s8 + $0x68] sm:$0xff]  ;;  %v1700_v18 = vld [vmem:[%s9268_s8 + $0x78] sm:$0xff]  ;;  %v1697_v19 = vld [vmem:[%s9268_s8 + $0x60] sm:$0xff] }
0x16a6   :  { %v6776_v13 = vpack.c.bf16 %v1695_v12, %v1693_v11 }
0x16a7   :  { %v7908_v27 = vadd.f32 %v7903_v23, %v1650_v20  ;;  %v7911_v29 = vadd.f32 %v7905_v25, %v1649_v22  ;;  %v7933_v28 = vadd.f32 %v1668_v24, %v1650_v20  ;;  %v7935_v33 = vadd.f32 %v1667_v26, %v1649_v22  ;;  %v1699_v22 = vld [vmem:[%s9268_s8 + $0x70] sm:$0xff] }
0x16a8   :  { %v7942_v36 = vadd.f32 %v1668_v24, %v7916_v9  ;;  %v7945_v37 = vadd.f32 %v1667_v26, %v7921_v30  ;;  %v7948_v38 = vadd.f32 %v1668_v24, %v7926_v31  ;;  %v7951_v40 = vadd.f32 %v1667_v26, %v7931_v32  ;;  %6777 = vmatpush1.bf16.msra.mxu0 %v6776_v13 }
0x16a9   :  { %9299 = vst [vmem:[#allocation13_spill] sm:$0xff] %v7933_v28  ;;  %v1774_v34 = vsel %vm112_vm0, %v7908_v27, 0.0  ;;  %v1771_v35 = vsel %vm112_vm0, %v7911_v29, 0.0  ;;  %v6778_v20 = vpack.c.bf16 %v1700_v18, %v1698_v16  ;;  %v6780_v24 = vpack.c.bf16 %v1699_v22, %v1697_v19 }
0x16aa   :  { %1775 = vadd.xlane.f32.xlu0 %v1774_v34  ;;  %1772 = vadd.xlane.f32.xlu1 %v1771_v35  ;;  %9300 = vst [vmem:[#allocation14_spill] sm:$0xff] %v7942_v36  ;;  %9301 = vst [vmem:[#allocation15_spill] sm:$0xff] %v7948_v38 }
0x16ab   :  { %9302 = vst [vmem:[#allocation16_spill] sm:$0xff] %v7951_v40  ;;  %6779 = vmatprep.subr.bf16.mxu0 %v6778_v20 }
0x16ac   :  { %6781 = vmatpush1.bf16.msra.mxu0 %v6780_v24 }
0x1737   :  { %v1776_v41 = vpop.xlane.xlu0 %1775  ;;  %v1773_v42 = vpop.xlane.xlu1 %1772 }
0x1738   :  { %v1809_v43 = vmul.f32 0.015625, %v1776_v41  ;;  %v1808_v44 = vmul.f32 0.015625, %v1773_v42 }
0x173a   :  { %v1821_v47 = vsub.f32 %v7908_v27, %v1809_v43  ;;  %v1820_v48 = vsub.f32 %v7911_v29, %v1808_v44  ;;  %v1682_v44 = vld [vmem:[%s9267_s7] sm:$0xff] }
0x173c   :  { %v1832_v49 = vmul.f32 %v1820_v48, %v1820_v48  ;;  %v1833_v51 = vmul.f32 %v1821_v47, %v1821_v47 }
0x173e   :  { %v1844_v50 = vsel %vm112_vm0, %v1832_v49, 0.0  ;;  %v1847_v52 = vsel %vm112_vm0, %v1833_v51, 0.0  ;;  %v8009_v49 = vrot.slane %v1682_v44, %v7603_v8  ;;  %v8012_v51 = vrot.slane %v1682_v44, %v7611_v10 }
0x173f   :  { %1845 = vadd.xlane.f32.xlu1 %v1844_v50 }
0x1743   :  { %1848 = vadd.xlane.f32.xlu1 %v1847_v52 }
0x17cc   :  { %v1846_v26 = vpop.xlane.xlu1 %1845 }
0x17cd   :  { %v1880_v34 = vmul.f32 0.015625, %v1846_v26  ;;  %v1638_v26 = vadd.s32 8, %v7600_v6 }
0x17cf   :  { %v1892_v35 = vadd.f32 1e-05, %v1880_v34  ;;  %v1766_v34 = vand.u32 127, %v223_v1 }
0x17d0   :  { %v1849_v41 = vpop.xlane.xlu1 %1848 }
0x17d1   :  { %7140 = vrsqrt.f32 %v1892_v35  ;;  %v1881_v42 = vmul.f32 0.015625, %v1849_v41  ;;  %vm1768_vm3 = vcmp.gt.s32.totalorder %v1766_v34, %v1638_v26  ;;  %vm1767_vm5 = vcmp.gt.s32.totalorder %v1766_v34, %v7600_v6 }
0x17d2   :  { %v8060_v35 = vsel %vm1768_vm3, -1e+09, %v9276_v57  ;;  %v8063_v41 = vsel %vm1767_vm5, -1e+09, %v9276_v57 }
0x17d3   :  { %v1893_v43 = vadd.f32 1e-05, %v1881_v42 }
0x17d5   :  { %7142 = vrsqrt.f32 %v1893_v43 }
0x17db   :  { %v7141_v50 = vpop.eup %7140 }
0x17dc   :  { %v1916_v52 = vmul.f32 %v7141_v50, %v1820_v48  ;;  %v8023_v48 = vrot.slane %v1682_v44, %v7642_v45 }
0x17de   :  { %v1932_v53 = vmul.f32 %v8009_v49, %v1916_v52 }
0x17df   :  { %v7143_v54 = vpop.eup %7142 }
0x17e0   :  { %v1948_v21 = vadd.f32 %v8012_v51, %v1932_v53  ;;  %v1917_v55 = vmul.f32 %v7143_v54, %v1821_v47  ;;  %v8073_v53 = vadd.f32 %v7903_v23, %v7916_v9 }
0x17e2   :  { %5872 = vmatmul.mubr.msk.f32.vlgmr.msra.gmra.mrb[12].mxu0 %vm112_vm0, %v1948_v21  ;;  %v1933_v56 = vmul.f32 %v8009_v49, %v1917_v55  ;;  %v1780_v54 = vsel %vm112_vm0, %v8073_v53, 0.0 }
0x17e3   :  { %2074 = vmatprep.mubr.f32.mxu0 %v9276_v57 }
0x17e4   :  { %v1949_v59 = vadd.f32 %v8012_v51, %v1933_v56 }
0x17e6   :  { %5873 = vmatmul.mubr.msk.f32.gmra.mrb[14].mxu0 %vm112_vm0, %v1949_v59 }
0x17e7   :  { %2080 = vmatprep.mubr.f32.mxu0 %v9276_v57 }
0x18b5   :  { %v2070_v47 = vpop.f32.mrb[12].mxu0 }
0x18b6   :  { %v2071_v61 = vadd.f32 %v2070_v47, %v8023_v48  ;;  %v2072_v62 = vpop.f32.mrb[13].mxu0 }
0x18b7   :  { %v8035_v7 = vadd.f32 %v2072_v62, %v8030_v63 }
0x18b8   :  { %v2141_v0 = vmul.f32 0.17677669, %v2071_v61 }
0x18b9   :  { %v2076_v2 = vpop.f32.mrb[14].mxu0 }
0x18ba   :  { %v2077_v3 = vadd.f32 %v2076_v2, %v8023_v48  ;;  %v2078_v5 = vpop.f32.mrb[15].mxu0  ;;  %6414 = vmatprep.mubr.msk.f32.mxu1 %vm194_vm2, %v2141_v0  ;;  %v8082_v2 = vadd.f32 %v7905_v25, %v7921_v30 }
0x18bb   :  { %v8038_v11 = vadd.f32 %v2078_v5, %v8030_v63 }
0x18bc   :  { %v7010_v12 = vpack.i.bf16 %v2077_v3, %v2071_v61  ;;  %v2142_v24 = vmul.f32 0.17677669, %v2077_v3  ;;  %v1777_v3 = vsel %vm112_vm0, %v8082_v2, 0.0 }
0x18bd   :  { %v7020_v13 = vpack.i.bf16 %v8038_v11, %v8035_v7  ;;  %v6788_v45 = vpack.c.bf16 %v8038_v11, %v8035_v7 }
0x18be   :  { %7011 = vrot.lane.b32.xlu1 %v7010_v12, %s7418_s16 }
0x1930   :  { %v7012_v16 = vpop.permute.xlu1 %7011 }
0x1931   :  { %v7014_v18 = vunpack.i.h.bf16 %v7012_v16  ;;  %v7013_v19 = vunpack.i.l.bf16 %v7012_v16 }
0x1933   :  { %v6782_v22 = vpack.c.bf16 %v7014_v18, %v7013_v19 }
0x1935   :  { %6784 = vmatprep.subr.msk.bf16.mxu1 %vm8047_vm1, %v6782_v22 }
0x1936   :  { %6787 = vmatpush3.bf16.xpose.msk.msra.mxu1 %vm8047_vm1, %v6782_v22 }
0x1937   :  { %6789 = vmatprep.subr.bf16.mxu1 %v6788_v45 }
0x193d   :  { %6415 = vmatmul.mubr.msk.f32.vlgmr.msra.gmra.mrb[22].mxu1 %vm194_vm2, %v2142_v24 }
0x193e   :  { %6791 = vmatpush3.bf16.msra.mxu1 %v6788_v45 }
0x1a10   :  { %v6416_v42 = vpop.f32.mrb[22].mxu1 }
0x1a11   :  { %v2241_v43 = vadd.f32 %v6416_v42, %v8060_v35  ;;  %v2235_v44 = vpop.f32.mrb[23].mxu1 }
0x1a12   :  { %v2236_v50 = vadd.f32 %v2235_v44, %v8063_v41 }
0x1a13   :  { %v2247_v52 = vsel %vm363_vm6, %v2241_v43, -inf }
0x1a14   :  { %2248 = vmax.xlane.f32.xlu0 %v2247_v52  ;;  %v2244_v1 = vsel %vm363_vm6, %v2236_v50, -inf }
0x1a15   :  { %2245 = vmax.xlane.f32.xlu1 %v2244_v1 }
0x1a26   :  { %2347 = vrot.lane.b32.xlu1 %v2141_v0, %s7416_s14 }
0x1a2a   :  { %2349 = vrot.lane.b32.xlu1 %v2142_v24, %s7416_s14 }
0x1a4e   :  { %1781 = vadd.xlane.f32.xlu1 %v1780_v54 }
0x1aa1   :  { %v2249_v21 = vpop.xlane.xlu0 %2248 }
0x1aa2   :  { %v2251_v55 = vsub.f32 %v2241_v43, %v2249_v21  ;;  %v2246_v56 = vpop.xlane.xlu1 %2245 }
0x1aa3   :  { %v2250_v59 = vsub.f32 %v2236_v50, %v2246_v56 }
0x1aa4   :  { %v2254_v60 = vmul.f32 1.442695, %v2251_v55 }
0x1aa5   :  { %v2252_v47 = vmul.f32 1.442695, %v2250_v59 }
0x1aa6   :  { %7144 = vpow2.f32 %v2254_v60  ;;  %v2348_v34 = vpop.permute.xlu1 %2347 }
0x1aa7   :  { %7146 = vpow2.f32 %v2252_v47 }
0x1aaa   :  { %v2350_v42 = vpop.permute.xlu1 %2349 }
0x1ab0   :  { %v7145_v61 = vpop.eup %7144 }
0x1ab1   :  { %v2259_v62 = vsel %vm363_vm6, %v7145_v61, 0.0  ;;  %v7147_v0 = vpop.eup %7146 }
0x1ab2   :  { %2260 = vadd.xlane.f32.xlu0 %v2259_v62  ;;  %v2256_v9 = vsel %vm363_vm6, %v7147_v0, 0.0 }
0x1ab6   :  { %2257 = vadd.xlane.f32.xlu0 %v2256_v9 }
0x1acc   :  { %7016 = vrot.lane.b32.xlu0 %v7010_v12, %s7423_s24 }
0x1adb   :  { %v1782_v43 = vpop.xlane.xlu1 %1781 }
0x1adc   :  { %v1811_v44 = vmul.f32 0.015625, %v1782_v43 }
0x1ade   :  { %v1823_v1 = vsub.f32 %v8073_v53, %v1811_v44 }
0x1ae0   :  { %v1835_v56 = vmul.f32 %v1823_v1, %v1823_v1 }
0x1ae2   :  { %v1853_v59 = vsel %vm112_vm0, %v1835_v56, 0.0 }
0x1aeb   :  { %1778 = vadd.xlane.f32.xlu0 %v1777_v3 }
0x1b3f   :  { %v2261_v5 = vpop.xlane.xlu0 %2260 }
0x1b40   :  { %7148 = vrcp.f32 %v2261_v5 }
0x1b43   :  { %v2258_v45 = vpop.xlane.xlu0 %2257 }
0x1b44   :  { %7150 = vrcp.f32 %v2258_v45 }
0x1b47   :  { %v7017_v16 = vpop.permute.xlu0 %7016 }
0x1b48   :  { %v7019_v18 = vunpack.i.h.bf16 %v7017_v16  ;;  %v7018_v19 = vunpack.i.l.bf16 %v7017_v16 }
0x1b4a   :  { %v6792_v22 = vpack.c.bf16 %v7019_v18, %v7018_v19  ;;  %v7149_v12 = vpop.eup %7148 }
0x1b4b   :  { %v2265_v30 = vmul.f32 %v7149_v12, %v7145_v61 }
0x1b4c   :  { %6794 = vmatprep.subr.msk.bf16.mxu1 %vm8047_vm1, %v6792_v22 }
0x1b4e   :  { %v7151_v24 = vpop.eup %7150 }
0x1b4f   :  { %v2264_v26 = vmul.f32 %v7151_v24, %v7147_v0 }
0x1b51   :  { %6421 = vmatprep.mubr.msk.f32.mxu1 %vm363_vm6, %v2264_v26 }
0x1b52   :  { %6422 = vmatmul.mubr.msk.f32.vlgmr.msra.gmra.mrb[24].mxu1 %vm363_vm6, %v2265_v30 }
0x1b53   :  { %6797 = vmatpush3.bf16.xpose.msk.msra.mxu1 %vm8047_vm1, %v6792_v22  ;;  %6428 = vmatprep.mubr.msk.f32.mxu1 %vm194_vm2, %v2348_v34 }
0x1b5a   :  { %6429 = vmatmul.mubr.msk.f32.vlgmr.msra.gmra.mrb[26].mxu1 %vm194_vm2, %v2350_v42 }
0x1b78   :  { %v1779_v50 = vpop.xlane.xlu0 %1778 }
0x1b79   :  { %v1810_v52 = vmul.f32 0.015625, %v1779_v50 }
0x1b7b   :  { %v1822_v54 = vsub.f32 %v8082_v2, %v1810_v52 }
0x1b7d   :  { %v1834_v21 = vmul.f32 %v1822_v54, %v1822_v54 }
0x1b7f   :  { %v1850_v55 = vsel %vm112_vm0, %v1834_v21, 0.0 }
0x1b80   :  { %1851 = vadd.xlane.f32.xlu0 %v1850_v55 }
0x1b84   :  { %1854 = vadd.xlane.f32.xlu0 %v1853_v59 }
0x1c0d   :  { %v1852_v60 = vpop.xlane.xlu0 %1851 }
0x1c0e   :  { %v1882_v47 = vmul.f32 0.015625, %v1852_v60 }
0x1c10   :  { %v1894_v61 = vadd.f32 1e-05, %v1882_v47 }
0x1c11   :  { %v1855_v62 = vpop.xlane.xlu0 %1854 }
0x1c12   :  { %7152 = vrsqrt.f32 %v1894_v61  ;;  %v1883_v0 = vmul.f32 0.015625, %v1855_v62 }
0x1c14   :  { %v1895_v9 = vadd.f32 1e-05, %v1883_v0 }
0x1c16   :  { %7154 = vrsqrt.f32 %v1895_v9 }
0x1c1c   :  { %v7153_v3 = vpop.eup %7152 }
0x1c1d   :  { %v1918_v5 = vmul.f32 %v7153_v3, %v1822_v54 }
0x1c1f   :  { %v1934_v45 = vmul.f32 %v8009_v49, %v1918_v5 }
0x1c20   :  { %v7155_v16 = vpop.eup %7154 }
0x1c21   :  { %v1950_v18 = vadd.f32 %v8012_v51, %v1934_v45  ;;  %v1919_v19 = vmul.f32 %v7155_v16, %v1823_v1 }
0x1c23   :  { %5874 = vmatmul.mubr.msk.f32.gmra.mrb[16].mxu0 %vm112_vm0, %v1950_v18  ;;  %v1935_v22 = vmul.f32 %v8009_v49, %v1919_v19 }
0x1c24   :  { %2086 = vmatprep.mubr.f32.mxu0 %v9276_v57 }
0x1c25   :  { %v8103_v12 = vpop.f32.mrb[24].mxu1  ;;  %v1951_v24 = vadd.f32 %v8012_v51, %v1935_v22 }
0x1c26   :  { %v8106_v26 = vpop.f32.mrb[25].mxu1 }
0x1c27   :  { %5875 = vmatmul.mubr.msk.f32.gmra.mrb[18].mxu0 %vm112_vm0, %v1951_v24  ;;  %v8144_v24 = vadd.f32 %v7905_v25, %v7931_v32 }
0x1c28   :  { %2092 = vmatprep.mubr.f32.mxu0 %v9276_v57 }
0x1c2d   :  { %v6430_v30 = vpop.f32.mrb[26].mxu1 }
0x1c2e   :  { %v2429_v34 = vpop.f32.mrb[27].mxu1  ;;  %v2435_v43 = vadd.f32 %v6430_v30, %v8060_v35  ;;  %v1783_v30 = vsel %vm112_vm0, %v8144_v24, 0.0 }
0x1c2f   :  { %v2430_v42 = vadd.f32 %v2429_v34, %v8063_v41 }
0x1c30   :  { %v2441_v50 = vsel %vm363_vm6, %v2435_v43, -inf }
0x1c31   :  { %v2438_v44 = vsel %vm363_vm6, %v2430_v42, -inf }
0x1c32   :  { %2439 = vmax.xlane.f32.xlu0 %v2438_v44 }
0x1c36   :  { %2442 = vmax.xlane.f32.xlu0 %v2441_v50 }
0x1cbf   :  { %v2440_v52 = vpop.xlane.xlu0 %2439 }
0x1cc0   :  { %v2444_v1 = vsub.f32 %v2430_v42, %v2440_v52 }
0x1cc2   :  { %v2446_v55 = vmul.f32 1.442695, %v2444_v1 }
0x1cc3   :  { %v2443_v54 = vpop.xlane.xlu0 %2442 }
0x1cc4   :  { %v2445_v21 = vsub.f32 %v2435_v43, %v2443_v54 }
0x1cc6   :  { %v2448_v56 = vmul.f32 1.442695, %v2445_v21 }
0x1cc8   :  { %7156 = vpow2.f32 %v2448_v56 }
0x1cc9   :  { %7158 = vpow2.f32 %v2446_v55 }
0x1cd2   :  { %v7157_v59 = vpop.eup %7156 }
0x1cd3   :  { %v2453_v60 = vsel %vm363_vm6, %v7157_v59, 0.0  ;;  %v7159_v47 = vpop.eup %7158 }
0x1cd4   :  { %2454 = vadd.xlane.f32.xlu0 %v2453_v60  ;;  %v2450_v61 = vsel %vm363_vm6, %v7159_v47, 0.0 }
0x1cd8   :  { %2451 = vadd.xlane.f32.xlu0 %v2450_v61 }
0x1cee   :  { %7021 = vrot.lane.b32.xlu0 %v7020_v13, %s7416_s14  ;;  %v8138_v13 = vadd.f32 %v7903_v23, %v7926_v31 }
0x1cf0   :  { %v1786_v22 = vsel %vm112_vm0, %v8138_v13, 0.0 }
0x1cf6   :  { %v2082_v62 = vpop.f32.mrb[16].mxu0 }
0x1cf7   :  { %v2084_v0 = vpop.f32.mrb[17].mxu0  ;;  %v2083_v3 = vadd.f32 %v2082_v62, %v8023_v48 }
0x1cf8   :  { %v8123_v16 = vadd.f32 %v2084_v0, %v8030_v63 }
0x1cf9   :  { %v8148_v55 = vmul.f32 0.17677669, %v2083_v3 }
0x1cfa   :  { %v2088_v9 = vpop.f32.mrb[18].mxu0 }
0x1cfb   :  { %v2089_v5 = vadd.f32 %v2088_v9, %v8023_v48  ;;  %v2090_v45 = vpop.f32.mrb[19].mxu0  ;;  %v1792_v9 = vsel %vm112_vm0, %v7933_v28, 0.0 }
0x1cfc   :  { %v8126_v18 = vadd.f32 %v2090_v45, %v8030_v63 }
0x1cfd   :  { %v8128_v19 = vpack.i.bf16 %v2089_v5, %v2083_v3  ;;  %v8158_v60 = vmul.f32 0.17677669, %v2089_v5 }
0x1cfe   :  { %v6808_v11 = vpack.c.bf16 %v8126_v18, %v8123_v16 }
0x1cff   :  { %7026 = vrot.lane.b32.xlu1 %v8128_v19, %s7418_s16 }
0x1d0d   :  { %1787 = vadd.xlane.f32.xlu0 %v1786_v22 }
0x1d23   :  { %1784 = vadd.xlane.f32.xlu1 %v1783_v30 }
0x1d61   :  { %v2455_v34 = vpop.xlane.xlu0 %2454 }
0x1d62   :  { %7160 = vrcp.f32 %v2455_v34 }
0x1d65   :  { %v2452_v42 = vpop.xlane.xlu0 %2451 }
0x1d66   :  { %7162 = vrcp.f32 %v2452_v42 }
0x1d69   :  { %v7022_v43 = vpop.permute.xlu0 %7021 }
0x1d6a   :  { %v7024_v44 = vunpack.i.h.bf16 %v7022_v43  ;;  %v7023_v23 = vunpack.i.l.bf16 %v7022_v43 }
0x1d6c   :  { %v6798_v31 = vpack.c.bf16 %v7024_v44, %v7023_v23  ;;  %v7161_v50 = vpop.eup %7160 }
0x1d6d   :  { %v2459_v21 = vmul.f32 %v7161_v50, %v7157_v59 }
0x1d6e   :  { %6799 = vmatprep.subr.bf16.mxu1 %v6798_v31 }
0x1d6f   :  { %6801 = vmatpush3.bf16.msra.mxu1 %v6798_v31 }
0x1d70   :  { %v7163_v52 = vpop.eup %7162 }
0x1d71   :  { %v7027_v1 = vpop.permute.xlu1 %7026  ;;  %v2458_v54 = vmul.f32 %v7163_v52, %v7159_v47 }
0x1d72   :  { %v7029_v25 = vunpack.i.h.bf16 %v7027_v1  ;;  %v7028_v32 = vunpack.i.l.bf16 %v7027_v1 }
0x1d73   :  { %6435 = vmatprep.mubr.msk.f32.mxu1 %vm363_vm6, %v2458_v54 }
0x1d74   :  { %v6802_v56 = vpack.c.bf16 %v7029_v25, %v7028_v32  ;;  %6436 = vmatmul.mubr.msk.f32.vlgmr.msra.gmra.mrb[28].mxu1 %vm363_vm6, %v2459_v21 }
0x1d75   :  { %6442 = vmatprep.mubr.msk.f32.mxu1 %vm194_vm2, %v8148_v55 }
0x1d76   :  { %6804 = vmatprep.subr.msk.bf16.mxu1 %vm8047_vm1, %v6802_v56 }
0x1d78   :  { %6807 = vmatpush3.bf16.xpose.msk.msra.mxu1 %vm8047_vm1, %v6802_v56 }
0x1d79   :  { %6809 = vmatprep.subr.bf16.mxu1 %v6808_v11 }
0x1d7f   :  { %6443 = vmatmul.mubr.msk.f32.vlgmr.msra.gmra.mrb[30].mxu1 %vm194_vm2, %v8158_v60 }
0x1d80   :  { %6811 = vmatpush3.bf16.msra.mxu1 %v6808_v11  ;;  %v1789_v11 = vsel %vm112_vm0, %v7935_v33, 0.0 }
0x1d9a   :  { %v1788_v59 = vpop.xlane.xlu0 %1787 }
0x1d9b   :  { %v1813_v47 = vmul.f32 0.015625, %v1788_v59 }
0x1d9d   :  { %v1825_v61 = vsub.f32 %v8138_v13, %v1813_v47 }
0x1d9f   :  { %v1837_v62 = vmul.f32 %v1825_v61, %v1825_v61 }
0x1da1   :  { %v1859_v0 = vsel %vm112_vm0, %v1837_v62, 0.0 }
0x1da2   :  { %1860 = vadd.xlane.f32.xlu1 %v1859_v0 }
0x1da6   :  { %1793 = vadd.xlane.f32.xlu1 %v1792_v9 }
0x1db0   :  { %v1785_v3 = vpop.xlane.xlu1 %1784 }
0x1db1   :  { %v1812_v45 = vmul.f32 0.015625, %v1785_v3 }
0x1db3   :  { %v1824_v5 = vsub.f32 %v8144_v24, %v1812_v45 }
0x1db5   :  { %v1836_v22 = vmul.f32 %v1824_v5, %v1824_v5 }
0x1db7   :  { %v1856_v30 = vsel %vm112_vm0, %v1836_v22, 0.0 }
0x1db8   :  { %1857 = vadd.xlane.f32.xlu0 %v1856_v30 }
0x1dbc   :  { %1790 = vadd.xlane.f32.xlu0 %v1789_v11 }
0x1e2f   :  { %v1861_v34 = vpop.xlane.xlu1 %1860 }
0x1e30   :  { %v1885_v42 = vmul.f32 0.015625, %v1861_v34  ;;  %v1798_v34 = vsel %vm112_vm0, %v7942_v36, 0.0 }
0x1e32   :  { %v1897_v43 = vadd.f32 1e-05, %v1885_v42 }
0x1e33   :  { %v1794_v54 = vpop.xlane.xlu1 %1793 }
0x1e34   :  { %7164 = vrsqrt.f32 %v1897_v43  ;;  %v1815_v62 = vmul.f32 0.015625, %v1794_v54 }
0x1e36   :  { %v8180_v11 = vsub.f32 %v7933_v28, %v1815_v62 }
0x1e3e   :  { %v7165_v1 = vpop.eup %7164 }
0x1e3f   :  { %v1921_v3 = vmul.f32 %v7165_v1, %v1825_v61  ;;  %v1795_v61 = vsel %vm112_vm0, %v7945_v37, 0.0  ;;  %v1801_v1 = vsel %vm112_vm0, %v7951_v40, 0.0 }
0x1e41   :  { %v1937_v43 = vmul.f32 %v8009_v49, %v1921_v3 }
0x1e45   :  { %v1858_v44 = vpop.xlane.xlu0 %1857 }
0x1e46   :  { %v1884_v23 = vmul.f32 0.015625, %v1858_v44  ;;  %v1804_v44 = vsel %vm112_vm0, %v7948_v38, 0.0 }
0x1e47   :  { %v8170_v31 = vpop.f32.mrb[28].mxu1 }
0x1e48   :  { %v1896_v50 = vadd.f32 1e-05, %v1884_v23  ;;  %v8172_v52 = vpop.f32.mrb[29].mxu1  ;;  %v1953_v23 = vadd.f32 %v8012_v51, %v1937_v43 }
0x1e49   :  { %v1791_v32 = vpop.xlane.xlu0 %1790 }
0x1e4a   :  { %7166 = vrsqrt.f32 %v1896_v50  ;;  %v1814_v45 = vmul.f32 0.015625, %v1791_v32  ;;  %v1839_v50 = vmul.f32 %v8180_v11, %v8180_v11 }
0x1e52   :  { %v6444_v25 = vpop.f32.mrb[30].mxu1 }
0x1e53   :  { %v2647_v21 = vadd.f32 %v6444_v25, %v8060_v35  ;;  %v2641_v56 = vpop.f32.mrb[31].mxu1  ;;  %v1865_v25 = vsel %vm112_vm0, %v1839_v50, 0.0 }
0x1e54   :  { %v7167_v59 = vpop.eup %7166  ;;  %v2642_v47 = vadd.f32 %v2641_v56, %v8063_v41 }
0x1e55   :  { %v2653_v0 = vsel %vm363_vm6, %v2647_v21, -inf  ;;  %v1920_v9 = vmul.f32 %v7167_v59, %v1824_v5  ;;  %v8187_v5 = vsub.f32 %v7935_v33, %v1814_v45 }
0x1e56   :  { %2654 = vmax.xlane.f32.xlu1 %v2653_v0  ;;  %v2650_v22 = vsel %vm363_vm6, %v2642_v47, -inf }
0x1e57   :  { %2651 = vmax.xlane.f32.xlu0 %v2650_v22  ;;  %v1936_v30 = vmul.f32 %v8009_v49, %v1920_v9  ;;  %v1838_v54 = vmul.f32 %v8187_v5, %v8187_v5 }
0x1e59   :  { %v1952_v42 = vadd.f32 %v8012_v51, %v1936_v30  ;;  %v1862_v32 = vsel %vm112_vm0, %v1838_v54, 0.0 }
0x1e5a   :  { %1799 = vadd.xlane.f32.xlu1 %v1798_v34 }
0x1e5b   :  { %1796 = vadd.xlane.f32.xlu0 %v1795_v61  ;;  %5876 = vmatmul.mubr.msk.f32.gmra.mrb[20].mxu0 %vm112_vm0, %v1952_v42 }
0x1e5c   :  { %2098 = vmatprep.mubr.f32.mxu0 %v9276_v57 }
0x1e5e   :  { %1805 = vadd.xlane.f32.xlu1 %v1804_v44 }
0x1e5f   :  { %1802 = vadd.xlane.f32.xlu0 %v1801_v1  ;;  %5877 = vmatmul.mubr.msk.f32.gmra.mrb[22].mxu0 %vm112_vm0, %v1953_v23 }
0x1e60   :  { %2104 = vmatprep.mubr.f32.mxu0 %v9276_v57 }
0x1e62   :  { %1866 = vadd.xlane.f32.xlu1 %v1865_v25 }
0x1e63   :  { %1863 = vadd.xlane.f32.xlu0 %v1862_v32 }
0x1ee3   :  { %v2655_v56 = vpop.xlane.xlu1 %2654 }
0x1ee4   :  { %v2657_v59 = vsub.f32 %v2647_v21, %v2655_v56  ;;  %v2652_v62 = vpop.xlane.xlu0 %2651 }
0x1ee5   :  { %v2656_v0 = vsub.f32 %v2642_v47, %v2652_v62 }
0x1ee6   :  { %v2660_v9 = vmul.f32 1.442695, %v2657_v59 }
0x1ee7   :  { %v2658_v3 = vmul.f32 1.442695, %v2656_v0  ;;  %v1800_v45 = vpop.xlane.xlu1 %1799 }
0x1ee8   :  { %7168 = vpow2.f32 %v2660_v9  ;;  %v1817_v22 = vmul.f32 0.015625, %v1800_v45  ;;  %v1797_v30 = vpop.xlane.xlu0 %1796 }
0x1ee9   :  { %v1816_v34 = vmul.f32 0.015625, %v1797_v30  ;;  %7170 = vpow2.f32 %v2658_v3 }
0x1eea   :  { %v8207_v42 = vsub.f32 %v7942_v36, %v1817_v22 }
0x1eeb   :  { %v8210_v43 = vsub.f32 %v7945_v37, %v1816_v34  ;;  %v1806_v61 = vpop.xlane.xlu1 %1805 }
0x1eec   :  { %v1819_v44 = vmul.f32 0.015625, %v1806_v61  ;;  %v1803_v23 = vpop.xlane.xlu0 %1802  ;;  %v1841_v21 = vmul.f32 %v8207_v42, %v8207_v42 }
0x1eed   :  { %v1818_v47 = vmul.f32 0.015625, %v1803_v23  ;;  %v1840_v50 = vmul.f32 %v8210_v43, %v8210_v43 }
0x1eee   :  { %v1871_v1 = vsel %vm112_vm0, %v1841_v21, 0.0  ;;  %v8218_v54 = vsub.f32 %v7948_v38, %v1819_v44 }
0x1eef   :  { %v8221_v25 = vsub.f32 %v7951_v40, %v1818_v47  ;;  %1872 = vadd.xlane.f32.xlu1 %v1871_v1  ;;  %v1867_v32 = vpop.xlane.xlu1 %1866  ;;  %v1868_v56 = vsel %vm112_vm0, %v1840_v50, 0.0 }
0x1ef0   :  { %v1887_v59 = vmul.f32 0.015625, %v1867_v32  ;;  %1869 = vadd.xlane.f32.xlu0 %v1868_v56  ;;  %v1864_v62 = vpop.xlane.xlu0 %1863  ;;  %v1843_v61 = vmul.f32 %v8218_v54, %v8218_v54 }
0x1ef1   :  { %v1886_v0 = vmul.f32 0.015625, %v1864_v62  ;;  %v1842_v9 = vmul.f32 %v8221_v25, %v8221_v25 }
0x1ef2   :  { %v8226_v3 = vpop.eup %7168  ;;  %v1899_v45 = vadd.f32 1e-05, %v1887_v59  ;;  %v1877_v21 = vsel %vm112_vm0, %v1843_v61, 0.0 }
0x1ef3   :  { %v1898_v22 = vadd.f32 1e-05, %v1886_v0  ;;  %v2665_v30 = vsel %vm363_vm6, %v8226_v3, 0.0  ;;  %v1874_v34 = vsel %vm112_vm0, %v1842_v9, 0.0  ;;  %v8233_v44 = vpop.eup %7170 }
0x1ef4   :  { %7172 = vrsqrt.f32 %v1899_v45  ;;  %2666 = vadd.xlane.f32.xlu0 %v2665_v30  ;;  %1875 = vadd.xlane.f32.xlu1 %v1874_v34  ;;  %v2662_v23 = vsel %vm363_vm6, %v8233_v44, 0.0 }
0x1ef5   :  { %7174 = vrsqrt.f32 %v1898_v22 }
0x1ef8   :  { %2663 = vadd.xlane.f32.xlu0 %v2662_v23  ;;  %1878 = vadd.xlane.f32.xlu1 %v1877_v21 }
0x1efe   :  { %v7173_v47 = vpop.eup %7172 }
0x1eff   :  { %v7175_v50 = vpop.eup %7174  ;;  %v1923_v32 = vmul.f32 %v7173_v47, %v8180_v11 }
0x1f00   :  { %v1922_v1 = vmul.f32 %v7175_v50, %v8187_v5 }
0x1f01   :  { %v1939_v62 = vmul.f32 %v8009_v49, %v1923_v32 }
0x1f02   :  { %v1938_v56 = vmul.f32 %v8009_v49, %v1922_v1 }
0x1f03   :  { %v1955_v0 = vadd.f32 %v8012_v51, %v1939_v62 }
0x1f04   :  { %v1954_v59 = vadd.f32 %v8012_v51, %v1938_v56 }
0x1f06   :  { %5878 = vmatmul.mubr.msk.f32.gmra.mrb[24].mxu0 %vm112_vm0, %v1954_v59 }
0x1f07   :  { %2110 = vmatprep.mubr.f32.mxu0 %v9276_v57 }
0x1f09   :  { %2753 = vrot.lane.b32.xlu1 %v8148_v55, %s7416_s14 }
0x1f0a   :  { %5879 = vmatmul.mubr.msk.f32.gmra.mrb[26].mxu0 %vm112_vm0, %v1955_v0 }
0x1f0b   :  { %2116 = vmatprep.mubr.f32.mxu0 %v9276_v57 }
0x1f0e   :  { %7031 = vrot.lane.b32.xlu0 %v8128_v19, %s7423_s24 }
0x1f12   :  { %2755 = vrot.lane.b32.xlu0 %v8158_v60, %s7416_s14 }
0x1f2e   :  { %v2094_v11 = vpop.f32.mrb[20].mxu0 }
0x1f2f   :  { %v2096_v5 = vpop.f32.mrb[21].mxu0  ;;  %v8255_v45 = vadd.f32 %v2094_v11, %v8023_v48 }
0x1f30   :  { %v8261_v30 = vadd.f32 %v2096_v5, %v8030_v63 }
0x1f32   :  { %v2100_v9 = vpop.f32.mrb[22].mxu0 }
0x1f33   :  { %v8258_v22 = vadd.f32 %v2100_v9, %v8023_v48  ;;  %v2102_v55 = vpop.f32.mrb[23].mxu0 }
0x1f34   :  { %v8264_v34 = vadd.f32 %v2102_v55, %v8030_v63 }
0x1f35   :  { %v8268_v19 = vpack.i.bf16 %v8258_v22, %v8255_v45 }
0x1f36   :  { %v8274_v61 = vpack.c.bf16 %v8264_v34, %v8261_v30 }
0x1f37   :  { %7036 = vrot.lane.b32.xlu1 %v8268_v19, %s7418_s16 }
0x1f7c   :  { %v1873_v23 = vpop.xlane.xlu1 %1872 }
0x1f7d   :  { %v1889_v21 = vmul.f32 0.015625, %v1873_v23  ;;  %v1870_v47 = vpop.xlane.xlu0 %1869 }
0x1f7e   :  { %v1888_v50 = vmul.f32 0.015625, %v1870_v47 }
0x1f7f   :  { %v1901_v1 = vadd.f32 1e-05, %v1889_v21 }
0x1f80   :  { %v1900_v32 = vadd.f32 1e-05, %v1888_v50 }
0x1f81   :  { %7176 = vrsqrt.f32 %v1901_v1  ;;  %v1876_v56 = vpop.xlane.xlu1 %1875  ;;  %v2667_v59 = vpop.xlane.xlu0 %2666 }
0x1f82   :  { %7178 = vrsqrt.f32 %v1900_v32  ;;  %v1890_v62 = vmul.f32 0.015625, %v1876_v56 }
0x1f83   :  { %7180 = vrcp.f32 %v2667_v59 }
0x1f84   :  { %v1902_v0 = vadd.f32 1e-05, %v1890_v62 }
0x1f85   :  { %v1879_v11 = vpop.xlane.xlu1 %1878  ;;  %v2664_v5 = vpop.xlane.xlu0 %2663 }
0x1f86   :  { %7182 = vrsqrt.f32 %v1902_v0  ;;  %v1891_v9 = vmul.f32 0.015625, %v1879_v11 }
0x1f87   :  { %7184 = vrcp.f32 %v2664_v5 }
0x1f88   :  { %v1903_v55 = vadd.f32 1e-05, %v1891_v9 }
0x1f89   :  { %v7032_v15 = vpop.permute.xlu0 %7031  ;;  %v2754_v9 = vpop.permute.xlu1 %2753 }
0x1f8a   :  { %7186 = vrsqrt.f32 %v1903_v55  ;;  %v7034_v23 = vunpack.i.h.bf16 %v7032_v15  ;;  %v7033_v4 = vunpack.i.l.bf16 %v7032_v15 }
0x1f8b   :  { %v7177_v47 = vpop.eup %7176 }
0x1f8c   :  { %v7179_v21 = vpop.eup %7178  ;;  %v6812_v50 = vpack.c.bf16 %v7034_v23, %v7033_v4  ;;  %v1925_v32 = vmul.f32 %v7177_v47, %v8207_v42 }
0x1f8d   :  { %v1924_v1 = vmul.f32 %v7179_v21, %v8210_v43  ;;  %v7181_v56 = vpop.eup %7180  ;;  %v2756_v47 = vpop.permute.xlu0 %2755  ;;  %v8307_v21 = vmul.f32 0.17677669, %v8255_v45 }
0x1f8e   :  { %6814 = vmatprep.subr.msk.bf16.mxu1 %vm8047_vm1, %v6812_v50  ;;  %v1941_v5 = vmul.f32 %v8009_v49, %v1925_v32  ;;  %v2671_v42 = vmul.f32 %v7181_v56, %v8226_v3 }
0x1f8f   :  { %v1940_v59 = vmul.f32 %v8009_v49, %v1924_v1 }
0x1f90   :  { %v7183_v62 = vpop.eup %7182  ;;  %v1957_v55 = vadd.f32 %v8012_v51, %v1941_v5 }
0x1f91   :  { %v7185_v0 = vpop.eup %7184  ;;  %v1956_v11 = vadd.f32 %v8012_v51, %v1940_v59  ;;  %v1926_v15 = vmul.f32 %v7183_v62, %v8221_v25 }
0x1f92   :  { %v2670_v4 = vmul.f32 %v7185_v0, %v8233_v44 }
0x1f93   :  { %5880 = vmatmul.mubr.msk.f32.gmra.mrb[28].mxu0 %vm112_vm0, %v1956_v11  ;;  %v1942_v23 = vmul.f32 %v8009_v49, %v1926_v15 }
0x1f94   :  { %v7187_v43 = vpop.eup %7186  ;;  %6449 = vmatprep.mubr.msk.f32.mxu1 %vm363_vm6, %v2670_v4  ;;  %2122 = vmatprep.mubr.f32.mxu0 %v9276_v57 }
0x1f95   :  { %6450 = vmatmul.mubr.msk.f32.vlgmr.msra.gmra.mrb[32].mxu1 %vm363_vm6, %v2671_v42  ;;  %v1927_v25 = vmul.f32 %v7187_v43, %v8218_v54  ;;  %v1958_v3 = vadd.f32 %v8012_v51, %v1942_v23 }
0x1f96   :  { %6817 = vmatpush3.bf16.xpose.msk.msra.mxu1 %vm8047_vm1, %v6812_v50  ;;  %6456 = vmatprep.mubr.msk.f32.mxu1 %vm194_vm2, %v2754_v9 }
0x1f97   :  { %5881 = vmatmul.mubr.msk.f32.gmra.mrb[30].mxu0 %vm112_vm0, %v1957_v55  ;;  %v1943_v44 = vmul.f32 %v8009_v49, %v1927_v25 }
0x1f98   :  { %2128 = vmatprep.mubr.f32.mxu0 %v9276_v57 }
0x1f99   :  { %v1959_v54 = vadd.f32 %v8012_v51, %v1943_v44  ;;  %v8317_v51 = vmul.f32 0.17677669, %v8258_v22 }
0x1f9b   :  { %5882 = vmatmul.mubr.msk.f32.gmra.mrb[32].mxu0 %vm112_vm0, %v1958_v3 }
0x1f9c   :  { %2134 = vmatprep.mubr.f32.mxu0 %v9276_v57 }
0x1f9d   :  { %6457 = vmatmul.mubr.msk.f32.vlgmr.msra.gmra.mrb[34].mxu1 %vm194_vm2, %v2756_v47 }
0x1f9f   :  { %5883 = vmatmul.mubr.msk.f32.gmra.mrb[34].mxu0 %vm112_vm0, %v1959_v54 }
0x1fa0   :  { %6470 = vmatprep.mubr.msk.f32.mxu0 %vm194_vm2, %v8307_v21 }
0x1fa9   :  { %v7037_v50 = vpop.permute.xlu1 %7036 }
0x1faa   :  { %v7039_v1 = vunpack.i.h.bf16 %v7037_v50  ;;  %v7038_v49 = vunpack.i.l.bf16 %v7037_v50 }
0x1fac   :  { %v6822_v32 = vpack.c.bf16 %v7039_v1, %v7038_v49 }
0x1fae   :  { %6824 = vmatprep.subr.msk.bf16.mxu0 %vm8047_vm1, %v6822_v32 }
0x1faf   :  { %6827 = vmatpush3.bf16.xpose.msk.msra.mxu0 %vm8047_vm1, %v6822_v32 }
0x1fb6   :  { %6471 = vmatmul.mubr.msk.f32.vlgmr.msra.gmra.mrb[36].mxu0 %vm194_vm2, %v8317_v51 }
0x1fd9   :  { %v2106_v45 = vpop.f32.mrb[24].mxu0 }
0x1fda   :  { %v2108_v56 = vpop.f32.mrb[25].mxu0  ;;  %v8322_v62 = vadd.f32 %v2106_v45, %v8023_v48 }
0x1fdb   :  { %v8328_v5 = vadd.f32 %v2108_v56, %v8030_v63 }
0x1fdd   :  { %v2112_v59 = vpop.f32.mrb[26].mxu0 }
0x1fde   :  { %v8325_v0 = vadd.f32 %v2112_v59, %v8023_v48  ;;  %v2114_v11 = vpop.f32.mrb[27].mxu0 }
0x1fdf   :  { %v8331_v15 = vadd.f32 %v2114_v11, %v8030_v63 }
0x1fe0   :  { %v8335_v22 = vpack.i.bf16 %v8325_v0, %v8322_v62 }
0x1fe1   :  { %v8341_v42 = vpack.c.bf16 %v8331_v15, %v8328_v5 }
0x2066   :  { %v2118_v43 = vpop.f32.mrb[28].mxu0 }
0x2067   :  { %v2120_v9 = vpop.f32.mrb[29].mxu0  ;;  %v8348_v3 = vadd.f32 %v2118_v43, %v8023_v48 }
0x2068   :  { %v8343_v55 = vpop.f32.mrb[32].mxu1  ;;  %v8354_v54 = vadd.f32 %v2120_v9, %v8030_v63 }
0x2069   :  { %v8345_v23 = vpop.f32.mrb[33].mxu1 }
0x206a   :  { %v2124_v25 = vpop.f32.mrb[30].mxu0 }
0x206b   :  { %v8351_v44 = vadd.f32 %v2124_v25, %v8023_v48  ;;  %v2126_v47 = vpop.f32.mrb[31].mxu0 }
0x206c   :  { %v8357_v50 = vadd.f32 %v2126_v47, %v8030_v63 }
0x206d   :  { %v8361_v1 = vpack.i.bf16 %v8351_v44, %v8348_v3 }
0x206e   :  { %v8367_v32 = vpack.c.bf16 %v8357_v50, %v8354_v54  ;;  %v2130_v45 = vpop.f32.mrb[32].mxu0 }
0x206f   :  { %v2132_v56 = vpop.f32.mrb[33].mxu0  ;;  %v8372_v47 = vadd.f32 %v2130_v45, %v8023_v48 }
0x2070   :  { %v6458_v59 = vpop.f32.mrb[34].mxu1  ;;  %v8379_v60 = vadd.f32 %v2132_v56, %v8030_v63 }
0x2071   :  { %v2841_v11 = vadd.f32 %v6458_v59, %v8060_v35  ;;  %v2835_v43 = vpop.f32.mrb[35].mxu1 }
0x2072   :  { %v2836_v9 = vadd.f32 %v2835_v43, %v8063_v41  ;;  %v2136_v25 = vpop.f32.mrb[34].mxu0 }
0x2073   :  { %v8375_v57 = vadd.f32 %v2136_v25, %v8023_v48  ;;  %v2847_v49 = vsel %vm363_vm6, %v2841_v11, -inf  ;;  %v2138_v4 = vpop.f32.mrb[35].mxu0 }
0x2074   :  { %2848 = vmax.xlane.f32.xlu0 %v2847_v49  ;;  %v8382_v7 = vadd.f32 %v2138_v4, %v8030_v63  ;;  %v2844_v59 = vsel %vm363_vm6, %v2836_v9, -inf }
0x2075   :  { %v8387_v43 = vpack.i.bf16 %v8375_v57, %v8372_v47  ;;  %2845 = vmax.xlane.f32.xlu1 %v2844_v59 }
0x2076   :  { %v8393_v45 = vpack.c.bf16 %v8382_v7, %v8379_v60 }
0x2089   :  { %v6472_v56 = vpop.f32.mrb[36].mxu0 }
0x208a   :  { %v3053_v49 = vadd.f32 %v6472_v56, %v8060_v35  ;;  %v3047_v25 = vpop.f32.mrb[37].mxu0 }
0x208b   :  { %v3048_v63 = vadd.f32 %v3047_v25, %v8063_v41 }
0x208c   :  { %v3059_v4 = vsel %vm363_vm6, %v3053_v49, -inf }
0x208d   :  { %3060 = vmax.xlane.f32.xlu1 %v3059_v4  ;;  %v3056_v17 = vsel %vm363_vm6, %v3048_v63, -inf }
0x208e   :  { %3057 = vmax.xlane.f32.xlu0 %v3056_v17 }
0x2101   :  { %v2849_v59 = vpop.xlane.xlu0 %2848 }
0x2102   :  { %v2846_v10 = vpop.xlane.xlu1 %2845  ;;  %v2851_v8 = vsub.f32 %v2841_v11, %v2849_v59 }
0x2103   :  { %v2850_v48 = vsub.f32 %v2836_v9, %v2846_v10 }
0x2104   :  { %v2854_v40 = vmul.f32 1.442695, %v2851_v8 }
0x2105   :  { %v2852_v56 = vmul.f32 1.442695, %v2850_v48 }
0x211a   :  { %v3061_v6 = vpop.xlane.xlu1 %3060 }
0x211b   :  { %v3063_v14 = vsub.f32 %v3053_v49, %v3061_v6  ;;  %v3058_v39 = vpop.xlane.xlu0 %3057 }
0x211c   :  { %v3062_v58 = vsub.f32 %v3048_v63, %v3058_v39 }
0x211d   :  { %v3066_v38 = vmul.f32 1.442695, %v3063_v14 }
0x211e   :  { %v3064_v36 = vmul.f32 1.442695, %v3062_v58  ;;  %v9305_v58 = vpack.i.bf16 %v8126_v18, %v8123_v16 }
0x211f   :  { %7188 = vpow2.f32 %v3066_v38 }
0x2120   :  { %7190 = vpow2.f32 %v3064_v36 }
0x2121   :  { %7192 = vpow2.f32 %v2854_v40 }
0x2122   :  { %7194 = vpow2.f32 %v2852_v56 }
0x2129   :  { %v7189_v25 = vpop.eup %7188 }
0x212a   :  { %v7191_v4 = vpop.eup %7190  ;;  %v3071_v17 = vsel %vm363_vm6, %v7189_v25, 0.0 }
0x212b   :  { %v7193_v28 = vpop.eup %7192  ;;  %3072 = vadd.xlane.f32.xlu1 %v3071_v17  ;;  %v3068_v10 = vsel %vm363_vm6, %v7191_v4, 0.0 }
0x212c   :  { %v7195_v11 = vpop.eup %7194  ;;  %3069 = vadd.xlane.f32.xlu0 %v3068_v10  ;;  %v2859_v6 = vsel %vm363_vm6, %v7193_v28, 0.0 }
0x212d   :  { %v2856_v8 = vsel %vm363_vm6, %v7195_v11, 0.0 }
0x212f   :  { %2860 = vadd.xlane.f32.xlu1 %v2859_v6 }
0x2130   :  { %2857 = vadd.xlane.f32.xlu0 %v2856_v8 }
0x2140   :  { %7046 = vrot.lane.b32.xlu1 %v8268_v19, %s7423_s24 }
0x2144   :  { %3159 = vrot.lane.b32.xlu1 %v8307_v21, %s7416_s14 }
0x2146   :  { %7041 = vrot.lane.b32.xlu0 %v9305_v58, %s7416_s14 }
0x214a   :  { %3161 = vrot.lane.b32.xlu0 %v8317_v51, %s7416_s14 }
0x21b8   :  { %v3073_v39 = vpop.xlane.xlu1 %3072 }
0x21b9   :  { %v3070_v14 = vpop.xlane.xlu0 %3069 }
0x21ba   :  { %7196 = vrcp.f32 %v3070_v14 }
0x21bc   :  { %v2861_v36 = vpop.xlane.xlu1 %2860 }
0x21bd   :  { %7198 = vrcp.f32 %v2861_v36  ;;  %v2858_v38 = vpop.xlane.xlu0 %2857 }
0x21be   :  { %7200 = vrcp.f32 %v2858_v38 }
0x21bf   :  { %7202 = vrcp.f32 %v3073_v39 }
0x21c0   :  { %v7047_v48 = vpop.permute.xlu1 %7046 }
0x21c1   :  { %v7042_v40 = vpop.permute.xlu0 %7041  ;;  %v7049_v63 = vunpack.i.h.bf16 %v7047_v48  ;;  %v7048_v51 = vunpack.i.l.bf16 %v7047_v48 }
0x21c2   :  { %v7044_v19 = vunpack.i.h.bf16 %v7042_v40  ;;  %v7043_v9 = vunpack.i.l.bf16 %v7042_v40 }
0x21c3   :  { %v6832_v6 = vpack.c.bf16 %v7049_v63, %v7048_v51 }
0x21c4   :  { %v6818_v21 = vpack.c.bf16 %v7044_v19, %v7043_v9  ;;  %v7197_v49 = vpop.eup %7196  ;;  %v3160_v58 = vpop.permute.xlu1 %3159 }
0x21c5   :  { %v3076_v10 = vmul.f32 %v7197_v49, %v7191_v4 }
0x21c6   :  { %6819 = vmatprep.subr.bf16.mxu1 %v6818_v21 }
0x21c7   :  { %v7199_v16 = vpop.eup %7198  ;;  %6821 = vmatpush3.bf16.msra.mxu1 %v6818_v21 }
0x21c8   :  { %v7201_v18 = vpop.eup %7200  ;;  %6829 = vmatprep.subr.bf16.mxu1 %v8274_v61  ;;  %v2865_v56 = vmul.f32 %v7199_v16, %v7193_v28  ;;  %v3162_v28 = vpop.permute.xlu0 %3161 }
0x21c9   :  { %v2864_v59 = vmul.f32 %v7201_v18, %v7195_v11  ;;  %v7203_v17 = vpop.eup %7202 }
0x21ca   :  { %v3077_v8 = vmul.f32 %v7203_v17, %v7189_v25 }
0x21cb   :  { %6463 = vmatprep.mubr.msk.f32.mxu1 %vm363_vm6, %v2864_v59 }
0x21cc   :  { %6464 = vmatmul.mubr.msk.f32.vlgmr.msra.gmra.mrb[36].mxu1 %vm363_vm6, %v2865_v56  ;;  %v9306_v56 = vpack.i.bf16 %v8264_v34, %v8261_v30 }
0x21cd   :  { %6831 = vmatpush3.bf16.msra.mxu1 %v8274_v61  ;;  %6477 = vmatprep.mubr.msk.f32.mxu1 %vm363_vm6, %v3076_v10 }
0x21ce   :  { %6834 = vmatprep.subr.msk.bf16.mxu1 %vm8047_vm1, %v6832_v6 }
0x21d0   :  { %6478 = vmatmul.mubr.msk.f32.vlgmr.msra.gmra.mrb[38].mxu1 %vm363_vm6, %v3077_v8 }
0x21d1   :  { %6484 = vmatprep.mubr.msk.f32.mxu1 %vm194_vm2, %v3160_v58 }
0x21d6   :  { %6837 = vmatpush3.bf16.xpose.msk.msra.mxu1 %vm8047_vm1, %v6832_v6 }
0x21d7   :  { %6849 = vmatprep.subr.bf16.mxu1 %v8341_v42 }
0x21dd   :  { %6485 = vmatmul.mubr.msk.f32.vlgmr.msra.gmra.mrb[40].mxu1 %vm194_vm2, %v3162_v28 }
0x21de   :  { %6851 = vmatpush3.bf16.msra.mxu1 %v8341_v42 }
0x229f   :  { %v8427_v61 = vpop.f32.mrb[36].mxu1 }
0x22a0   :  { %v8429_v25 = vpop.f32.mrb[37].mxu1 }
0x22a3   :  { %v8431_v4 = vpop.f32.mrb[38].mxu1 }
0x22a4   :  { %v8433_v11 = vpop.f32.mrb[39].mxu1 }
0x22b0   :  { %v6486_v39 = vpop.f32.mrb[40].mxu1 }
0x22b1   :  { %v3247_v14 = vadd.f32 %v6486_v39, %v8060_v35  ;;  %v3241_v36 = vpop.f32.mrb[41].mxu1 }
0x22b2   :  { %v3242_v38 = vadd.f32 %v3241_v36, %v8063_v41 }
0x22b3   :  { %v3253_v40 = vsel %vm363_vm6, %v3247_v14, -inf }
0x22b4   :  { %3254 = vmax.xlane.f32.xlu0 %v3253_v40  ;;  %v3250_v19 = vsel %vm363_vm6, %v3242_v38, -inf }
0x22b5   :  { %3251 = vmax.xlane.f32.xlu1 %v3250_v19 }
0x2341   :  { %v3255_v42 = vpop.xlane.xlu0 %3254 }
0x2342   :  { %v3257_v9 = vsub.f32 %v3247_v14, %v3255_v42  ;;  %v3252_v21 = vpop.xlane.xlu1 %3251  ;;  %v2147_v42 = vmul.f32 0.17677669, %v8322_v62 }
0x2343   :  { %v3256_v48 = vsub.f32 %v3242_v38, %v3252_v21 }
0x2344   :  { %v3260_v49 = vmul.f32 1.442695, %v3257_v9  ;;  %v2148_v9 = vmul.f32 0.17677669, %v8325_v0 }
0x2345   :  { %v3258_v16 = vmul.f32 1.442695, %v3256_v48 }
0x2346   :  { %7204 = vpow2.f32 %v3260_v49 }
0x2347   :  { %7206 = vpow2.f32 %v3258_v16 }
0x2350   :  { %v7205_v18 = vpop.eup %7204 }
0x2351   :  { %v7207_v63 = vpop.eup %7206  ;;  %v3265_v51 = vsel %vm363_vm6, %v7205_v18, 0.0 }
0x2352   :  { %3266 = vadd.xlane.f32.xlu1 %v3265_v51  ;;  %v3262_v59 = vsel %vm363_vm6, %v7207_v63, 0.0 }
0x2353   :  { %3263 = vadd.xlane.f32.xlu0 %v3262_v59 }
0x2363   :  { %7056 = vrot.lane.b32.xlu1 %v8335_v22, %s7418_s16 }
0x2369   :  { %7051 = vrot.lane.b32.xlu0 %v9306_v56, %s7416_s14 }
0x23df   :  { %v3267_v17 = vpop.xlane.xlu1 %3266 }
0x23e0   :  { %7208 = vrcp.f32 %v3267_v17  ;;  %v3264_v10 = vpop.xlane.xlu0 %3263 }
0x23e1   :  { %7210 = vrcp.f32 %v3264_v10 }
0x23e3   :  { %v7057_v6 = vpop.permute.xlu1 %7056 }
0x23e4   :  { %v7052_v8 = vpop.permute.xlu0 %7051  ;;  %v7059_v58 = vunpack.i.h.bf16 %v7057_v6  ;;  %v7058_v28 = vunpack.i.l.bf16 %v7057_v6 }
0x23e5   :  { %v7054_v39 = vunpack.i.h.bf16 %v7052_v8  ;;  %v7053_v14 = vunpack.i.l.bf16 %v7052_v8 }
0x23e6   :  { %v6842_v38 = vpack.c.bf16 %v7059_v58, %v7058_v28 }
0x23e7   :  { %v6838_v36 = vpack.c.bf16 %v7054_v39, %v7053_v14 }
0x23e9   :  { %6839 = vmatprep.subr.bf16.mxu0 %v6838_v36 }
0x23ea   :  { %v7209_v40 = vpop.eup %7208  ;;  %6841 = vmatpush3.bf16.msra.mxu0 %v6838_v36 }
0x23eb   :  { %v7211_v19 = vpop.eup %7210  ;;  %6844 = vmatprep.subr.msk.bf16.mxu0 %vm8047_vm1, %v6842_v38  ;;  %v3271_v34 = vmul.f32 %v7209_v40, %v7205_v18 }
0x23ec   :  { %v3270_v30 = vmul.f32 %v7211_v19, %v7207_v63 }
0x23ee   :  { %6491 = vmatprep.mubr.msk.f32.mxu0 %vm363_vm6, %v3270_v30 }
0x23ef   :  { %6492 = vmatmul.mubr.msk.f32.vlgmr.msra.gmra.mrb[38].mxu0 %vm363_vm6, %v3271_v34 }
0x23f0   :  { %6498 = vmatprep.mubr.msk.f32.mxu0 %vm194_vm2, %v2147_v42 }
0x23f3   :  { %6847 = vmatpush3.bf16.xpose.msk.msra.mxu0 %vm8047_vm1, %v6842_v38 }
0x23fa   :  { %6499 = vmatmul.mubr.msk.f32.vlgmr.msra.gmra.mrb[40].mxu0 %vm194_vm2, %v2148_v9 }
0x24c2   :  { %v8457_v21 = vpop.f32.mrb[38].mxu0 }
0x24c3   :  { %v8459_v48 = vpop.f32.mrb[39].mxu0 }
0x24cd   :  { %v6500_v49 = vpop.f32.mrb[40].mxu0 }
0x24ce   :  { %v3459_v62 = vadd.f32 %v6500_v49, %v8060_v35  ;;  %v3453_v16 = vpop.f32.mrb[41].mxu0 }
0x24cf   :  { %v3454_v18 = vadd.f32 %v3453_v16, %v8063_v41 }
0x24d0   :  { %v3465_v63 = vsel %vm363_vm6, %v3459_v62, -inf }
0x24d1   :  { %3466 = vmax.xlane.f32.xlu0 %v3465_v63  ;;  %v3462_v51 = vsel %vm363_vm6, %v3454_v18, -inf }
0x24d2   :  { %3463 = vmax.xlane.f32.xlu1 %v3462_v51 }
0x255e   :  { %v3467_v59 = vpop.xlane.xlu0 %3466 }
0x255f   :  { %v3469_v0 = vsub.f32 %v3459_v62, %v3467_v59  ;;  %v3464_v56 = vpop.xlane.xlu1 %3463 }
0x2560   :  { %v3468_v17 = vsub.f32 %v3454_v18, %v3464_v56 }
0x2561   :  { %v3472_v10 = vmul.f32 1.442695, %v3469_v0 }
0x2562   :  { %v3470_v6 = vmul.f32 1.442695, %v3468_v17 }
0x2563   :  { %7212 = vpow2.f32 %v3472_v10 }
0x2564   :  { %7214 = vpow2.f32 %v3470_v6 }
0x256d   :  { %v7213_v8 = vpop.eup %7212 }
0x256e   :  { %v7215_v58 = vpop.eup %7214  ;;  %v3477_v28 = vsel %vm363_vm6, %v7213_v8, 0.0 }
0x256f   :  { %3478 = vadd.xlane.f32.xlu1 %v3477_v28  ;;  %v3474_v39 = vsel %vm363_vm6, %v7215_v58, 0.0 }
0x2570   :  { %3475 = vadd.xlane.f32.xlu0 %v3474_v39 }
0x2580   :  { %3565 = vrot.lane.b32.xlu1 %v2147_v42, %s7416_s14 }
0x2584   :  { %3567 = vrot.lane.b32.xlu1 %v2148_v9, %s7416_s14 }
0x2586   :  { %7061 = vrot.lane.b32.xlu0 %v8335_v22, %s7423_s24 }
0x25fc   :  { %v3479_v14 = vpop.xlane.xlu1 %3478 }
0x25fd   :  { %7216 = vrcp.f32 %v3479_v14  ;;  %v3476_v36 = vpop.xlane.xlu0 %3475 }
0x25fe   :  { %7218 = vrcp.f32 %v3476_v36 }
0x2600   :  { %v3566_v9 = vpop.permute.xlu1 %3565 }
0x2601   :  { %v7062_v38 = vpop.permute.xlu0 %7061 }
0x2602   :  { %v7064_v40 = vunpack.i.h.bf16 %v7062_v38  ;;  %v7063_v19 = vunpack.i.l.bf16 %v7062_v38 }
0x2604   :  { %v6852_v30 = vpack.c.bf16 %v7064_v40, %v7063_v19  ;;  %v3568_v22 = vpop.permute.xlu1 %3567 }
0x2606   :  { %6854 = vmatprep.subr.msk.bf16.mxu1 %vm8047_vm1, %v6852_v30 }
0x2607   :  { %v7217_v34 = vpop.eup %7216 }
0x2608   :  { %v7219_v49 = vpop.eup %7218  ;;  %v3483_v42 = vmul.f32 %v7217_v34, %v7213_v8 }
0x2609   :  { %v3482_v62 = vmul.f32 %v7219_v49, %v7215_v58 }
0x260b   :  { %6505 = vmatprep.mubr.msk.f32.mxu1 %vm363_vm6, %v3482_v62 }
0x260c   :  { %6506 = vmatmul.mubr.msk.f32.vlgmr.msra.gmra.mrb[42].mxu1 %vm363_vm6, %v3483_v42 }
0x260d   :  { %6857 = vmatpush3.bf16.xpose.msk.msra.mxu1 %vm8047_vm1, %v6852_v30  ;;  %6512 = vmatprep.mubr.msk.f32.mxu1 %vm194_vm2, %v3566_v9 }
0x260e   :  { %6869 = vmatprep.subr.bf16.mxu1 %v8367_v32 }
0x2614   :  { %6513 = vmatmul.mubr.msk.f32.vlgmr.msra.gmra.mrb[44].mxu1 %vm194_vm2, %v3568_v22 }
0x2615   :  { %6871 = vmatpush3.bf16.msra.mxu1 %v8367_v32  ;;  %v9307_v32 = vpack.i.bf16 %v8331_v15, %v8328_v5 }
0x26df   :  { %v8481_v16 = vpop.f32.mrb[42].mxu1 }
0x26e0   :  { %v8483_v18 = vpop.f32.mrb[43].mxu1 }
0x26e7   :  { %v6514_v63 = vpop.f32.mrb[44].mxu1 }
0x26e8   :  { %v3653_v51 = vadd.f32 %v6514_v63, %v8060_v35  ;;  %v3647_v59 = vpop.f32.mrb[45].mxu1 }
0x26e9   :  { %v3648_v0 = vadd.f32 %v3647_v59, %v8063_v41 }
0x26ea   :  { %v3659_v56 = vsel %vm363_vm6, %v3653_v51, -inf }
0x26eb   :  { %3660 = vmax.xlane.f32.xlu1 %v3659_v56  ;;  %v3656_v17 = vsel %vm363_vm6, %v3648_v0, -inf  ;;  %v2149_v56 = vmul.f32 0.17677669, %v8348_v3 }
0x26ec   :  { %3657 = vmax.xlane.f32.xlu0 %v3656_v17  ;;  %v2150_v17 = vmul.f32 0.17677669, %v8351_v44 }
0x26fc   :  { %7066 = vrot.lane.b32.xlu1 %v9307_v32, %s7416_s14 }
0x2778   :  { %v3661_v10 = vpop.xlane.xlu1 %3660 }
0x2779   :  { %v3663_v6 = vsub.f32 %v3653_v51, %v3661_v10  ;;  %v3658_v8 = vpop.xlane.xlu0 %3657 }
0x277a   :  { %v3662_v58 = vsub.f32 %v3648_v0, %v3658_v8 }
0x277b   :  { %v3666_v28 = vmul.f32 1.442695, %v3663_v6 }
0x277c   :  { %v3664_v39 = vmul.f32 1.442695, %v3662_v58  ;;  %v7067_v14 = vpop.permute.xlu1 %7066 }
0x277d   :  { %7220 = vpow2.f32 %v3666_v28  ;;  %v7069_v36 = vunpack.i.h.bf16 %v7067_v14  ;;  %v7068_v38 = vunpack.i.l.bf16 %v7067_v14 }
0x277e   :  { %7222 = vpow2.f32 %v3664_v39 }
0x277f   :  { %v6858_v40 = vpack.c.bf16 %v7069_v36, %v7068_v38 }
0x2781   :  { %6859 = vmatprep.subr.bf16.mxu0 %v6858_v40 }
0x2782   :  { %6861 = vmatpush3.bf16.msra.mxu0 %v6858_v40 }
0x2787   :  { %v7221_v19 = vpop.eup %7220 }
0x2788   :  { %v3671_v30 = vsel %vm363_vm6, %v7221_v19, 0.0  ;;  %v7223_v34 = vpop.eup %7222 }
0x2789   :  { %3672 = vadd.xlane.f32.xlu0 %v3671_v30  ;;  %v3668_v5 = vsel %vm363_vm6, %v7223_v34, 0.0 }
0x278d   :  { %3669 = vadd.xlane.f32.xlu0 %v3668_v5 }
0x27a3   :  { %7071 = vrot.lane.b32.xlu0 %v8361_v1, %s7418_s16 }
0x2816   :  { %v3673_v15 = vpop.xlane.xlu0 %3672 }
0x2817   :  { %7224 = vrcp.f32 %v3673_v15 }
0x281a   :  { %v3670_v49 = vpop.xlane.xlu0 %3669 }
0x281b   :  { %7226 = vrcp.f32 %v3670_v49 }
0x281e   :  { %v7072_v62 = vpop.permute.xlu0 %7071 }
0x281f   :  { %v7074_v42 = vunpack.i.h.bf16 %v7072_v62  ;;  %v7073_v9 = vunpack.i.l.bf16 %v7072_v62 }
0x2821   :  { %v6862_v22 = vpack.c.bf16 %v7074_v42, %v7073_v9  ;;  %v7225_v63 = vpop.eup %7224 }
0x2822   :  { %v3677_v0 = vmul.f32 %v7225_v63, %v7221_v19 }
0x2823   :  { %6864 = vmatprep.subr.msk.bf16.mxu0 %vm8047_vm1, %v6862_v22 }
0x2825   :  { %v7227_v51 = vpop.eup %7226 }
0x2826   :  { %v3676_v59 = vmul.f32 %v7227_v51, %v7223_v34 }
0x2828   :  { %6519 = vmatprep.mubr.msk.f32.mxu0 %vm363_vm6, %v3676_v59 }
0x2829   :  { %6520 = vmatmul.mubr.msk.f32.vlgmr.msra.gmra.mrb[42].mxu0 %vm363_vm6, %v3677_v0 }
0x282a   :  { %6867 = vmatpush3.bf16.xpose.msk.msra.mxu0 %vm8047_vm1, %v6862_v22  ;;  %6526 = vmatprep.mubr.msk.f32.mxu0 %vm194_vm2, %v2149_v56 }
0x2831   :  { %6527 = vmatmul.mubr.msk.f32.vlgmr.msra.gmra.mrb[44].mxu0 %vm194_vm2, %v2150_v17 }
0x28fc   :  { %v8507_v32 = vpop.f32.mrb[42].mxu0 }
0x28fd   :  { %v8509_v10 = vpop.f32.mrb[43].mxu0 }
0x2904   :  { %v6528_v6 = vpop.f32.mrb[44].mxu0 }
0x2905   :  { %v3865_v3 = vadd.f32 %v6528_v6, %v8060_v35  ;;  %v3859_v8 = vpop.f32.mrb[45].mxu0 }
0x2906   :  { %v3860_v58 = vadd.f32 %v3859_v8, %v8063_v41 }
0x2907   :  { %v3871_v28 = vsel %vm363_vm6, %v3865_v3, -inf }
0x2908   :  { %3872 = vmax.xlane.f32.xlu0 %v3871_v28  ;;  %v3868_v39 = vsel %vm363_vm6, %v3860_v58, -inf }
0x2909   :  { %3869 = vmax.xlane.f32.xlu1 %v3868_v39 }
0x291a   :  { %7076 = vrot.lane.b32.xlu1 %v8361_v1, %s7423_s24 }
0x2995   :  { %v3873_v44 = vpop.xlane.xlu0 %3872 }
0x2996   :  { %v3875_v14 = vsub.f32 %v3865_v3, %v3873_v44  ;;  %v3870_v36 = vpop.xlane.xlu1 %3869 }
0x2997   :  { %v3874_v38 = vsub.f32 %v3860_v58, %v3870_v36 }
0x2998   :  { %v3878_v40 = vmul.f32 1.442695, %v3875_v14 }
0x2999   :  { %v3876_v19 = vmul.f32 1.442695, %v3874_v38 }
0x299a   :  { %7228 = vpow2.f32 %v3878_v40  ;;  %v7077_v30 = vpop.permute.xlu1 %7076 }
0x299b   :  { %7230 = vpow2.f32 %v3876_v19  ;;  %v7079_v34 = vunpack.i.h.bf16 %v7077_v30  ;;  %v7078_v5 = vunpack.i.l.bf16 %v7077_v30 }
0x299d   :  { %v6872_v15 = vpack.c.bf16 %v7079_v34, %v7078_v5 }
0x299f   :  { %6874 = vmatprep.subr.msk.bf16.mxu1 %vm8047_vm1, %v6872_v15 }
0x29a4   :  { %v7229_v49 = vpop.eup %7228 }
0x29a5   :  { %v7231_v62 = vpop.eup %7230  ;;  %v3883_v42 = vsel %vm363_vm6, %v7229_v49, 0.0 }
0x29a6   :  { %3884 = vadd.xlane.f32.xlu0 %v3883_v42  ;;  %v3880_v1 = vsel %vm363_vm6, %v7231_v62, 0.0 }
0x29a7   :  { %3881 = vadd.xlane.f32.xlu1 %v3880_v1 }
0x29b8   :  { %3973 = vrot.lane.b32.xlu1 %v2150_v17, %s7416_s14 }
0x29bc   :  { %3971 = vrot.lane.b32.xlu0 %v2149_v56, %s7416_s14 }
0x2a33   :  { %v3885_v9 = vpop.xlane.xlu0 %3884 }
0x2a34   :  { %7232 = vrcp.f32 %v3885_v9  ;;  %v3882_v22 = vpop.xlane.xlu1 %3881 }
0x2a35   :  { %7234 = vrcp.f32 %v3882_v22 }
0x2a37   :  { %v3972_v6 = vpop.permute.xlu0 %3971 }
0x2a38   :  { %v3974_v56 = vpop.permute.xlu1 %3973 }
0x2a3e   :  { %v7233_v63 = vpop.eup %7232 }
0x2a3f   :  { %v7235_v51 = vpop.eup %7234  ;;  %v3889_v0 = vmul.f32 %v7233_v63, %v7229_v49 }
0x2a40   :  { %v3888_v59 = vmul.f32 %v7235_v51, %v7231_v62  ;;  %v9308_v62 = vpack.i.bf16 %v8357_v50, %v8354_v54 }
0x2a42   :  { %6533 = vmatprep.mubr.msk.f32.mxu1 %vm363_vm6, %v3888_v59 }
0x2a43   :  { %6534 = vmatmul.mubr.msk.f32.vlgmr.msra.gmra.mrb[46].mxu1 %vm363_vm6, %v3889_v0 }
0x2a44   :  { %6877 = vmatpush3.bf16.xpose.msk.msra.mxu1 %vm8047_vm1, %v6872_v15  ;;  %6540 = vmatprep.mubr.msk.f32.mxu1 %vm194_vm2, %v3972_v6 }
0x2a45   :  { %6889 = vmatprep.subr.bf16.mxu1 %v8393_v45 }
0x2a4b   :  { %6541 = vmatmul.mubr.msk.f32.vlgmr.msra.gmra.mrb[48].mxu1 %vm194_vm2, %v3974_v56 }
0x2a4c   :  { %6891 = vmatpush3.bf16.msra.mxu1 %v8393_v45 }
0x2b16   :  { %v8531_v17 = vpop.f32.mrb[46].mxu1 }
0x2b17   :  { %v8533_v3 = vpop.f32.mrb[47].mxu1 }
0x2b1e   :  { %v6542_v8 = vpop.f32.mrb[48].mxu1 }
0x2b1f   :  { %v4059_v58 = vadd.f32 %v6542_v8, %v8060_v35  ;;  %v4053_v28 = vpop.f32.mrb[49].mxu1 }
0x2b20   :  { %v4054_v39 = vadd.f32 %v4053_v28, %v8063_v41  ;;  %v2151_v28 = vmul.f32 0.17677669, %v8372_v47 }
0x2b21   :  { %v4065_v44 = vsel %vm363_vm6, %v4059_v58, -inf }
0x2b22   :  { %4066 = vmax.xlane.f32.xlu0 %v4065_v44  ;;  %v4062_v14 = vsel %vm363_vm6, %v4054_v39, -inf }
0x2b23   :  { %4063 = vmax.xlane.f32.xlu1 %v4062_v14 }
0x2baf   :  { %v4067_v36 = vpop.xlane.xlu0 %4066 }
0x2bb0   :  { %v4069_v38 = vsub.f32 %v4059_v58, %v4067_v36  ;;  %v4064_v40 = vpop.xlane.xlu1 %4063 }
0x2bb1   :  { %v4068_v45 = vsub.f32 %v4054_v39, %v4064_v40  ;;  %v2152_v39 = vmul.f32 0.17677669, %v8375_v57 }
0x2bb2   :  { %v4072_v19 = vmul.f32 1.442695, %v4069_v38 }
0x2bb3   :  { %v4070_v30 = vmul.f32 1.442695, %v4068_v45 }
0x2bb4   :  { %7236 = vpow2.f32 %v4072_v19 }
0x2bb5   :  { %7238 = vpow2.f32 %v4070_v30 }
0x2bbe   :  { %v7237_v34 = vpop.eup %7236 }
0x2bbf   :  { %v7239_v5 = vpop.eup %7238  ;;  %v4077_v15 = vsel %vm363_vm6, %v7237_v34, 0.0 }
0x2bc0   :  { %4078 = vadd.xlane.f32.xlu1 %v4077_v15  ;;  %v4074_v49 = vsel %vm363_vm6, %v7239_v5, 0.0 }
0x2bc1   :  { %4075 = vadd.xlane.f32.xlu0 %v4074_v49 }
0x2bd1   :  { %7086 = vrot.lane.b32.xlu1 %v8387_v43, %s7418_s16 }
0x2bd7   :  { %7081 = vrot.lane.b32.xlu0 %v9308_v62, %s7416_s14 }
0x2c4d   :  { %v4079_v42 = vpop.xlane.xlu1 %4078 }
0x2c4e   :  { %7240 = vrcp.f32 %v4079_v42  ;;  %v4076_v1 = vpop.xlane.xlu0 %4075 }
0x2c4f   :  { %7242 = vrcp.f32 %v4076_v1 }
0x2c51   :  { %v7087_v9 = vpop.permute.xlu1 %7086 }
0x2c52   :  { %v7082_v22 = vpop.permute.xlu0 %7081  ;;  %v7089_v63 = vunpack.i.h.bf16 %v7087_v9  ;;  %v7088_v51 = vunpack.i.l.bf16 %v7087_v9 }
0x2c53   :  { %v7084_v59 = vunpack.i.h.bf16 %v7082_v22  ;;  %v7083_v0 = vunpack.i.l.bf16 %v7082_v22 }
0x2c54   :  { %v6882_v56 = vpack.c.bf16 %v7089_v63, %v7088_v51 }
0x2c55   :  { %v6878_v6 = vpack.c.bf16 %v7084_v59, %v7083_v0 }
0x2c57   :  { %6879 = vmatprep.subr.bf16.mxu0 %v6878_v6 }
0x2c58   :  { %v7241_v8 = vpop.eup %7240  ;;  %6881 = vmatpush3.bf16.msra.mxu0 %v6878_v6 }
0x2c59   :  { %v7243_v58 = vpop.eup %7242  ;;  %6884 = vmatprep.subr.msk.bf16.mxu0 %vm8047_vm1, %v6882_v56  ;;  %v4083_v50 = vmul.f32 %v7241_v8, %v7237_v34 }
0x2c5a   :  { %v4082_v54 = vmul.f32 %v7243_v58, %v7239_v5 }
0x2c5c   :  { %6547 = vmatprep.mubr.msk.f32.mxu0 %vm363_vm6, %v4082_v54 }
0x2c5d   :  { %6548 = vmatmul.mubr.msk.f32.vlgmr.msra.gmra.mrb[46].mxu0 %vm363_vm6, %v4083_v50 }
0x2c5e   :  { %6554 = vmatprep.mubr.msk.f32.mxu0 %vm194_vm2, %v2151_v28 }
0x2c61   :  { %6887 = vmatpush3.bf16.xpose.msk.msra.mxu0 %vm8047_vm1, %v6882_v56 }
0x2c68   :  { %6555 = vmatmul.mubr.msk.f32.vlgmr.msra.gmra.mrb[48].mxu0 %vm194_vm2, %v2152_v39 }
0x2d30   :  { %v8557_v44 = vpop.f32.mrb[46].mxu0 }
0x2d31   :  { %v4164_v14 = vpop.f32.mrb[47].mxu0 }
0x2d3b   :  { %v6556_v36 = vpop.f32.mrb[48].mxu0 }
0x2d3c   :  { %v4271_v38 = vadd.f32 %v6556_v36, %v8060_v35  ;;  %v4265_v47 = vpop.f32.mrb[49].mxu0 }
0x2d3d   :  { %v4266_v40 = vadd.f32 %v4265_v47, %v8063_v41 }
0x2d3e   :  { %v4277_v45 = vsel %vm363_vm6, %v4271_v38, -inf }
0x2d3f   :  { %4278 = vmax.xlane.f32.xlu0 %v4277_v45  ;;  %v4274_v19 = vsel %vm363_vm6, %v4266_v40, -inf }
0x2d40   :  { %4275 = vmax.xlane.f32.xlu1 %v4274_v19 }
0x2dcc   :  { %v4279_v30 = vpop.xlane.xlu0 %4278 }
0x2dcd   :  { %v4281_v34 = vsub.f32 %v4271_v38, %v4279_v30  ;;  %v4276_v57 = vpop.xlane.xlu1 %4275  ;;  %v9310_v30 = vpack.i.bf16 %v8382_v7, %v8379_v60 }
0x2dce   :  { %v4280_v5 = vsub.f32 %v4266_v40, %v4276_v57 }
0x2dcf   :  { %v4284_v15 = vmul.f32 1.442695, %v4281_v34 }
0x2dd0   :  { %v4282_v49 = vmul.f32 1.442695, %v4280_v5 }
0x2dd1   :  { %7244 = vpow2.f32 %v4284_v15 }
0x2dd2   :  { %7246 = vpow2.f32 %v4282_v49 }
0x2ddb   :  { %v7245_v62 = vpop.eup %7244 }
0x2ddc   :  { %v7247_v42 = vpop.eup %7246  ;;  %v4289_v1 = vsel %vm363_vm6, %v7245_v62, 0.0 }
0x2ddd   :  { %4290 = vadd.xlane.f32.xlu1 %v4289_v1  ;;  %v4286_v9 = vsel %vm363_vm6, %v7247_v42, 0.0 }
0x2dde   :  { %4287 = vadd.xlane.f32.xlu0 %v4286_v9 }
0x2dee   :  { %4377 = vrot.lane.b32.xlu1 %v2151_v28, %s7416_s14  ;;  %v9309_v28 = vmov 0.0  }
0x2df2   :  { %4379 = vrot.lane.b32.xlu1 %v2152_v39, %s7416_s14 }
0x2df4   :  { %7091 = vrot.lane.b32.xlu0 %v8387_v43, %s7423_s24 }
0x2e6a   :  { %v4291_v22 = vpop.xlane.xlu1 %4290 }
0x2e6b   :  { %7248 = vrcp.f32 %v4291_v22  ;;  %v4288_v63 = vpop.xlane.xlu0 %4287 }
0x2e6c   :  { %7250 = vrcp.f32 %v4288_v63 }
0x2e6e   :  { %v4378_v50 = vpop.permute.xlu1 %4377 }
0x2e6f   :  { %v7092_v51 = vpop.permute.xlu0 %7091 }
0x2e70   :  { %v7094_v59 = vunpack.i.h.bf16 %v7092_v51  ;;  %v7093_v0 = vunpack.i.l.bf16 %v7092_v51 }
0x2e72   :  { %v6892_v6 = vpack.c.bf16 %v7094_v59, %v7093_v0  ;;  %v4380_v43 = vpop.permute.xlu1 %4379  ;;  %v1721_v0 = vld [vmem:[%s9270_s10 + $0x20] sm:$0xff] }
0x2e74   :  { %6894 = vmatprep.subr.msk.bf16.mxu1 %vm8047_vm1, %v6892_v6 }
0x2e75   :  { %v7249_v56 = vpop.eup %7248 }
0x2e76   :  { %v7251_v8 = vpop.eup %7250  ;;  %v4295_v54 = vmul.f32 %v7249_v56, %v7245_v62  ;;  %v1717_v62 = vld [vmem:[%s9270_s10] sm:$0xff] }
0x2e77   :  { %v4294_v58 = vmul.f32 %v7251_v8, %v7247_v42  ;;  %v1718_v42 = vld [vmem:[%s9270_s10 + $0x8] sm:$0xff] }
0x2e78   :  { %v6902_v1 = vpack.c.bf16 %v1718_v42, %v1717_v62 }
0x2e79   :  { %6561 = vmatprep.mubr.msk.f32.mxu1 %vm363_vm6, %v4294_v58 }
0x2e7a   :  { %6562 = vmatmul.mubr.msk.f32.vlgmr.msra.gmra.mrb[50].mxu1 %vm363_vm6, %v4295_v54  ;;  %v1723_v54 = vld [vmem:[%s9270_s10 + $0x30] sm:$0xff] }
0x2e7b   :  { %6897 = vmatpush3.bf16.xpose.msk.msra.mxu1 %vm8047_vm1, %v6892_v6  ;;  %6568 = vmatprep.mubr.msk.f32.mxu1 %vm194_vm2, %v4378_v50  ;;  %v1722_v6 = vld [vmem:[%s9270_s10 + $0x28] sm:$0xff]  ;;  %v1724_v50 = vld [vmem:[%s9270_s10 + $0x38] sm:$0xff] }
0x2e7c   :  { %v6910_v58 = vpack.c.bf16 %v1722_v6, %v1721_v0 }
0x2e82   :  { %6569 = vmatmul.mubr.msk.f32.vlgmr.msra.gmra.mrb[52].mxu1 %vm194_vm2, %v4380_v43  ;;  %v6914_v43 = vpack.c.bf16 %v1724_v50, %v1723_v54 }
0x2e83   :  { %5074 = vmatprep.mubr.f32.mxu1 %v9309_v28 }
0x2f4d   :  { %v8578_v39 = vpop.f32.mrb[50].mxu1 }
0x2f4e   :  { %v8580_v36 = vpop.f32.mrb[51].mxu1 }
0x2f55   :  { %v6570_v38 = vpop.f32.mrb[52].mxu1 }
0x2f56   :  { %v4465_v47 = vadd.f32 %v6570_v38, %v8060_v35  ;;  %v4459_v40 = vpop.f32.mrb[53].mxu1 }
0x2f57   :  { %v4460_v45 = vadd.f32 %v4459_v40, %v8063_v41 }
0x2f58   :  { %v4471_v20 = vsel %vm363_vm6, %v4465_v47, -inf }
0x2f59   :  { %4472 = vmax.xlane.f32.xlu1 %v4471_v20  ;;  %v4468_v19 = vsel %vm363_vm6, %v4460_v45, -inf }
0x2f5a   :  { %4469 = vmax.xlane.f32.xlu0 %v4468_v19 }
0x2f6a   :  { %7096 = vrot.lane.b32.xlu1 %v9310_v30, %s7416_s14 }
0x2f6e   :  { %2553 = vrot.lane.b32.xlu1 %v8170_v31, %s7423_s24 }
0x2f72   :  { %2957 = vrot.lane.b32.xlu1 %v8429_v25, %s7423_s24 }
0x2f76   :  { %3363 = vrot.lane.b32.xlu1 %v8459_v48, %s7423_s24 }
0x2f7a   :  { %3769 = vrot.lane.b32.xlu1 %v8509_v10, %s7423_s24 }
0x2f7e   :  { %4175 = vrot.lane.b32.xlu1 %v4164_v14, %s7423_s24 }
0x2fe6   :  { %v4473_v35 = vpop.xlane.xlu1 %4472 }
0x2fe7   :  { %v4475_v41 = vsub.f32 %v4465_v47, %v4473_v35  ;;  %v4470_v34 = vpop.xlane.xlu0 %4469 }
0x2fe8   :  { %v4474_v57 = vsub.f32 %v4460_v45, %v4470_v34 }
0x2fe9   :  { %v4478_v7 = vmul.f32 1.442695, %v4475_v41 }
0x2fea   :  { %v4476_v60 = vmul.f32 1.442695, %v4474_v57  ;;  %v7097_v5 = vpop.permute.xlu1 %7096 }
0x2feb   :  { %v7099_v15 = vunpack.i.h.bf16 %v7097_v5  ;;  %v7098_v31 = vunpack.i.l.bf16 %v7097_v5 }
0x2fec   :  { %7252 = vpow2.f32 %v4476_v60 }
0x2fed   :  { %v6898_v49 = vpack.c.bf16 %v7099_v15, %v7098_v31  ;;  %7254 = vpow2.f32 %v4478_v7  ;;  %v8672_v15 = vld [vmem:[%s9267_s7] sm:$0xff] }
0x2fee   :  { %v2554_v8 = vpop.permute.xlu1 %2553 }
0x2fef   :  { %6899 = vmatprep.subr.bf16.mxu0 %v6898_v49  ;;  %v2558_v40 = vsel %vm194_vm2, %v8103_v12, %v2554_v8  ;;  %v9312_v8 = vld [vmem:[#allocation14_spill] sm:$0xff] }
0x2ff0   :  { %6901 = vmatpush3.bf16.msra.mxu0 %v6898_v49 }
0x2ff1   :  { %6903 = vmatprep.subr.bf16.mxu0 %v6902_v1 }
0x2ff6   :  { %v7253_v25 = vpop.eup %7252 }
0x2ff7   :  { %v4480_v48 = vsel %vm363_vm6, %v7253_v25, 0.0  ;;  %v7255_v10 = vpop.eup %7254 }
0x2ff8   :  { %4481 = vadd.xlane.f32.xlu0 %v4480_v48  ;;  %v4483_v14 = vsel %vm363_vm6, %v7255_v10, 0.0 }
0x2ffc   :  { %4484 = vadd.xlane.f32.xlu0 %v4483_v14 }
0x3012   :  { %2551 = vrot.lane.b32.xlu0 %v8172_v52, %s7423_s24 }
0x3016   :  { %2959 = vrot.lane.b32.xlu0 %v8427_v61, %s7423_s24  ;;  %v1719_v61 = vld [vmem:[%s9270_s10 + $0x10] sm:$0xff] }
0x301a   :  { %3365 = vrot.lane.b32.xlu0 %v8457_v21, %s7423_s24  ;;  %v1720_v21 = vld [vmem:[%s9270_s10 + $0x18] sm:$0xff] }
0x301e   :  { %3771 = vrot.lane.b32.xlu0 %v8507_v32, %s7423_s24 }
0x3022   :  { %4177 = vrot.lane.b32.xlu0 %v8557_v44, %s7423_s24  ;;  %v6906_v44 = vpack.c.bf16 %v1720_v21, %v1719_v61 }
0x3085   :  { %v4482_v52 = vpop.xlane.xlu0 %4481 }
0x3086   :  { %7256 = vrcp.f32 %v4482_v52 }
0x3089   :  { %v4485_v9 = vpop.xlane.xlu0 %4484 }
0x308a   :  { %7258 = vrcp.f32 %v4485_v9 }
0x308d   :  { %v2552_v51 = vpop.permute.xlu0 %2551 }
0x308e   :  { %v2557_v56 = vsel %vm194_vm2, %v8106_v26, %v2552_v51  ;;  %v2958_v26 = vpop.permute.xlu1 %2957 }
0x308f   :  { %v2963_v45 = vsel %vm194_vm2, %v8345_v23, %v2958_v26 }
0x3090   :  { %v7257_v22 = vpop.eup %7256 }
0x3091   :  { %v4488_v63 = vmul.f32 %v7257_v22, %v7253_v25  ;;  %v2960_v38 = vpop.permute.xlu0 %2959 }
0x3092   :  { %v3364_v47 = vpop.permute.xlu1 %3363  ;;  %v2964_v30 = vsel %vm194_vm2, %v8343_v55, %v2960_v38 }
0x3093   :  { %6575 = vmatprep.mubr.msk.f32.mxu0 %vm363_vm6, %v4488_v63  ;;  %v3369_v35 = vsel %vm194_vm2, %v8433_v11, %v3364_v47 }
0x3094   :  { %v7259_v32 = vpop.eup %7258 }
0x3095   :  { %v4489_v59 = vmul.f32 %v7259_v32, %v7255_v10  ;;  %v3366_v20 = vpop.permute.xlu0 %3365 }
0x3096   :  { %v3770_v19 = vpop.permute.xlu1 %3769  ;;  %v3370_v23 = vsel %vm194_vm2, %v8431_v4, %v3366_v20 }
0x3097   :  { %6576 = vmatmul.mubr.msk.f32.vlgmr.msra.gmra.mrb[50].mxu0 %vm363_vm6, %v4489_v59  ;;  %v3775_v41 = vsel %vm194_vm2, %v8483_v18, %v3770_v19  ;;  %vm5554_vm6 = vcmask 521216  }
0x3098   :  { %6905 = vmatpush3.bf16.msra.mxu0 %v6902_v1  ;;  %6594 = vmatprep.mubr.msk.f32.mxu0 %vm112_vm0, %v2557_v56 }
0x3099   :  { %6907 = vmatprep.subr.bf16.mxu0 %v6906_v44  ;;  %v3772_v12 = vpop.permute.xlu0 %3771 }
0x309a   :  { %v4176_v34 = vpop.permute.xlu1 %4175  ;;  %v3776_v55 = vsel %vm194_vm2, %v8481_v16, %v3772_v12 }
0x309b   :  { %v4181_v11 = vsel %vm194_vm2, %v8533_v3, %v4176_v34 }
0x309c   :  { %6909 = vmatpush3.bf16.msra.mxu0 %v6906_v44  ;;  %v9311_v44 = vld [vmem:[#allocation13_spill] sm:$0xff] }
0x309d   :  { %6911 = vmatprep.subr.bf16.mxu0 %v6910_v58  ;;  %v4178_v57 = vpop.permute.xlu0 %4177 }
0x309e   :  { %v4182_v4 = vsel %vm194_vm2, %v8531_v17, %v4178_v57  ;;  %v8676_v17 = vrot.slane %v8672_v15, %v7645_v46 }
0x30a0   :  { %6913 = vmatpush3.bf16.msra.mxu0 %v6910_v58 }
0x30a1   :  { %6915 = vmatprep.subr.bf16.mxu0 %v6914_v43 }
0x30a4   :  { %6917 = vmatpush3.bf16.msra.mxu0 %v6914_v43 }
0x30a7   :  { %6595 = vmatmul.mubr.msk.f32.vlgmr.msra.gmra.mrb[52].mxu0 %vm112_vm0, %v2558_v40 }
0x30a8   :  { %6597 = vmatprep.mubr.msk.f32.mxu0 %vm112_vm0, %v2963_v45 }
0x30ab   :  { %6598 = vmatmul.mubr.msk.f32.gmra.mrb[54].mxu0 %vm112_vm0, %v2964_v30 }
0x30ac   :  { %6600 = vmatprep.mubr.msk.f32.mxu0 %vm112_vm0, %v3369_v35 }
0x30af   :  { %6601 = vmatmul.mubr.msk.f32.gmra.mrb[56].mxu0 %vm112_vm0, %v3370_v23 }
0x30b0   :  { %6603 = vmatprep.mubr.msk.f32.mxu0 %vm112_vm0, %v3775_v41 }
0x30b3   :  { %6604 = vmatmul.mubr.msk.f32.gmra.mrb[58].mxu0 %vm112_vm0, %v3776_v55 }
0x30b4   :  { %6606 = vmatprep.mubr.msk.f32.mxu0 %vm112_vm0, %v4181_v11 }
0x30b7   :  { %6607 = vmatmul.mubr.msk.f32.gmra.mrb[60].mxu0 %vm112_vm0, %v4182_v4  ;;  %v9313_v4 = vld [vmem:[#allocation15_spill] sm:$0xff] }
0x316a   :  { %v6577_v18 = vpop.f32.mrb[50].mxu0 }
0x316b   :  { %4583 = vrot.lane.b32.xlu0 %v6577_v18, %s7423_s24  ;;  %v4570_v7 = vpop.f32.mrb[51].mxu0 }
0x316c   :  { %4581 = vrot.lane.b32.xlu1 %v4570_v7, %s7423_s24 }
0x317a   :  { %v6596_v16 = vpop.f32.mrb[52].mxu0 }
0x317b   :  { %v4691_v60 = vpop.f32.mrb[53].mxu0  ;;  %v4751_v31 = vadd.f32 %v6596_v16, %v7908_v27 }
0x317c   :  { %v4750_v62 = vadd.f32 %v4691_v60, %v7911_v29  ;;  %v9314_v60 = vld [vmem:[#allocation16_spill] sm:$0xff] }
0x317d   :  { %v8680_v48 = vadd.f32 %v8676_v17, %v4751_v31 }
0x317e   :  { %v6599_v5 = vpop.f32.mrb[54].mxu0  ;;  %v8691_v9 = vadd.f32 %v8676_v17, %v4750_v62 }
0x317f   :  { %v4701_v3 = vpop.f32.mrb[55].mxu0  ;;  %v4781_v46 = vsel %vm112_vm0, %v8680_v48, 0.0  ;;  %v4753_v22 = vadd.f32 %v6599_v5, %v8073_v53 }
0x3180   :  { %v4752_v10 = vadd.f32 %v4701_v3, %v8082_v2  ;;  %v4778_v32 = vsel %vm112_vm0, %v8691_v9, 0.0 }
0x3182   :  { %v6602_v49 = vpop.f32.mrb[56].mxu0  ;;  %v8685_v1 = vadd.f32 %v8676_v17, %v4752_v10 }
0x3183   :  { %v4711_v25 = vpop.f32.mrb[57].mxu0  ;;  %v4755_v21 = vadd.f32 %v6602_v49, %v8138_v13 }
0x3184   :  { %v4754_v52 = vadd.f32 %v4711_v25, %v8144_v24  ;;  %v4784_v61 = vsel %vm112_vm0, %v8685_v1, 0.0  ;;  %v8701_v24 = vadd.f32 %v8676_v17, %v4753_v22 }
0x3185   :  { %v8713_v59 = vadd.f32 %v8676_v17, %v4755_v21 }
0x3186   :  { %v6605_v14 = vpop.f32.mrb[58].mxu0  ;;  %v8695_v63 = vadd.f32 %v8676_v17, %v4754_v52  ;;  %v4787_v13 = vsel %vm112_vm0, %v8701_v24, 0.0 }
0x3187   :  { %v4721_v42 = vpop.f32.mrb[59].mxu0  ;;  %v4757_v0 = vadd.f32 %v6605_v14, %v9311_v44  ;;  %v4793_v54 = vsel %vm112_vm0, %v8713_v59, 0.0 }
0x3188   :  { %v4756_v29 = vadd.f32 %v4721_v42, %v7935_v33  ;;  %v4790_v33 = vsel %vm112_vm0, %v8695_v63, 0.0 }
0x318a   :  { %v6608_v27 = vpop.f32.mrb[60].mxu0  ;;  %4782 = vadd.xlane.f32.xlu0 %v4781_v46  ;;  %v8707_v53 = vadd.f32 %v8676_v17, %v4756_v29 }
0x318b   :  { %v4731_v2 = vpop.f32.mrb[61].mxu0  ;;  %v4759_v58 = vadd.f32 %v6608_v27, %v9312_v8 }
0x318c   :  { %v4758_v51 = vadd.f32 %v4731_v2, %v7945_v37  ;;  %v4796_v56 = vsel %vm112_vm0, %v8707_v53, 0.0  ;;  %v8724_v37 = vadd.f32 %v8676_v17, %v4757_v0 }
0x318d   :  { %v8732_v43 = vadd.f32 %v8676_v17, %v4759_v58 }
0x318e   :  { %4785 = vadd.xlane.f32.xlu0 %v4784_v61  ;;  %v8719_v6 = vadd.f32 %v8676_v17, %v4758_v51  ;;  %v4799_v26 = vsel %vm112_vm0, %v8724_v37, 0.0 }
0x318f   :  { %v4805_v38 = vsel %vm112_vm0, %v8732_v43, 0.0 }
0x3190   :  { %4779 = vadd.xlane.f32.xlu1 %v4778_v32  ;;  %v4802_v50 = vsel %vm112_vm0, %v8719_v6, 0.0 }
0x3192   :  { %4791 = vadd.xlane.f32.xlu0 %v4790_v33 }
0x3194   :  { %4788 = vadd.xlane.f32.xlu1 %v4787_v13 }
0x3196   :  { %4797 = vadd.xlane.f32.xlu0 %v4796_v56 }
0x3198   :  { %4794 = vadd.xlane.f32.xlu1 %v4793_v54 }
0x319a   :  { %4803 = vadd.xlane.f32.xlu0 %v4802_v50 }
0x319c   :  { %4800 = vadd.xlane.f32.xlu1 %v4799_v26 }
0x31a0   :  { %4806 = vadd.xlane.f32.xlu1 %v4805_v38 }
0x31dd   :  { %v4584_v47 = vpop.permute.xlu0 %4583 }
0x31de   :  { %v4582_v40 = vpop.permute.xlu1 %4581  ;;  %v4588_v20 = vsel %vm194_vm2, %v8578_v39, %v4584_v47 }
0x31df   :  { %v4587_v45 = vsel %vm194_vm2, %v8580_v36, %v4582_v40  ;;  %vm5480_vm2 = vcmask 785408  }
0x31e0   :  { %6609 = vmatprep.mubr.msk.f32.mxu0 %vm112_vm0, %v4587_v45 }
0x31e1   :  { %6610 = vmatmul.mubr.msk.f32.gmra.mrb[62].mxu0 %vm112_vm0, %v4588_v20 }
0x3217   :  { %v4783_v30 = vpop.xlane.xlu0 %4782 }
0x3218   :  { %v4815_v23 = vmul.f32 0.015625, %v4783_v30 }
0x321a   :  { %v8745_v57 = vsub.f32 %v8680_v48, %v4815_v23 }
0x321b   :  { %v4786_v12 = vpop.xlane.xlu0 %4785 }
0x321c   :  { %v4816_v7 = vmul.f32 0.015625, %v4786_v12  ;;  %v4839_v42 = vmul.f32 %v8745_v57, %v8745_v57 }
0x321d   :  { %v4780_v19 = vpop.xlane.xlu1 %4779 }
0x321e   :  { %v4814_v41 = vmul.f32 0.015625, %v4780_v19  ;;  %v8766_v52 = vsub.f32 %v8685_v1, %v4816_v7  ;;  %v4853_v29 = vsel %vm112_vm0, %v4839_v42, 0.0  ;;  %v1710_v42 = vld [vmem:[%s9269_s9 + $0x48] sm:$0xff] }
0x321f   :  { %v4792_v55 = vpop.xlane.xlu0 %4791 }
0x3220   :  { %v8749_v16 = vsub.f32 %v8691_v9, %v4814_v41  ;;  %v4818_v46 = vmul.f32 0.015625, %v4792_v55  ;;  %v4840_v44 = vmul.f32 %v8766_v52, %v8766_v52 }
0x3221   :  { %v4789_v35 = vpop.xlane.xlu1 %4788 }
0x3222   :  { %v4817_v36 = vmul.f32 0.015625, %v4789_v35  ;;  %v4838_v27 = vmul.f32 %v8749_v16, %v8749_v16  ;;  %v8779_v21 = vsub.f32 %v8695_v63, %v4818_v46  ;;  %v4856_v26 = vsel %vm112_vm0, %v4840_v44, 0.0  ;;  %v1712_v46 = vld [vmem:[%s9269_s9 + $0x58] sm:$0xff]  ;;  %v1715_v44 = vld [vmem:[%s9269_s9 + $0x70] sm:$0xff] }
0x3223   :  { %v4798_v10 = vpop.xlane.xlu0 %4797 }
0x3224   :  { %v8759_v25 = vsub.f32 %v8701_v24, %v4817_v36  ;;  %v4820_v32 = vmul.f32 0.015625, %v4798_v10  ;;  %v4850_v33 = vsel %vm112_vm0, %v4838_v27, 0.0  ;;  %v4842_v38 = vmul.f32 %v8779_v21, %v8779_v21  ;;  %v1704_v36 = vld [vmem:[%s9269_s9 + $0x18] sm:$0xff]  ;;  %v1705_v10 = vld [vmem:[%s9269_s9 + $0x20] sm:$0xff] }
0x3225   :  { %v4795_v34 = vpop.xlane.xlu1 %4794  ;;  %v1709_v27 = vld [vmem:[%s9269_s9 + $0x40] sm:$0xff] }
0x3226   :  { %v4819_v14 = vmul.f32 0.015625, %v4795_v34  ;;  %v4841_v61 = vmul.f32 %v8759_v25, %v8759_v25  ;;  %v8791_v54 = vsub.f32 %v8707_v53, %v4820_v32  ;;  %v4862_v19 = vsel %vm112_vm0, %v4842_v38, 0.0  ;;  %v1716_v32 = vld [vmem:[%s9269_s9 + $0x78] sm:$0xff] }
0x3227   :  { %v4804_v0 = vpop.xlane.xlu0 %4803 }
0x3228   :  { %v8773_v22 = vsub.f32 %v8713_v59, %v4819_v14  ;;  %v4859_v8 = vsel %vm112_vm0, %v4841_v61, 0.0  ;;  %v4822_v50 = vmul.f32 0.015625, %v4804_v0  ;;  %v4844_v30 = vmul.f32 %v8791_v54, %v8791_v54  ;;  %v1707_v14 = vld [vmem:[%s9269_s9 + $0x30] sm:$0xff]  ;;  %v1714_v61 = vld [vmem:[%s9269_s9 + $0x68] sm:$0xff] }
0x3229   :  { %v4801_v31 = vpop.xlane.xlu1 %4800 }
0x322a   :  { %v4821_v2 = vmul.f32 0.015625, %v4801_v31  ;;  %v4843_v58 = vmul.f32 %v8773_v22, %v8773_v22  ;;  %v8803_v20 = vsub.f32 %v8719_v6, %v4822_v50  ;;  %v4868_v23 = vsel %vm112_vm0, %v4844_v30, 0.0 }
0x322c   :  { %v8785_v13 = vsub.f32 %v8724_v37, %v4821_v2  ;;  %v4865_v40 = vsel %vm112_vm0, %v4843_v58, 0.0  ;;  %v4846_v41 = vmul.f32 %v8803_v20, %v8803_v20  ;;  %v1711_v2 = vld [vmem:[%s9269_s9 + $0x50] sm:$0xff] }
0x322d   :  { %v4807_v51 = vpop.xlane.xlu1 %4806 }
0x322e   :  { %v4823_v56 = vmul.f32 0.015625, %v4807_v51  ;;  %v4845_v45 = vmul.f32 %v8785_v13, %v8785_v13  ;;  %v4874_v55 = vsel %vm112_vm0, %v4846_v41, 0.0  ;;  %v6930_v51 = vpack.c.bf16 %v1716_v32, %v1714_v61  ;;  %v9317_v32 = vld [vmem:[#allocation10_spill] sm:$0xff] }
0x3230   :  { %v8797_v47 = vsub.f32 %v8732_v43, %v4823_v56  ;;  %v4871_v35 = vsel %vm112_vm0, %v4845_v45, 0.0  ;;  %v9315_v56 = vmov 0.0|0.0  }
0x3232   :  { %v4847_v12 = vmul.f32 %v8797_v47, %v8797_v47 }
0x3234   :  { %v4877_v34 = vsel %vm112_vm0, %v4847_v12, 0.0 }
0x32b4   :  { %v6611_v11 = vpop.f32.mrb[62].mxu0 }
0x32b5   :  { %v4761_v18 = vadd.f32 %v6611_v11, %v9313_v4  ;;  %v4741_v39 = vpop.f32.mrb[63].mxu0  ;;  %v1702_v11 = vld [vmem:[%s9269_s9 + $0x8] sm:$0xff] }
0x32b6   :  { %v4760_v5 = vadd.f32 %v4741_v39, %v9314_v60  ;;  %v6918_v4 = vpack.c.bf16 %v1704_v36, %v1702_v11  ;;  %v1703_v39 = vld [vmem:[%s9269_s9 + $0x10] sm:$0xff]  ;;  %v1706_v60 = vld [vmem:[%s9269_s9 + $0x28] sm:$0xff] }
0x32b7   :  { %v8753_v3 = vadd.f32 %v8676_v17, %v4761_v18  ;;  %v1701_v18 = vld [vmem:[%s9269_s9] sm:$0xff] }
0x32b8   :  { %v8756_v49 = vadd.f32 %v8676_v17, %v4760_v5  ;;  %v6920_v7 = vpack.c.bf16 %v1703_v39, %v1701_v18  ;;  %6919 = vmatprep.subr.bf16.mxu1 %v6918_v4  ;;  %v1708_v5 = vld [vmem:[%s9269_s9 + $0x38] sm:$0xff] }
0x32b9   :  { %v4811_v62 = vsel %vm112_vm0, %v8753_v3, 0.0  ;;  %v6922_v31 = vpack.c.bf16 %v1708_v5, %v1706_v60 }
0x32ba   :  { %4812 = vadd.xlane.f32.xlu1 %v4811_v62  ;;  %v4808_v17 = vsel %vm112_vm0, %v8756_v49, 0.0  ;;  %6921 = vmatpush1.bf16.msra.mxu1 %v6920_v7  ;;  %v6924_v62 = vpack.c.bf16 %v1707_v14, %v1705_v10 }
0x32bb   :  { %4809 = vadd.xlane.f32.xlu0 %v4808_v17  ;;  %6923 = vmatprep.subr.bf16.mxu1 %v6922_v31  ;;  %v6926_v17 = vpack.c.bf16 %v1712_v46, %v1710_v42 }
0x32be   :  { %4854 = vadd.xlane.f32.xlu1 %v4853_v29  ;;  %6925 = vmatpush1.bf16.msra.mxu1 %v6924_v62  ;;  %v6928_v29 = vpack.c.bf16 %v1711_v2, %v1709_v27 }
0x32bf   :  { %4851 = vadd.xlane.f32.xlu0 %v4850_v33  ;;  %6927 = vmatprep.subr.bf16.mxu1 %v6926_v17  ;;  %v1713_v33 = vld [vmem:[%s9269_s9 + $0x60] sm:$0xff] }
0x32c0   :  { %v6932_v0 = vpack.c.bf16 %v1715_v44, %v1713_v33  ;;  %v9316_v17 = vld [vmem:[#allocation9_spill] sm:$0xff] }
0x32c1   :  { %v8879_v27 = vrot.slane %v8672_v15, %v9316_v17 }
0x32c2   :  { %4860 = vadd.xlane.f32.xlu1 %v4859_v8  ;;  %6929 = vmatpush1.bf16.msra.mxu1 %v6928_v29 }
0x32c3   :  { %4857 = vadd.xlane.f32.xlu0 %v4856_v26  ;;  %6931 = vmatprep.subr.bf16.mxu1 %v6930_v51  ;;  %v8883_v51 = vrot.slane %v8672_v15, %v9317_v32 }
0x32c6   :  { %4866 = vadd.xlane.f32.xlu1 %v4865_v40  ;;  %6933 = vmatpush1.bf16.msra.mxu1 %v6932_v0 }
0x32c7   :  { %4863 = vadd.xlane.f32.xlu0 %v4862_v19  ;;  %6966 = vmatprep.subr.bf16.mxu1 %v9315_v56 }
0x32ca   :  { %4872 = vadd.xlane.f32.xlu1 %v4871_v35 }
0x32cb   :  { %4869 = vadd.xlane.f32.xlu0 %v4868_v23 }
0x32ce   :  { %4878 = vadd.xlane.f32.xlu1 %v4877_v34 }
0x32cf   :  { %4875 = vadd.xlane.f32.xlu0 %v4874_v55 }
0x3347   :  { %v4813_v8 = vpop.xlane.xlu1 %4812 }
0x3348   :  { %v4825_v58 = vmul.f32 0.015625, %v4813_v8  ;;  %v4810_v50 = vpop.xlane.xlu0 %4809 }
0x3349   :  { %v4824_v26 = vmul.f32 0.015625, %v4810_v50 }
0x334a   :  { %v8866_v38 = vsub.f32 %v8753_v3, %v4825_v58 }
0x334b   :  { %v8869_v40 = vsub.f32 %v8756_v49, %v4824_v26  ;;  %v4855_v45 = vpop.xlane.xlu1 %4854 }
0x334c   :  { %v4887_v19 = vmul.f32 0.015625, %v4855_v45  ;;  %v4852_v30 = vpop.xlane.xlu0 %4851  ;;  %v4849_v35 = vmul.f32 %v8866_v38, %v8866_v38 }
0x334d   :  { %v4886_v12 = vmul.f32 0.015625, %v4852_v30  ;;  %v4848_v23 = vmul.f32 %v8869_v40, %v8869_v40 }
0x334e   :  { %v4899_v41 = vadd.f32 1e-05, %v4887_v19  ;;  %v4883_v34 = vsel %vm112_vm0, %v4849_v35, 0.0 }
0x334f   :  { %v4898_v55 = vadd.f32 1e-05, %v4886_v12  ;;  %4884 = vadd.xlane.f32.xlu1 %v4883_v34  ;;  %v4861_v11 = vpop.xlane.xlu1 %4860  ;;  %v4880_v36 = vsel %vm112_vm0, %v4848_v23, 0.0 }
0x3350   :  { %7260 = vrsqrt.f32 %v4899_v41  ;;  %v4889_v4 = vmul.f32 0.015625, %v4861_v11  ;;  %4881 = vadd.xlane.f32.xlu0 %v4880_v36  ;;  %v4858_v18 = vpop.xlane.xlu0 %4857 }
0x3351   :  { %7262 = vrsqrt.f32 %v4898_v55  ;;  %v4888_v39 = vmul.f32 0.015625, %v4858_v18 }
0x3352   :  { %v4901_v7 = vadd.f32 1e-05, %v4889_v4 }
0x3353   :  { %v4900_v60 = vadd.f32 1e-05, %v4888_v39  ;;  %v4867_v5 = vpop.xlane.xlu1 %4866 }
0x3354   :  { %v4864_v31 = vpop.xlane.xlu0 %4863  ;;  %v4891_v14 = vmul.f32 0.015625, %v4867_v5 }
0x3355   :  { %7264 = vrsqrt.f32 %v4900_v60  ;;  %v4890_v10 = vmul.f32 0.015625, %v4864_v31 }
0x3356   :  { %7266 = vrsqrt.f32 %v4901_v7  ;;  %v4903_v29 = vadd.f32 1e-05, %v4891_v14 }
0x3357   :  { %v4902_v62 = vadd.f32 1e-05, %v4890_v10  ;;  %v4873_v44 = vpop.xlane.xlu1 %4872 }
0x3358   :  { %v4870_v42 = vpop.xlane.xlu0 %4869  ;;  %v4893_v50 = vmul.f32 0.015625, %v4873_v44 }
0x3359   :  { %7268 = vrsqrt.f32 %v4902_v62  ;;  %v4892_v61 = vmul.f32 0.015625, %v4870_v42 }
0x335a   :  { %v7261_v46 = vpop.eup %7260  ;;  %7270 = vrsqrt.f32 %v4903_v29 }
0x335b   :  { %v7263_v2 = vpop.eup %7262  ;;  %v4923_v0 = vmul.f32 %v7261_v46, %v8745_v57  ;;  %v4904_v26 = vadd.f32 1e-05, %v4892_v61  ;;  %v4879_v57 = vpop.xlane.xlu1 %4878 }
0x335c   :  { %v4922_v33 = vmul.f32 %v7263_v2, %v8749_v16  ;;  %v4876_v45 = vpop.xlane.xlu0 %4875  ;;  %v4905_v16 = vadd.f32 1e-05, %v4893_v50 }
0x335d   :  { %v4939_v30 = vmul.f32 %v8879_v27, %v4923_v0  ;;  %7272 = vrsqrt.f32 %v4904_v26  ;;  %v4894_v23 = vmul.f32 0.015625, %v4876_v45  ;;  %v1725_v26 = vld [vmem:[%s9270_s10 + $0x40] sm:$0xff]  ;;  %v1726_v45 = vld [vmem:[%s9270_s10 + $0x48] sm:$0xff] }
0x335e   :  { %v4938_v8 = vmul.f32 %v8879_v27, %v4922_v33  ;;  %7274 = vrsqrt.f32 %v4905_v16  ;;  %v1727_v16 = vld [vmem:[%s9270_s10 + $0x50] sm:$0xff] }
0x335f   :  { %v7265_v58 = vpop.eup %7264  ;;  %v4955_v41 = vadd.f32 %v8883_v51, %v4939_v30  ;;  %v4906_v36 = vadd.f32 1e-05, %v4894_v23  ;;  %v1743_v30 = vld [vmem:[%s9270_s10 + $0xd0] sm:$0xff]  ;;  %v1728_v23 = vld [vmem:[%s9270_s10 + $0x58] sm:$0xff] }
0x3360   :  { %v4954_v19 = vadd.f32 %v8883_v51, %v4938_v8  ;;  %v4924_v35 = vmul.f32 %v7265_v58, %v8766_v52  ;;  %v7267_v12 = vpop.eup %7266  ;;  %v4895_v52 = vmul.f32 0.015625, %v4879_v57  ;;  %v1742_v58 = vld [vmem:[%s9270_s10 + $0xc8] sm:$0xff]  ;;  %v6940_v57 = vpack.c.bf16 %v1728_v23, %v1727_v16 }
0x3361   :  { %v4925_v55 = vmul.f32 %v7267_v12, %v8759_v25  ;;  %7276 = vrsqrt.f32 %v4906_v36 }
0x3362   :  { %5968 = vmatmul.mubr.msk.f32.vlgmr.msra.gmra.mrb[54].mxu1 %vm112_vm0, %v4954_v19  ;;  %v4940_v34 = vmul.f32 %v8879_v27, %v4924_v35  ;;  %v4907_v60 = vadd.f32 1e-05, %v4895_v52  ;;  %v6936_v19 = vpack.c.bf16 %v1726_v45, %v1725_v26  ;;  %v1744_v35 = vld [vmem:[%s9270_s10 + $0xd8] sm:$0xff]  ;;  %v1730_v52 = vld [vmem:[%s9270_s10 + $0x68] sm:$0xff] }
0x3363   :  { %5080 = vmatprep.mubr.f32.mxu1 %v9309_v28  ;;  %v7269_v11 = vpop.eup %7268  ;;  %v4941_v18 = vmul.f32 %v8879_v27, %v4925_v55  ;;  %v6938_v12 = vpack.c.bf16 %v1744_v35, %v1743_v30 }
0x3364   :  { %v4956_v4 = vadd.f32 %v8883_v51, %v4940_v34  ;;  %v4926_v39 = vmul.f32 %v7269_v11, %v8779_v21  ;;  %v7271_v7 = vpop.eup %7270  ;;  %7278 = vrsqrt.f32 %v4907_v60  ;;  %v1746_v34 = vld [vmem:[%s9270_s10 + $0xe8] sm:$0xff]  ;;  %v1729_v11 = vld [vmem:[%s9270_s10 + $0x60] sm:$0xff]  ;;  %v1732_v60 = vld [vmem:[%s9270_s10 + $0x78] sm:$0xff] }
0x3365   :  { %v4957_v25 = vadd.f32 %v8883_v51, %v4941_v18  ;;  %v4927_v31 = vmul.f32 %v7271_v7, %v8773_v22  ;;  %v6944_v36 = vpack.c.bf16 %v1730_v52, %v1729_v11  ;;  %v1748_v18 = vld [vmem:[%s9270_s10 + $0xf8] sm:$0xff]  ;;  %v1731_v7 = vld [vmem:[%s9270_s10 + $0x70] sm:$0xff] }
0x3366   :  { %5969 = vmatmul.mubr.msk.f32.gmra.mrb[56].mxu1 %vm112_vm0, %v4955_v41  ;;  %v4942_v5 = vmul.f32 %v8879_v27, %v4926_v39  ;;  %v1745_v41 = vld [vmem:[%s9270_s10 + $0xe0] sm:$0xff] }
0x3367   :  { %5086 = vmatprep.mubr.f32.mxu1 %v9309_v28  ;;  %v7273_v10 = vpop.eup %7272  ;;  %v4943_v14 = vmul.f32 %v8879_v27, %v4927_v31  ;;  %v6942_v55 = vpack.c.bf16 %v1746_v34, %v1745_v41  ;;  %v1750_v31 = vld [vmem:[%s9270_s10 + $0x108] sm:$0xff] }
0x3368   :  { %v4958_v21 = vadd.f32 %v8883_v51, %v4942_v5  ;;  %v4928_v62 = vmul.f32 %v7273_v10, %v8791_v54  ;;  %v7275_v42 = vpop.eup %7274  ;;  %v1749_v5 = vld [vmem:[%s9270_s10 + $0x100] sm:$0xff] }
0x3369   :  { %v4959_v46 = vadd.f32 %v8883_v51, %v4943_v14  ;;  %v4929_v17 = vmul.f32 %v7275_v42, %v8785_v13  ;;  %v6950_v10 = vpack.c.bf16 %v1750_v31, %v1749_v5  ;;  %v1734_v14 = vld [vmem:[%s9270_s10 + $0x88] sm:$0xff]  ;;  %v1751_v42 = vld [vmem:[%s9270_s10 + $0x110] sm:$0xff] }
0x336a   :  { %5970 = vmatmul.mubr.msk.f32.gmra.mrb[58].mxu1 %vm112_vm0, %v4956_v4  ;;  %v4944_v22 = vmul.f32 %v8879_v27, %v4928_v62  ;;  %v1747_v4 = vld [vmem:[%s9270_s10 + $0xf0] sm:$0xff] }
0x336b   :  { %5092 = vmatprep.mubr.f32.mxu1 %v9309_v28  ;;  %v7277_v2 = vpop.eup %7276  ;;  %v4945_v54 = vmul.f32 %v8879_v27, %v4929_v17  ;;  %v6946_v39 = vpack.c.bf16 %v1748_v18, %v1747_v4  ;;  %v1735_v17 = vld [vmem:[%s9270_s10 + $0x90] sm:$0xff] }
0x336c   :  { %v4960_v29 = vadd.f32 %v8883_v51, %v4944_v22  ;;  %v4930_v61 = vmul.f32 %v7277_v2, %v8803_v20  ;;  %v1736_v2 = vld [vmem:[%s9270_s10 + $0x98] sm:$0xff] }
0x336d   :  { %v4961_v33 = vadd.f32 %v8883_v51, %v4945_v54  ;;  %v1753_v54 = vld [vmem:[%s9270_s10 + $0x120] sm:$0xff] }
0x336e   :  { %5971 = vmatmul.mubr.msk.f32.gmra.mrb[60].mxu1 %vm112_vm0, %v4957_v25  ;;  %v7279_v32 = vpop.eup %7278  ;;  %v4946_v13 = vmul.f32 %v8879_v27, %v4930_v61  ;;  %v6948_v25 = vpack.c.bf16 %v1732_v60, %v1731_v7  ;;  %v1754_v61 = vld [vmem:[%s9270_s10 + $0x128] sm:$0xff] }
0x336f   :  { %5098 = vmatprep.mubr.f32.mxu1 %v9309_v28  ;;  %v4931_v44 = vmul.f32 %v7279_v32, %v8797_v47  ;;  %v1741_v47 = vld [vmem:[%s9270_s10 + $0xc0] sm:$0xff]  ;;  %v6958_v32 = vpack.c.bf16 %v1754_v61, %v1753_v54 }
0x3370   :  { %v4962_v0 = vadd.f32 %v8883_v51, %v4946_v13  ;;  %v6934_v50 = vpack.c.bf16 %v1742_v58, %v1741_v47  ;;  %v1738_v13 = vld [vmem:[%s9270_s10 + $0xa8] sm:$0xff]  ;;  %v1739_v47 = vld [vmem:[%s9270_s10 + $0xb0] sm:$0xff]  ;;  %v1740_v58 = vld [vmem:[%s9270_s10 + $0xb8] sm:$0xff] }
0x3371   :  { %v4947_v8 = vmul.f32 %v8879_v27, %v4931_v44 }
0x3372   :  { %5972 = vmatmul.mubr.msk.f32.gmra.mrb[62].mxu1 %vm112_vm0, %v4958_v21  ;;  %6935 = vmatprep.subr.bf16.mxu0 %v6934_v50  ;;  %v1733_v21 = vld [vmem:[%s9270_s10 + $0x80] sm:$0xff]  ;;  %v6964_v50 = vpack.c.bf16 %v1740_v58, %v1739_v47 }
0x3373   :  { %5104 = vmatprep.mubr.f32.mxu1 %v9309_v28  ;;  %v4963_v20 = vadd.f32 %v8883_v51, %v4947_v8  ;;  %6937 = vmatpush3.bf16.msra.mxu0 %v6936_v19  ;;  %v6952_v62 = vpack.c.bf16 %v1734_v14, %v1733_v21  ;;  %v1756_v8 = vld [vmem:[%s9270_s10 + $0x138] sm:$0xff] }
0x3374   :  { %6939 = vmatprep.subr.bf16.mxu0 %v6938_v12 }
0x3376   :  { %5973 = vmatmul.mubr.msk.f32.gmra.mrb[64].mxu1 %vm112_vm0, %v4959_v46  ;;  %v1752_v46 = vld [vmem:[%s9270_s10 + $0x118] sm:$0xff] }
0x3377   :  { %5110 = vmatprep.mubr.f32.mxu1 %v9309_v28  ;;  %6941 = vmatpush3.bf16.msra.mxu0 %v6940_v57  ;;  %v6954_v22 = vpack.c.bf16 %v1752_v46, %v1751_v42 }
0x3378   :  { %6943 = vmatprep.subr.bf16.mxu0 %v6942_v55 }
0x337a   :  { %5974 = vmatmul.mubr.msk.f32.gmra.mrb[66].mxu1 %vm112_vm0, %v4960_v29  ;;  %v6956_v29 = vpack.c.bf16 %v1736_v2, %v1735_v17 }
0x337b   :  { %5116 = vmatprep.mubr.f32.mxu1 %v9309_v28  ;;  %6945 = vmatpush3.bf16.msra.mxu0 %v6944_v36  ;;  %v7387_v36 = vld [vmem:[%s9267_s7 + $0x8] sm:$0xff] }
0x337c   :  { %6947 = vmatprep.subr.bf16.mxu0 %v6946_v39 }
0x337e   :  { %5975 = vmatmul.mubr.msk.f32.gmra.mrb[68].mxu1 %vm112_vm0, %v4961_v33  ;;  %v1737_v33 = vld [vmem:[%s9270_s10 + $0xa0] sm:$0xff] }
0x337f   :  { %5122 = vmatprep.mubr.f32.mxu1 %v9309_v28  ;;  %6949 = vmatpush3.bf16.msra.mxu0 %v6948_v25  ;;  %v6960_v44 = vpack.c.bf16 %v1738_v13, %v1737_v33 }
0x3380   :  { %6951 = vmatprep.subr.bf16.mxu0 %v6950_v10 }
0x3382   :  { %5976 = vmatmul.mubr.msk.f32.gmra.mrb[70].mxu1 %vm112_vm0, %v4962_v0  ;;  %v1755_v0 = vld [vmem:[%s9270_s10 + $0x130] sm:$0xff] }
0x3383   :  { %5128 = vmatprep.mubr.f32.mxu1 %v9309_v28  ;;  %6953 = vmatpush3.bf16.msra.mxu0 %v6952_v62 }
0x3384   :  { %6955 = vmatprep.subr.bf16.mxu0 %v6954_v22 }
0x3386   :  { %5977 = vmatmul.mubr.msk.f32.gmra.mrb[72].mxu1 %vm112_vm0, %v4963_v20  ;;  %v6962_v20 = vpack.c.bf16 %v1756_v8, %v1755_v0 }
0x3387   :  { %5134 = vmatprep.mubr.f32.mxu1 %v9309_v28  ;;  %6957 = vmatpush3.bf16.msra.mxu0 %v6956_v29 }
0x3388   :  { %6959 = vmatprep.subr.bf16.mxu0 %v6958_v32 }
0x338b   :  { %6961 = vmatpush3.bf16.msra.mxu0 %v6960_v44 }
0x338c   :  { %6963 = vmatprep.subr.bf16.mxu0 %v6962_v20 }
0x338f   :  { %6965 = vmatpush3.bf16.msra.mxu0 %v6964_v50 }
0x33dc   :  { %v4885_v26 = vpop.xlane.xlu1 %4884 }
0x33dd   :  { %v4897_v45 = vmul.f32 0.015625, %v4885_v26  ;;  %v4882_v19 = vpop.xlane.xlu0 %4881 }
0x33de   :  { %v4896_v30 = vmul.f32 0.015625, %v4882_v19 }
0x33df   :  { %v4909_v35 = vadd.f32 1e-05, %v4897_v45 }
0x33e0   :  { %v4908_v12 = vadd.f32 1e-05, %v4896_v30 }
0x33e1   :  { %7280 = vrsqrt.f32 %v4909_v35 }
0x33e2   :  { %7282 = vrsqrt.f32 %v4908_v12 }
0x33eb   :  { %v7281_v16 = vpop.eup %7280 }
0x33ec   :  { %v7283_v23 = vpop.eup %7282  ;;  %v4933_v41 = vmul.f32 %v7281_v16, %v8866_v38 }
0x33ed   :  { %v4932_v57 = vmul.f32 %v7283_v23, %v8869_v40  ;;  %v9318_v40 = vld [vmem:[#allocation11_spill] sm:$0xff] }
0x33ee   :  { %v4949_v11 = vmul.f32 %v8879_v27, %v4933_v41  ;;  %v9044_v38 = vrot.slane %v8672_v15, %v9318_v40 }
0x33ef   :  { %v4948_v34 = vmul.f32 %v8879_v27, %v4932_v57  ;;  %v9050_v27 = vrot.slane %v7387_v36, %v9318_v40 }
0x33f0   :  { %v4965_v52 = vadd.f32 %v8883_v51, %v4949_v11 }
0x33f1   :  { %v4964_v55 = vadd.f32 %v8883_v51, %v4948_v34 }
0x33f3   :  { %5978 = vmatmul.mubr.msk.f32.gmra.mrb[74].mxu1 %vm112_vm0, %v4964_v55 }
0x33f4   :  { %5140 = vmatprep.mubr.f32.mxu1 %v9309_v28 }
0x33f7   :  { %5979 = vmatmul.mubr.msk.f32.gmra.mrb[76].mxu1 %vm112_vm0, %v4965_v52 }
0x33f8   :  { %6636 = vmatprep.mubr.msk.f32.mxu1 %vm7415_vm4, %v9309_v28 }
0x3435   :  { %v5076_v4 = vpop.f32.mrb[54].mxu1 }
0x3436   :  { %v9053_v18 = vadd.f32 %v5076_v4, %v9044_v38  ;;  %v5078_v51 = vpop.f32.mrb[55].mxu1 }
0x3437   :  { %v9056_v39 = vadd.f32 %v5078_v51, %v9050_v27 }
0x3438   :  { %v5980_v7 = vmul.f32 -1.702, %v9053_v18 }
0x3439   :  { %v5981_v15 = vmul.f32 -1.702, %v9056_v39  ;;  %v5082_v60 = vpop.f32.mrb[56].mxu1 }
0x343a   :  { %v5195_v25 = vmul.f32 1.442695, %v5980_v7  ;;  %v9061_v5 = vadd.f32 %v5082_v60, %v9044_v38  ;;  %v5084_v31 = vpop.f32.mrb[57].mxu1 }
0x343b   :  { %v5197_v10 = vmul.f32 1.442695, %v5981_v15  ;;  %v9064_v21 = vadd.f32 %v5084_v31, %v9050_v27 }
0x343c   :  { %7284 = vpow2.f32 %v5195_v25  ;;  %v5982_v14 = vmul.f32 -1.702, %v9061_v5 }
0x343d   :  { %7286 = vpow2.f32 %v5197_v10  ;;  %v5983_v62 = vmul.f32 -1.702, %v9064_v21  ;;  %v5088_v42 = vpop.f32.mrb[58].mxu1 }
0x343e   :  { %v5199_v46 = vmul.f32 1.442695, %v5982_v14  ;;  %v9069_v22 = vadd.f32 %v5088_v42, %v9044_v38  ;;  %v5090_v17 = vpop.f32.mrb[59].mxu1 }
0x343f   :  { %v5201_v2 = vmul.f32 1.442695, %v5983_v62  ;;  %v9072_v29 = vadd.f32 %v5090_v17, %v9050_v27 }
0x3440   :  { %7288 = vpow2.f32 %v5199_v46  ;;  %v5984_v54 = vmul.f32 -1.702, %v9069_v22 }
0x3441   :  { %7290 = vpow2.f32 %v5201_v2  ;;  %v5985_v61 = vmul.f32 -1.702, %v9072_v29  ;;  %v5094_v32 = vpop.f32.mrb[60].mxu1 }
0x3442   :  { %v5203_v33 = vmul.f32 1.442695, %v5984_v54  ;;  %v9077_v13 = vadd.f32 %v5094_v32, %v9044_v38  ;;  %v5096_v44 = vpop.f32.mrb[61].mxu1 }
0x3443   :  { %v5205_v0 = vmul.f32 1.442695, %v5985_v61  ;;  %v9080_v8 = vadd.f32 %v5096_v44, %v9050_v27 }
0x3444   :  { %7292 = vpow2.f32 %v5203_v33  ;;  %v5986_v20 = vmul.f32 -1.702, %v9077_v13 }
0x3445   :  { %7294 = vpow2.f32 %v5205_v0  ;;  %v5987_v47 = vmul.f32 -1.702, %v9080_v8  ;;  %v5100_v58 = vpop.f32.mrb[62].mxu1 }
0x3446   :  { %v7285_v50 = vpop.eup %7284  ;;  %v5207_v26 = vmul.f32 1.442695, %v5986_v20  ;;  %v9085_v45 = vadd.f32 %v5100_v58, %v9044_v38  ;;  %v5102_v19 = vpop.f32.mrb[63].mxu1 }
0x3447   :  { %v7287_v30 = vpop.eup %7286  ;;  %v5243_v35 = vadd.f32 1.0, %v7285_v50  ;;  %v5209_v12 = vmul.f32 1.442695, %v5987_v47  ;;  %v9088_v16 = vadd.f32 %v5102_v19, %v9050_v27 }
0x3448   :  { %v5244_v23 = vadd.f32 1.0, %v7287_v30  ;;  %7296 = vpow2.f32 %v5207_v26  ;;  %v5988_v57 = vmul.f32 -1.702, %v9085_v45 }
0x3449   :  { %7298 = vrcp.f32 %v5243_v35  ;;  %v5989_v41 = vmul.f32 -1.702, %v9088_v16  ;;  %v5106_v34 = vpop.f32.mrb[64].mxu1 }
0x344a   :  { %v7289_v55 = vpop.eup %7288  ;;  %7300 = vrcp.f32 %v5244_v23  ;;  %v5211_v11 = vmul.f32 1.442695, %v5988_v57  ;;  %v9093_v52 = vadd.f32 %v5106_v34, %v9044_v38  ;;  %v5108_v40 = vpop.f32.mrb[65].mxu1 }
0x344b   :  { %v7291_v36 = vpop.eup %7290  ;;  %v5245_v4 = vadd.f32 1.0, %v7289_v55  ;;  %7302 = vpow2.f32 %v5209_v12  ;;  %v5213_v51 = vmul.f32 1.442695, %v5989_v41  ;;  %v9096_v7 = vadd.f32 %v5108_v40, %v9050_v27 }
0x344c   :  { %v5246_v15 = vadd.f32 1.0, %v7291_v36  ;;  %7304 = vpow2.f32 %v5211_v11  ;;  %v5990_v60 = vmul.f32 -1.702, %v9093_v52 }
0x344d   :  { %7306 = vrcp.f32 %v5245_v4  ;;  %v5991_v25 = vmul.f32 -1.702, %v9096_v7  ;;  %v5112_v31 = vpop.f32.mrb[66].mxu1 }
0x344e   :  { %v7293_v10 = vpop.eup %7292  ;;  %7308 = vrcp.f32 %v5246_v15  ;;  %v5215_v14 = vmul.f32 1.442695, %v5990_v60  ;;  %v9101_v62 = vadd.f32 %v5112_v31, %v9044_v38  ;;  %v5114_v42 = vpop.f32.mrb[67].mxu1 }
0x344f   :  { %v7295_v46 = vpop.eup %7294  ;;  %v5247_v17 = vadd.f32 1.0, %v7293_v10  ;;  %7310 = vpow2.f32 %v5213_v51  ;;  %v5217_v2 = vmul.f32 1.442695, %v5991_v25  ;;  %v9104_v54 = vadd.f32 %v5114_v42, %v9050_v27 }
0x3450   :  { %v5248_v61 = vadd.f32 1.0, %v7295_v46  ;;  %7312 = vpow2.f32 %v5215_v14  ;;  %v5992_v32 = vmul.f32 -1.702, %v9101_v62 }
0x3451   :  { %7314 = vrcp.f32 %v5247_v17  ;;  %v5993_v33 = vmul.f32 -1.702, %v9104_v54  ;;  %v5118_v44 = vpop.f32.mrb[68].mxu1 }
0x3452   :  { %v7297_v0 = vpop.eup %7296  ;;  %7316 = vrcp.f32 %v5248_v61  ;;  %v5219_v20 = vmul.f32 1.442695, %v5992_v32  ;;  %v9109_v47 = vadd.f32 %v5118_v44, %v9044_v38  ;;  %v5120_v58 = vpop.f32.mrb[69].mxu1 }
0x3453   :  { %v7299_v50 = vpop.eup %7298  ;;  %v5249_v26 = vadd.f32 1.0, %v7297_v0  ;;  %7318 = vpow2.f32 %v5217_v2  ;;  %v5221_v19 = vmul.f32 1.442695, %v5993_v33  ;;  %v9112_v30 = vadd.f32 %v5120_v58, %v9050_v27 }
0x3454   :  { %v7301_v35 = vpop.eup %7300  ;;  %7320 = vpow2.f32 %v5219_v20  ;;  %v5994_v12 = vmul.f32 -1.702, %v9109_v47  ;;  %v5315_v57 = vmul.f32 %v7299_v50, %v9053_v18 }
0x3455   :  { %v7303_v23 = vpop.eup %7302  ;;  %v5316_v41 = vmul.f32 %v7301_v35, %v9056_v39  ;;  %v5995_v34 = vmul.f32 -1.702, %v9112_v30  ;;  %v5124_v55 = vpop.f32.mrb[70].mxu1  ;;  %7322 = vpow2.f32 %v5221_v19 }
0x3456   :  { %v7305_v11 = vpop.eup %7304  ;;  %v5250_v40 = vadd.f32 1.0, %v7303_v23  ;;  %v5223_v36 = vmul.f32 1.442695, %v5994_v12  ;;  %v9119_v4 = vadd.f32 %v5124_v55, %v9044_v38  ;;  %v5126_v51 = vpop.f32.mrb[71].mxu1  ;;  %7324 = vrcp.f32 %v5249_v26 }
0x3457   :  { %v7307_v15 = vpop.eup %7306  ;;  %v5251_v60 = vadd.f32 1.0, %v7305_v11  ;;  %v5225_v25 = vmul.f32 1.442695, %v5995_v34  ;;  %v9122_v31 = vadd.f32 %v5126_v51, %v9050_v27  ;;  %5407 = vmatprep.mubr.f32.mxu0 %v5316_v41 }
0x3458   :  { %v7309_v18 = vpop.eup %7308  ;;  %7326 = vrcp.f32 %v5250_v40  ;;  %v5996_v39 = vmul.f32 -1.702, %v9119_v4  ;;  %5408 = vmatmul.mubr.f32.vlgmr.msra.gmra.mrb[64].mxu0 %v5315_v57  ;;  %v5317_v14 = vmul.f32 %v7307_v15, %v9061_v5 }
0x3459   :  { %v7311_v10 = vpop.eup %7310  ;;  %v5318_v42 = vmul.f32 %v7309_v18, %v9064_v21  ;;  %7328 = vrcp.f32 %v5251_v60  ;;  %v5997_v46 = vmul.f32 -1.702, %v9122_v31  ;;  %v5130_v17 = vpop.f32.mrb[72].mxu1 }
0x345a   :  { %v7313_v2 = vpop.eup %7312  ;;  %v5252_v61 = vadd.f32 1.0, %v7311_v10  ;;  %7330 = vpow2.f32 %v5223_v36  ;;  %v5227_v32 = vmul.f32 1.442695, %v5996_v39  ;;  %v9129_v33 = vadd.f32 %v5130_v17, %v9044_v38  ;;  %v5132_v44 = vpop.f32.mrb[73].mxu1 }
0x345b   :  { %v7315_v0 = vpop.eup %7314  ;;  %v5253_v20 = vadd.f32 1.0, %v7313_v2  ;;  %7332 = vpow2.f32 %v5225_v25  ;;  %v5229_v58 = vmul.f32 1.442695, %v5997_v46  ;;  %v9132_v5 = vadd.f32 %v5132_v44, %v9050_v27  ;;  %5412 = vmatprep.mubr.f32.mxu0 %v5318_v42 }
0x345c   :  { %v7317_v21 = vpop.eup %7316  ;;  %7334 = vrcp.f32 %v5252_v61  ;;  %v5998_v50 = vmul.f32 -1.702, %v9129_v33  ;;  %5413 = vmatmul.mubr.f32.gmra.mrb[66].mxu0 %v5317_v14  ;;  %v5319_v23 = vmul.f32 %v7315_v0, %v9069_v22 }
0x345d   :  { %v7319_v26 = vpop.eup %7318  ;;  %v5320_v19 = vmul.f32 %v7317_v21, %v9072_v29  ;;  %7336 = vrcp.f32 %v5253_v20  ;;  %v5999_v35 = vmul.f32 -1.702, %v9132_v5 }
0x345e   :  { %v7321_v12 = vpop.eup %7320  ;;  %v5254_v57 = vadd.f32 1.0, %v7319_v26  ;;  %7338 = vpow2.f32 %v5227_v32  ;;  %v5231_v41 = vmul.f32 1.442695, %v5998_v50 }
0x345f   :  { %v5255_v34 = vadd.f32 1.0, %v7321_v12  ;;  %7340 = vpow2.f32 %v5229_v58  ;;  %5417 = vmatprep.mubr.f32.mxu0 %v5320_v19  ;;  %v7323_v55 = vpop.eup %7322  ;;  %v5233_v11 = vmul.f32 1.442695, %v5999_v35 }
0x3460   :  { %7342 = vrcp.f32 %v5254_v57  ;;  %5418 = vmatmul.mubr.f32.gmra.mrb[68].mxu0 %v5319_v23  ;;  %v7325_v40 = vpop.eup %7324  ;;  %v5256_v36 = vadd.f32 1.0, %v7323_v55 }
0x3461   :  { %7344 = vrcp.f32 %v5255_v34  ;;  %v5321_v60 = vmul.f32 %v7325_v40, %v9077_v13 }
0x3462   :  { %v7327_v29 = vpop.eup %7326  ;;  %7346 = vpow2.f32 %v5231_v41 }
0x3463   :  { %v7329_v51 = vpop.eup %7328  ;;  %v5322_v15 = vmul.f32 %v7327_v29, %v9080_v8  ;;  %7348 = vrcp.f32 %v5256_v36 }
0x3464   :  { %v7331_v22 = vpop.eup %7330  ;;  %7350 = vpow2.f32 %v5233_v11  ;;  %v5323_v17 = vmul.f32 %v7329_v51, %v9085_v45 }
0x3465   :  { %v7333_v25 = vpop.eup %7332  ;;  %v5257_v18 = vadd.f32 1.0, %v7331_v22  ;;  %5422 = vmatprep.mubr.f32.mxu0 %v5322_v15 }
0x3466   :  { %v7335_v39 = vpop.eup %7334  ;;  %v5258_v10 = vadd.f32 1.0, %v7333_v25  ;;  %5423 = vmatmul.mubr.f32.gmra.mrb[70].mxu0 %v5321_v60 }
0x3467   :  { %v7337_v14 = vpop.eup %7336  ;;  %v5324_v42 = vmul.f32 %v7335_v39, %v9088_v16  ;;  %7352 = vrcp.f32 %v5257_v18 }
0x3468   :  { %v7339_v46 = vpop.eup %7338  ;;  %7354 = vrcp.f32 %v5258_v10  ;;  %v5325_v20 = vmul.f32 %v7337_v14, %v9093_v52 }
0x3469   :  { %v7341_v8 = vpop.eup %7340  ;;  %v5259_v2 = vadd.f32 1.0, %v7339_v46  ;;  %5427 = vmatprep.mubr.f32.mxu0 %v5324_v42 }
0x346a   :  { %v7343_v61 = vpop.eup %7342  ;;  %v5260_v13 = vadd.f32 1.0, %v7341_v8  ;;  %5428 = vmatmul.mubr.f32.gmra.mrb[72].mxu0 %v5323_v17 }
0x346b   :  { %v7345_v32 = vpop.eup %7344  ;;  %v5326_v44 = vmul.f32 %v7343_v61, %v9096_v7  ;;  %7356 = vrcp.f32 %v5259_v2 }
0x346c   :  { %v7347_v0 = vpop.eup %7346  ;;  %7358 = vrcp.f32 %v5260_v13  ;;  %v5327_v26 = vmul.f32 %v7345_v32, %v9101_v62 }
0x346d   :  { %v7349_v16 = vpop.eup %7348  ;;  %v5261_v58 = vadd.f32 1.0, %v7347_v0  ;;  %5432 = vmatprep.mubr.f32.mxu0 %v5326_v44 }
0x346e   :  { %v7351_v21 = vpop.eup %7350  ;;  %v5328_v45 = vmul.f32 %v7349_v16, %v9104_v54  ;;  %5433 = vmatmul.mubr.f32.gmra.mrb[74].mxu0 %v5325_v20 }
0x346f   :  { %v5262_v50 = vadd.f32 1.0, %v7351_v21  ;;  %7360 = vrcp.f32 %v5261_v58  ;;  %v7388_v21 = vld [vmem:[%s9267_s7] sm:$0xff] }
0x3470   :  { %5437 = vmatprep.mubr.f32.mxu0 %v5328_v45  ;;  %v9319_v45 = vld [vmem:[#allocation6_spill] sm:$0xff] }
0x3471   :  { %v7353_v19 = vpop.eup %7352  ;;  %7362 = vrcp.f32 %v5262_v50  ;;  %v9320_v50 = vsub.s32 7, %v9319_v45 }
0x3472   :  { %v7355_v7 = vpop.eup %7354  ;;  %5438 = vmatmul.mubr.f32.gmra.mrb[76].mxu0 %v5327_v26  ;;  %v5329_v52 = vmul.f32 %v7353_v19, %v9109_v47 }
0x3473   :  { %v5330_v35 = vmul.f32 %v7355_v7, %v9112_v30  ;;  %v9161_v26 = vrot.slane %v7388_v21, %v9320_v50 }
0x3475   :  { %v7357_v12 = vpop.eup %7356  ;;  %5442 = vmatprep.mubr.f32.mxu0 %v5330_v35 }
0x3476   :  { %v7359_v23 = vpop.eup %7358  ;;  %5443 = vmatmul.mubr.f32.gmra.mrb[78].mxu0 %v5329_v52  ;;  %v5331_v57 = vmul.f32 %v7357_v12, %v9119_v4 }
0x3477   :  { %v5332_v54 = vmul.f32 %v7359_v23, %v9122_v31 }
0x3479   :  { %5447 = vmatprep.mubr.f32.mxu0 %v5332_v54  ;;  %v7361_v62 = vpop.eup %7360 }
0x347a   :  { %5448 = vmatmul.mubr.f32.gmra.mrb[80].mxu0 %v5331_v57  ;;  %v5333_v55 = vmul.f32 %v7361_v62, %v9129_v33 }
0x347b   :  { %v7363_v41 = vpop.eup %7362 }
0x347c   :  { %v5334_v34 = vmul.f32 %v7363_v41, %v9132_v5 }
0x347e   :  { %5452 = vmatprep.mubr.f32.mxu0 %v5334_v34 }
0x347f   :  { %5453 = vmatmul.mubr.f32.gmra.mrb[82].mxu0 %v5333_v55 }
0x34c6   :  { %v5136_v30 = vpop.f32.mrb[74].mxu1 }
0x34c7   :  { %v5137_v47 = vadd.f32 %v5136_v30, %v9044_v38  ;;  %v5138_v11 = vpop.f32.mrb[75].mxu1 }
0x34c8   :  { %v5139_v40 = vadd.f32 %v5138_v11, %v9050_v27 }
0x34c9   :  { %v6000_v36 = vmul.f32 -1.702, %v5137_v47 }
0x34ca   :  { %v6001_v31 = vmul.f32 -1.702, %v5139_v40  ;;  %v5142_v29 = vpop.f32.mrb[76].mxu1 }
0x34cb   :  { %v5235_v4 = vmul.f32 1.442695, %v6000_v36  ;;  %v5143_v51 = vadd.f32 %v5142_v29, %v9044_v38  ;;  %v5144_v15 = vpop.f32.mrb[77].mxu1 }
0x34cc   :  { %v5237_v22 = vmul.f32 1.442695, %v6001_v31  ;;  %v5145_v5 = vadd.f32 %v5144_v15, %v9050_v27 }
0x34cd   :  { %7364 = vpow2.f32 %v5235_v4  ;;  %v6002_v33 = vmul.f32 -1.702, %v5143_v51 }
0x34ce   :  { %7366 = vpow2.f32 %v5237_v22  ;;  %v6003_v60 = vmul.f32 -1.702, %v5145_v5 }
0x34cf   :  { %v5239_v25 = vmul.f32 1.442695, %v6002_v33 }
0x34d0   :  { %v5241_v18 = vmul.f32 1.442695, %v6003_v60 }
0x34d1   :  { %7368 = vpow2.f32 %v5239_v25 }
0x34d2   :  { %7370 = vpow2.f32 %v5241_v18 }
0x34d7   :  { %v7365_v39 = vpop.eup %7364 }
0x34d8   :  { %v7367_v10 = vpop.eup %7366  ;;  %v5263_v14 = vadd.f32 1.0, %v7365_v39 }
0x34d9   :  { %v5264_v42 = vadd.f32 1.0, %v7367_v10 }
0x34da   :  { %7372 = vrcp.f32 %v5263_v14 }
0x34db   :  { %v7369_v46 = vpop.eup %7368  ;;  %7374 = vrcp.f32 %v5264_v42 }
0x34dc   :  { %v7371_v38 = vpop.eup %7370  ;;  %v5265_v17 = vadd.f32 1.0, %v7369_v46 }
0x34dd   :  { %v5266_v8 = vadd.f32 1.0, %v7371_v38 }
0x34de   :  { %7376 = vrcp.f32 %v5265_v17 }
0x34df   :  { %7378 = vrcp.f32 %v5266_v8 }
0x34e4   :  { %v7373_v27 = vpop.eup %7372 }
0x34e5   :  { %v7375_v2 = vpop.eup %7374  ;;  %v5335_v13 = vmul.f32 %v7373_v27, %v5137_v47 }
0x34e6   :  { %v5336_v61 = vmul.f32 %v7375_v2, %v5139_v40 }
0x34e8   :  { %v7377_v32 = vpop.eup %7376  ;;  %5457 = vmatprep.mubr.f32.mxu0 %v5336_v61 }
0x34e9   :  { %v7379_v44 = vpop.eup %7378  ;;  %5458 = vmatmul.mubr.f32.gmra.mrb[84].mxu0 %v5335_v13  ;;  %v5337_v20 = vmul.f32 %v7377_v32, %v5143_v51 }
0x34ea   :  { %v5338_v0 = vmul.f32 %v7379_v44, %v5145_v5 }
0x34ec   :  { %5462 = vmatprep.mubr.f32.mxu0 %v5338_v0 }
0x34ed   :  { %5463 = vmatmul.mubr.f32.gmra.mrb[86].mxu0 %v5337_v20 }
0x352b   :  { %v6219_v16 = vpop.f32.mrb[64].mxu0 }
0x352c   :  { %v6220_v58 = vpop.f32.mrb[65].mxu0 }
0x352d   :  { %v6221_v19 = vadd.f32 %v6220_v58, %v6219_v16 }
0x352f   :  { %v6222_v7 = vpop.f32.mrb[66].mxu0  ;;  %v5410_v52 = vadd.f32 %v6221_v19, %v9161_v26 }
0x3530   :  { %v6223_v35 = vpop.f32.mrb[67].mxu0 }
0x3531   :  { %v6224_v12 = vadd.f32 %v6223_v35, %v6222_v7  ;;  %v5468_v62 = vadd.f32 %v5410_v52, %v8691_v9 }
0x3533   :  { %v5415_v23 = vadd.f32 %v6224_v12, %v9161_v26  ;;  %v6225_v54 = vpop.f32.mrb[68].mxu0 }
0x3534   :  { %v6226_v57 = vpop.f32.mrb[69].mxu0 }
0x3535   :  { %v5469_v41 = vadd.f32 %v5415_v23, %v8680_v48  ;;  %v6227_v34 = vadd.f32 %v6226_v57, %v6225_v54 }
0x3537   :  { %v6967_v55 = vpack.c.bf16 %v5469_v41, %v5468_v62  ;;  %v5420_v11 = vadd.f32 %v6227_v34, %v9161_v26  ;;  %v5811_v62 = vld [vmem:[#allocation2] sm:$0x1] }
0x3538   :  { %v5812_v34 = vmul.f32 1.442695, %v5811_v62 }
0x3539   :  { %v6228_v30 = vpop.f32.mrb[70].mxu0  ;;  %6968 = vmatpush3.bf16.msra.mxu1 %v6967_v55  ;;  %v5470_v4 = vadd.f32 %v5420_v11, %v8685_v1  ;;  %v9321_v11 = vld [vmem:[#allocation7_spill] sm:$0xff] }
0x353a   :  { %v6229_v47 = vpop.f32.mrb[71].mxu0  ;;  %6969 = vmatprep.subr.bf16.mxu1 %v9315_v56  ;;  %7380 = vpow2.f32 %v5812_v34 }
0x353b   :  { %v6230_v40 = vadd.f32 %v6229_v47, %v6228_v30 }
0x353d   :  { %v5425_v36 = vadd.f32 %v6230_v40, %v9161_v26  ;;  %v6231_v31 = vpop.f32.mrb[72].mxu0 }
0x353e   :  { %v6232_v29 = vpop.f32.mrb[73].mxu0 }
0x353f   :  { %v5471_v9 = vadd.f32 %v5425_v36, %v8701_v24  ;;  %v6233_v51 = vadd.f32 %v6232_v29, %v6231_v31  ;;  %v1757_v36 = vld [vmem:[%s9270_s10 + $0x140] sm:$0xff]  ;;  %v1758_v31 = vld [vmem:[%s9270_s10 + $0x148] sm:$0xff] }
0x3540   :  { %v6985_v29 = vpack.c.bf16 %v1758_v31, %v1757_v36 }
0x3541   :  { %v6970_v48 = vpack.c.bf16 %v5471_v9, %v5470_v4  ;;  %v6234_v15 = vpop.f32.mrb[74].mxu0  ;;  %v5430_v5 = vadd.f32 %v6233_v51, %v9161_v26  ;;  %v1759_v4 = vld [vmem:[%s9270_s10 + $0x150] sm:$0xff]  ;;  %v1760_v9 = vld [vmem:[%s9270_s10 + $0x158] sm:$0xff] }
0x3542   :  { %v6235_v22 = vpop.f32.mrb[75].mxu0  ;;  %v6988_v51 = vpack.c.bf16 %v1760_v9, %v1759_v4 }
0x3543   :  { %v6236_v33 = vadd.f32 %v6235_v22, %v6234_v15  ;;  %6971 = vmatpush3.bf16.msra.mxu1 %v6970_v48  ;;  %v5472_v39 = vadd.f32 %v5430_v5, %v8695_v63  ;;  %v1761_v48 = vld [vmem:[%s9270_s10 + $0x160] sm:$0xff]  ;;  %v1762_v15 = vld [vmem:[%s9270_s10 + $0x168] sm:$0xff]  ;;  %v1763_v5 = vld [vmem:[%s9270_s10 + $0x170] sm:$0xff] }
0x3544   :  { %6972 = vmatprep.subr.bf16.mxu1 %v9315_v56  ;;  %v7381_v47 = vpop.eup %7380  ;;  %v6991_v22 = vpack.c.bf16 %v1762_v15, %v1761_v48 }
0x3545   :  { %v5435_v60 = vadd.f32 %v6236_v33, %v9161_v26  ;;  %v6237_v25 = vpop.f32.mrb[76].mxu0  ;;  %v5818_v40 = vrot.slane %v7381_v47, %v9321_v11  ;;  %v1764_v33 = vld [vmem:[%s9270_s10 + $0x178] sm:$0xff] }
0x3546   :  { %v6238_v18 = vpop.f32.mrb[77].mxu0 }
0x3547   :  { %v5473_v1 = vadd.f32 %v5435_v60, %v8713_v59  ;;  %v6239_v10 = vadd.f32 %v6238_v18, %v6237_v25  ;;  %v6994_v60 = vpack.c.bf16 %v1764_v33, %v1763_v5 }
0x3549   :  { %v6973_v24 = vpack.c.bf16 %v5473_v1, %v5472_v39  ;;  %v6240_v14 = vpop.f32.mrb[78].mxu0  ;;  %v5440_v46 = vadd.f32 %v6239_v10, %v9161_v26  ;;  %v1684_v1 = vld [vmem:[%s9267_s7 + $0x10] sm:$0x3]  ;;  %s7424_s7 = smov [#allocation3]  }
0x354a   :  { %v6241_v42 = vpop.f32.mrb[79].mxu0  ;;  %v5571_v10 = vrot.slane %v1684_v1, %v9321_v11  ;;  %s5832_s10 = sshll.u32 %s7424_s7, 4  ;;  %s5833_s10 = int_to_ptr.vmem [resolvable:$true] %s5832_s10 }
0x354b   :  { %v6242_v38 = vadd.f32 %v6241_v42, %v6240_v14  ;;  %6974 = vmatpush3.bf16.msra.mxu1 %v6973_v24  ;;  %v5474_v2 = vadd.f32 %v5440_v46, %v8707_v53  ;;  %v9322_v42 = vld [vmem:[#allocation8_spill] sm:$0xff]  ;;  %s7389_s26 = scalar_lea.vmem %s5833_s10, 32  ;;  %p7394_p1 = scmp.lt.s32.totalorder %s5833_s10, %s5833_s10 }
0x354c   :  { %6975 = vmatprep.subr.bf16.mxu1 %v9315_v56  ;;  %v5576_v46 = vrot.slane %v1684_v1, %v9322_v42  ;;  %p7390_p0 = scmp.ne.s32.totalorder %s5833_s10, %s7389_s26  ;;  %p7395_p2 = scmp.lt.s32.totalorder %s7389_s26, %s7389_s26 }
0x354d   :  { %v5445_v17 = vadd.f32 %v6242_v38, %v9161_v26  ;;  %v6243_v8 = vpop.f32.mrb[80].mxu0 }
0x354e   :  { %v6244_v27 = vpop.f32.mrb[81].mxu0  ;;  %p7396_p3 = por %p7395_p2, %p7394_p1 }
0x354f   :  { %v5475_v63 = vadd.f32 %v5445_v17, %v8724_v37  ;;  %v6245_v61 = vadd.f32 %v6244_v27, %v6243_v8 }
0x3550   :  { %p7397_p4 = pnand %p7396_p3, %p7390_p0 }
0x3551   :  { %v6976_v59 = vpack.c.bf16 %v5475_v63, %v5474_v2  ;;  %v5450_v44 = vadd.f32 %v6245_v61, %v9161_v26 }
0x3552   :  { %v6246_v13 = vpop.f32.mrb[82].mxu0 }
0x3553   :  { %v6247_v32 = vpop.f32.mrb[83].mxu0  ;;  %6977 = vmatpush3.bf16.msra.mxu1 %v6976_v59  ;;  %v5476_v16 = vadd.f32 %v5450_v44, %v8719_v6  ;;  %v9323_v44 = vld [vmem:[#allocation12_spill] sm:$0xff] }
0x3554   :  { %v6248_v0 = vadd.f32 %v6247_v32, %v6246_v13  ;;  %6978 = vmatprep.subr.bf16.mxu1 %v9315_v56 }
0x3556   :  { %v5455_v20 = vadd.f32 %v6248_v0, %v9161_v26  ;;  %v5731_v0 = vrot.slane %v9323_v44, 1 }
0x3558   :  { %v5477_v58 = vadd.f32 %v5455_v20, %v8732_v43  ;;  %v1681_v43 = vld [vmem:[%s9261_s1] sm:$0x3f] }
0x355a   :  { %v6979_v21 = vpack.c.bf16 %v5477_v58, %v5476_v16 }
0x355c   :  { %6980 = vmatpush3.bf16.msra.mxu1 %v6979_v21 }
0x355d   :  { %6981 = vmatprep.subr.bf16.mxu1 %v9315_v56 }
0x35bc   :  { %v6249_v53 = vpop.f32.mrb[84].mxu0 }
0x35bd   :  { %v6250_v37 = vpop.f32.mrb[85].mxu0 }
0x35be   :  { %v6251_v45 = vadd.f32 %v6250_v37, %v6249_v53 }
0x35c0   :  { %v6252_v50 = vpop.f32.mrb[86].mxu0  ;;  %v5460_v7 = vadd.f32 %v6251_v45, %v9161_v26 }
0x35c1   :  { %v6253_v19 = vpop.f32.mrb[87].mxu0 }
0x35c2   :  { %v6254_v35 = vadd.f32 %v6253_v19, %v6252_v50  ;;  %v5478_v12 = vadd.f32 %v5460_v7, %v8756_v49 }
0x35c4   :  { %v5465_v52 = vadd.f32 %v6254_v35, %v9161_v26 }
0x35c6   :  { %v5479_v6 = vadd.f32 %v5465_v52, %v8753_v3 }
0x35c8   :  { %v6982_v23 = vpack.c.bf16 %v5479_v6, %v5478_v12 }
0x35ca   :  { %6983 = vmatpush3.bf16.msra.mxu1 %v6982_v23 }
0x35cb   :  { %6984 = vmatprep.subr.bf16.mxu1 %v9315_v56 }
0x35cd   :  { %6637 = vmatmul.mubr.msk.f32.vlgmr.msra.gmra.mrb[78].mxu1 %vm5480_vm2, %v1681_v43 }
0x35ce   :  { %6655 = vmatprep.mubr.msk.f32.mxu1 %vm7415_vm4, %v9309_v28  ;;  %6986 = vmatpush3.bf16.msra.mxu1 %v6985_v29 }
0x35cf   :  { %6987 = vmatprep.subr.bf16.mxu1 %v9315_v56 }
0x35d2   :  { %6989 = vmatpush3.bf16.msra.mxu1 %v6988_v51 }
0x35d3   :  { %6990 = vmatprep.subr.bf16.mxu1 %v9315_v56 }
0x35d6   :  { %6992 = vmatpush3.bf16.msra.mxu1 %v6991_v22 }
0x35d7   :  { %6993 = vmatprep.subr.bf16.mxu1 %v9315_v56 }
0x35da   :  { %6995 = vmatpush3.bf16.msra.mxu1 %v6994_v60 }
0x35db   :  { %6658 = vmatprep.subr.mxu1 %v9309_v28 }
0x36a0   :  { %v5550_v54 = vpop.f32.mrb[78].mxu1 }
0x36a1   :  { %v5555_v26 = vsel %vm5554_vm6, %v5550_v54, 0.0  ;;  %v6638_v49 = vpop.f32.mrb[79].mxu1 }
0x36a2   :  { %5556 = vadd.xlane.f32.xlu0 %v5555_v26 }
0x372f   :  { %v5557_v3 = vpop.xlane.xlu0 %5556 }
0x3730   :  { %v5558_v57 = vmul.f32 0.015625, %v5557_v3 }
0x3732   :  { %v5559_v41 = vsub.f32 %v5550_v54, %v5558_v57 }
0x3734   :  { %v5560_v55 = vmul.f32 %v5559_v41, %v5559_v41 }
0x3736   :  { %v5561_v30 = vsel %vm5554_vm6, %v5560_v55, 0.0 }
0x3737   :  { %5562 = vadd.xlane.f32.xlu1 %v5561_v30 }
0x3748   :  { %5820 = vperm.xlu1 %7008, %v5818_v40  }
0x37c4   :  { %v5563_v25 = vpop.xlane.xlu1 %5562 }
0x37c5   :  { %v5564_v18 = vmul.f32 0.015625, %v5563_v25 }
0x37c7   :  { %v5565_v39 = vadd.f32 1e-05, %v5564_v18 }
0x37c8   :  { %v5821_v37 = vpop.permute.xlu1 %5820 }
0x37c9   :  { %7382 = vrsqrt.f32 %v5565_v39 }
0x37d3   :  { %v7383_v24 = vpop.eup %7382 }
0x37d4   :  { %v5567_v14 = vmul.f32 %v7383_v24, %v5559_v41 }
0x37d6   :  { %v5572_v38 = vmul.f32 %v5571_v10, %v5567_v14 }
0x37d8   :  { %v5577_v17 = vadd.f32 %v5576_v46, %v5572_v38 }
0x37da   :  { %6656 = vmatmul.mubr.msk.f32.vlgmr.msra.gmra.mrb[80].mxu1 %vm112_vm0, %v5577_v17 }
0x37db   :  { %6660 = vmatprep.mubr.msk.f32.mxu1 %vm7415_vm4, %v9309_v28 }
0x38ad   :  { %v5647_v56 = vpop.f32.mrb[80].mxu1 }
0x38ae   :  { %v5651_v8 = vmul.f32 %v5647_v56, %v5647_v56  ;;  %v6657_v27 = vpop.f32.mrb[81].mxu1 }
0x38b0   :  { %v5652_v2 = vsel %vm5554_vm6, %v5651_v8, 0.0 }
0x38b1   :  { %5653 = vadd.xlane.f32.xlu0 %v5652_v2 }
0x393e   :  { %v5654_v63 = vpop.xlane.xlu0 %5653 }
0x393f   :  { %v5655_v61 = vadd.f32 1e-12, %v5654_v63 }
0x3941   :  { %7384 = vrsqrt.f32 %v5655_v61 }
0x394b   :  { %v7385_v59 = vpop.eup %7384 }
0x394c   :  { %v5657_v13 = vmul.f32 %v7385_v59, %v5647_v56 }
0x394e   :  { %6659 = vmatpush3.xpose.msk.msra.mxu1 %vm112_vm0, %v5657_v13  ;;  %v5732_v32 = vrot.slane %v5657_v13, 3 }
0x394f   :  { %6663 = vmatprep.subr.mxu1 %v9309_v28 }
0x3951   :  { %6661 = vmatmul.mubr.msk.f32.vlgmr.msra.gmra.mrb[82].mxu1 %vm112_vm0, %v9323_v44 }
0x3952   :  { %6664 = vmatpush3.xpose.msk.msra.mxu1 %vm112_vm0, %v5732_v32  ;;  %6665 = vmatprep.mubr.msk.f32.mxu1 %vm7415_vm4, %v9309_v28 }
0x3955   :  { %6666 = vmatmul.mubr.msk.f32.vlgmr.msra.gmra.mrb[84].mxu1 %vm112_vm0, %v5731_v0 }
0x3a24   :  { %v5727_v20 = vpop.f32.mrb[82].mxu1 }
0x3a25   :  { %v6662_v16 = vpop.f32.mrb[83].mxu1 }
0x3a28   :  { %v5803_v58 = vpop.f32.mrb[84].mxu1 }
0x3a29   :  { %v5808_v21 = vrot.slane %v5803_v58, 7  ;;  %v6667_v53 = vpop.f32.mrb[85].mxu1 }
0x3a2b   :  { %v5810_v45 = vsel %vm1357_vm9, %v5727_v20, %v5808_v21 }
0x3a2c   :  { %v5823_v50 = vmul.f32 %v5821_v37, %v5810_v45 }
0x3a2e   :  { %5825 = vst.msk [vmem:[#allocation3] sm:$0x3] %vm5824_vm7, %v5823_v50 }
0x3a2f   :  { %7400 = shalt.err (!%p7397_p4)
}
0x3a30   :  { %s7401_s29 = scalar_lea.hbm %s9272_s12, 32 }
0x3a31   :  { %p7402_p5 = scmp.ne.s32.totalorder %s9272_s12, %s7401_s29  ;;  %p7405_p6 = scmp.lt.u32.totalorder %s7401_s29, %s9272_s12 }
0x3a33   :  { %p7407_p7 = pnand %p7405_p6, %p7402_p5 }
0x3a35   :  { %7410 = shalt.err (!%p7407_p7)
}
0x3a36   :  { %5835 = dma.vmem_to_hbm [thread:$0]  %s5833_s10, 32, %s9272_s12, [#allocation4]  }
0x3a37   :  { %7411 = dma.done.wait [#allocation4], 32  }
0x3a38   :  { %7412 = vsyncadd [#allocation4], 4294967264 }
0x3a39   :  { %5839 = vsyncpa [#allocation4], 1 }

</bundles_post_ra>
